<compile_context>
chip_gen: v5e
topology: v5e:2x2
jax: 0.10.0
libtpu: 0.0.40
codegen_flags: <defaults>
</compile_context>

<pallas_src>
import jax
import jax.numpy as jnp
from jax import lax
from jax.experimental import pallas as pl
from jax.experimental.pallas import tpu as pltpu

EPS = 1e-5  # nn.BatchNorm2d default eps

# For the stride-2, pad-1, 3x3 conv expressed on phase-split (space-to-depth)
# inputs: tap index di -> (row phase, row offset into the front-padded phase).
# Same mapping applies to dj for columns.
_TAP = {0: (1, 0), 1: (0, 1), 2: (1, 1)}


def _bn_relu(y, gamma, beta, *, relu, residual=None):
    """Training-mode BatchNorm over axis 0 (single-pass sums folded into a
    per-channel scale/shift) [+ residual] [+ ReLU].  y: (M, C) f32."""
    m = y.shape[0]
    s1 = jnp.sum(y, axis=0, keepdims=True)
    s2 = jnp.sum(y * y, axis=0, keepdims=True)
    mean = s1 * (1.0 / m)
    var = jnp.maximum(s2 * (1.0 / m) - mean * mean, 0.0)  # biased var (train mode)
    scale = gamma * lax.rsqrt(var + EPS)                   # EUP rsqrt
    shift = beta - mean * scale
    y = y * scale + shift
    if residual is not None:
        y = y + residual
    if relu:
        y = jnp.maximum(y, 0.0)
    return y


def _make_encoder_kernel(n, ho, wo, cin, cout):
    m = n * ho * wo

    def conv_s1(pad_ref, w_ref):
        """3x3 / stride-1 / pad-1 conv as a 9-tap MXU accumulation over the
        zero-padded VMEM activation scratch.  Returns (m, cout) f32 pre-BN."""
        acc = jnp.zeros((m, cout), jnp.float32)
        for di in range(3):
            for dj in range(3):
                tap = pad_ref[:, di:di + ho, dj:dj + wo, :]        # (n,ho,wo,cout)
                tap = tap.reshape(m, cout).astype(jnp.bfloat16)
                acc = acc + jnp.dot(tap, w_ref[3 * di + dj],
                                    preferred_element_type=jnp.float32)
        return acc

    def kernel(xph_ref, w1d_ref, w21_ref, w12_ref, w22_ref, g_ref, b_ref,
               o_ref, pad_ref):
        # ---- block1.conv1 (3x3, s2) fused with block1.downsample (1x1, s2) ----
        # Combined weight columns: [:cout] = conv1, [cout:] = downsample
        # (downsample weight lives only in the centre tap).
        acc = jnp.zeros((m, 2 * cout), jnp.float32)
        for di in range(3):
            pr, ro = _TAP[di]
            for dj in range(3):
                pc, co = _TAP[dj]
                tap = xph_ref[2 * pr + pc, :, ro:ro + ho, co:co + wo, :]
                tap = tap.reshape(m, cin).astype(jnp.bfloat16)
                acc = acc + jnp.dot(tap, w1d_ref[3 * di + dj],
                                    preferred_element_type=jnp.float32)
        y1 = _bn_relu(acc[:, :cout], g_ref[0], b_ref[0], relu=True)
        res1 = _bn_relu(acc[:, cout:], g_ref[1], b_ref[1], relu=False)

        # Zero the padded activation scratch once; only its interior is ever
        # rewritten, so the zero halo is reused by all three stride-1 convs.
        pad_ref[...] = jnp.zeros((n, ho + 2, wo + 2, cout), jnp.float32)

        # ---- block1.conv2 (3x3, s1) + BN + residual + ReLU ----
        pad_ref[:, 1:ho + 1, 1:wo + 1, :] = y1.reshape(n, ho, wo, cout)
        out1 = _bn_relu(conv_s1(pad_ref, w21_ref), g_ref[2], b_ref[2],
                        relu=True, residual=res1)

        # ---- block2.conv1 (3x3, s1) + BN + ReLU ----
        pad_ref[:, 1:ho + 1, 1:wo + 1, :] = out1.reshape(n, ho, wo, cout)
        y2 = _bn_relu(conv_s1(pad_ref, w12_ref), g_ref[3], b_ref[3], relu=True)

        # ---- block2.conv2 (3x3, s1) + BN + identity residual + ReLU ----
        pad_ref[:, 1:ho + 1, 1:wo + 1, :] = y2.reshape(n, ho, wo, cout)
        out = _bn_relu(conv_s1(pad_ref, w22_ref), g_ref[4], b_ref[4],
                       relu=True, residual=out1)

        o_ref[...] = out

    return kernel


# ---------------------------------------------------------------------------
# Wrapper: cheap layout prep (same byte count as x / weights) + one pallas_call
# ---------------------------------------------------------------------------
def encoder_forward(x, params):
    """x: (N,H,W,Cin) f32 NHWC.  Encoder(kernel_size=3, stride=2, padding=1)."""
    n, h, w, cin = x.shape
    assert h % 2 == 0 and w % 2 == 0
    ho, wo = h // 2, w // 2
    p1, p2 = params["block1"], params["block2"]
    cout = p1["w1"].shape[-1]
    m = n * ho * wo

    # Stride-2 phase split (space-to-depth): xph[2*pr+pc] = zero-front-pad of
    # x[:, pr::2, pc::2, :]  ->  (n, ho+1, wo+1, cin).  Same bytes as x; lets
    # the in-kernel stride-2 conv use contiguous static slices (no 9x im2col).
    xph = jnp.stack(
        [jnp.pad(x[:, pr::2, pc::2, :], ((0, 0), (1, 0), (1, 0), (0, 0)))
         for pr in (0, 1) for pc in (0, 1)], axis=0)

    # block1.conv1 weight (3,3,cin,cout) packed per tap and concatenated with
    # the 1x1 downsample weight (centre tap only) -> (9, cin, 2*cout), bf16.
    w1_taps = p1["w1"].reshape(9, cin, cout)
    wd_taps = jnp.zeros((9, cin, cout), jnp.float32).at[4].set(p1["wd"])
    w1d = jnp.concatenate([w1_taps, wd_taps], axis=-1).astype(jnp.bfloat16)

    w21 = p1["w2"].reshape(9, cout, cout).astype(jnp.bfloat16)
    w12 = p2["w1"].reshape(9, cout, cout).astype(jnp.bfloat16)
    w22 = p2["w2"].reshape(9, cout, cout).astype(jnp.bfloat16)

    # BN affine params, order: bn1_b1, bn_down_b1, bn2_b1, bn1_b2, bn2_b2.
    gammas = jnp.stack([p1["g1"], p1["gd"], p1["g2"], p2["g1"], p2["g2"]]
                       ).reshape(5, 1, cout)
    betas = jnp.stack([p1["b1"], p1["bd"], p1["b2"], p2["b1"], p2["b2"]]
                      ).reshape(5, 1, cout)

    vmem = pl.BlockSpec(memory_space=pltpu.MemorySpace.VMEM)
    out = pl.pallas_call(
        _make_encoder_kernel(n, ho, wo, cin, cout),
        out_shape=jax.ShapeDtypeStruct((m, cout), jnp.float32),
        in_specs=[vmem] * 7,
        out_specs=vmem,
        scratch_shapes=[pltpu.VMEM((n, ho + 2, wo + 2, cout), jnp.float32)],
    )(xph, w1d, w21, w12, w22, gammas, betas)
    return out.reshape(n, ho, wo, cout)


# TODO(synk): grouped convolution (groups > 1) is not implemented; the default
# groups=1 path of the PyTorch module is reproduced.


# ---------------------------------------------------------------------------
# Pure-JAX reference (lax.conv) for a self-check of the fused kernel
# ---------------------------------------------------------------------------
def _conv_ref(x, w, stride, padding):
    return lax.conv_general_dilated(
        x.astype(jnp.bfloat16), w.astype(jnp.bfloat16),
        window_strides=(stride, stride), padding=[(padding, padding)] * 2,
        dimension_numbers=("NHWC", "HWIO", "NHWC"),
        preferred_element_type=jnp.float32)


def _bn_ref(y, gamma, beta):
    mean = jnp.mean(y, axis=(0, 1, 2), keepdims=True)
    var = jnp.mean((y - mean) ** 2, axis=(0, 1, 2), keepdims=True)
    return (y - mean) * lax.rsqrt(var + EPS) * gamma + beta


def encoder_reference(x, params):
    def block(x, p, stride):
        out = jnp.maximum(_bn_ref(_conv_ref(x, p["w1"], stride, 1),
                                  p["g1"], p["b1"]), 0.0)
        out = _bn_ref(_conv_ref(out, p["w2"], 1, 1), p["g2"], p["b2"])
        if stride > 1:
            cin, cout = p["wd"].shape
            res = _bn_ref(_conv_ref(x, p["wd"].reshape(1, 1, cin, cout), stride, 0),
                          p["gd"], p["bd"])
        else:
            res = x
        return jnp.maximum(out + res, 0.0)

    return block(block(x, params["block1"], 2), params["block2"], 1)


# ---------------------------------------------------------------------------
# Deterministic parameter construction
# ---------------------------------------------------------------------------
def _init_block(key, cin, cout, k, stride):
    ks = jax.random.split(key, 8)
    p = {
        "w1": 0.1 * jax.random.normal(ks[0], (k, k, cin, cout), jnp.float32),
        "g1": 1.0 + 0.1 * jax.random.normal(ks[1], (cout,), jnp.float32),
        "b1": 0.1 * jax.random.normal(ks[2], (cout,), jnp.float32),
        "w2": 0.1 * jax.random.normal(ks[3], (k, k, cout, cout), jnp.float32),
        "g2": 1.0 + 0.1 * jax.random.normal(ks[4], (cout,), jnp.float32),
        "b2": 0.1 * jax.random.normal(ks[5], (cout,), jnp.float32),
    }
    if stride > 1:
        p["wd"] = 0.1 * jax.random.normal(ks[6], (cin, cout), jnp.float32)
        p["gd"] = 1.0 + 0.1 * jax.random.normal(ks[7], (cout,), jnp.float32)
        p["bd"] = jnp.zeros((cout,), jnp.float32)
    return p


if __name__ == "__main__":
    key = jax.random.PRNGKey(0)
    k_x, k_b1, k_b2 = jax.random.split(key, 3)

    # Encoder(in_planes=4, out_planes=8, kernel_size=3, stride=2, padding=1)
    N, H, W, CIN, COUT = 2, 16, 16, 4, 8
    x = jax.random.normal(k_x, (N, H, W, CIN), jnp.float32)  # NHWC (== NCHW [2,4,16,16])

    params = {
        "block1": _init_block(k_b1, CIN, COUT, 3, stride=2),
        "block2": _init_block(k_b2, COUT, COUT, 3, stride=1),
    }

    out = jax.block_until_ready(jax.jit(encoder_forward)(x, params))
    assert out.shape == (N, H // 2, W // 2, COUT), out.shape
    assert bool(jnp.all(jnp.isfinite(out)))

    # Numerical self-check against a pure-JAX/XLA reference of the same module.
    ref = jax.block_until_ready(encoder_reference(x, params))
    max_err = float(jnp.max(jnp.abs(out - ref)))
    assert bool(jnp.allclose(out, ref, atol=2e-2, rtol=2e-2)), max_err

    print("KERNEL_OK")
</pallas_src>

<mosaic_0001>
module attributes {stable_mosaic.version = 11 : i64} {
  func.func @kernel(%arg0: memref<4x2x9x9x4xf32, #tpu.memory_space<vmem>>, %arg1: memref<9x4x16xbf16, #tpu.memory_space<vmem>>, %arg2: memref<9x8x8xbf16, #tpu.memory_space<vmem>>, %arg3: memref<9x8x8xbf16, #tpu.memory_space<vmem>>, %arg4: memref<9x8x8xbf16, #tpu.memory_space<vmem>>, %arg5: memref<5x1x8xf32, #tpu.memory_space<vmem>>, %arg6: memref<5x1x8xf32, #tpu.memory_space<vmem>>, %arg7: memref<128x8xf32, #tpu.memory_space<vmem>>, %arg8: memref<2x10x10x8xf32, #tpu.memory_space<vmem>>) attributes {dimension_semantics = [], scalar_prefetch = 0 : i64, scratch_operands = 1 : i64, tpu.core_type = #tpu.core_type<tc>} {
    %cst = arith.constant 0.000000e+00 : f32
    %0 = vector.broadcast %cst : f32 to vector<128x16xf32>
    %c3 = arith.constant 3 : index
    %c0 = arith.constant 0 : index
    %c0_0 = arith.constant 0 : index
    %c0_1 = arith.constant 0 : index
    %c0_2 = arith.constant 0 : index
    %1 = vector.load %arg0[%c3, %c0, %c0_0, %c0_1, %c0_2] : memref<4x2x9x9x4xf32, #tpu.memory_space<vmem>>, vector<1x2x8x8x4xf32>
    %2 = vector.shape_cast %1 : vector<1x2x8x8x4xf32> to vector<2x8x8x4xf32>
    %3 = vector.shape_cast %2 : vector<2x8x8x4xf32> to vector<128x4xf32>
    %4 = arith.truncf %3 : vector<128x4xf32> to vector<128x4xbf16>
    %c0_3 = arith.constant 0 : index
    %c0_4 = arith.constant 0 : index
    %c0_5 = arith.constant 0 : index
    %5 = vector.load %arg1[%c0_3, %c0_4, %c0_5] : memref<9x4x16xbf16, #tpu.memory_space<vmem>>, vector<1x4x16xbf16>
    %6 = vector.shape_cast %5 : vector<1x4x16xbf16> to vector<4x16xbf16>
    %cst_6 = arith.constant dense<0.000000e+00> : vector<128x16xf32>
    %7 = tpu.matmul %4, %6, %cst_6 {dimension_numbers = #tpu.dot_dimension_numbers<[1], [0], [0], [1], [0, 0, 1, 1], [], []>} : vector<128x4xbf16>, vector<4x16xbf16>, vector<128x16xf32> -> vector<128x16xf32>
    %8 = arith.addf %0, %7 : vector<128x16xf32>
    %c2 = arith.constant 2 : index
    %c0_7 = arith.constant 0 : index
    %c0_8 = arith.constant 0 : index
    %c1 = arith.constant 1 : index
    %c0_9 = arith.constant 0 : index
    %9 = vector.load %arg0[%c2, %c0_7, %c0_8, %c1, %c0_9] : memref<4x2x9x9x4xf32, #tpu.memory_space<vmem>>, vector<1x2x8x8x4xf32>
    %10 = vector.shape_cast %9 : vector<1x2x8x8x4xf32> to vector<2x8x8x4xf32>
    %11 = vector.shape_cast %10 : vector<2x8x8x4xf32> to vector<128x4xf32>
    %12 = arith.truncf %11 : vector<128x4xf32> to vector<128x4xbf16>
    %c1_10 = arith.constant 1 : index
    %c0_11 = arith.constant 0 : index
    %c0_12 = arith.constant 0 : index
    %13 = vector.load %arg1[%c1_10, %c0_11, %c0_12] : memref<9x4x16xbf16, #tpu.memory_space<vmem>>, vector<1x4x16xbf16>
    %14 = vector.shape_cast %13 : vector<1x4x16xbf16> to vector<4x16xbf16>
    %cst_13 = arith.constant dense<0.000000e+00> : vector<128x16xf32>
    %15 = tpu.matmul %12, %14, %cst_13 {dimension_numbers = #tpu.dot_dimension_numbers<[1], [0], [0], [1], [0, 0, 1, 1], [], []>} : vector<128x4xbf16>, vector<4x16xbf16>, vector<128x16xf32> -> vector<128x16xf32>
    %16 = arith.addf %8, %15 : vector<128x16xf32>
    %c3_14 = arith.constant 3 : index
    %c0_15 = arith.constant 0 : index
    %c0_16 = arith.constant 0 : index
    %c1_17 = arith.constant 1 : index
    %c0_18 = arith.constant 0 : index
    %17 = vector.load %arg0[%c3_14, %c0_15, %c0_16, %c1_17, %c0_18] : memref<4x2x9x9x4xf32, #tpu.memory_space<vmem>>, vector<1x2x8x8x4xf32>
    %18 = vector.shape_cast %17 : vector<1x2x8x8x4xf32> to vector<2x8x8x4xf32>
    %19 = vector.shape_cast %18 : vector<2x8x8x4xf32> to vector<128x4xf32>
    %20 = arith.truncf %19 : vector<128x4xf32> to vector<128x4xbf16>
    %c2_19 = arith.constant 2 : index
    %c0_20 = arith.constant 0 : index
    %c0_21 = arith.constant 0 : index
    %21 = vector.load %arg1[%c2_19, %c0_20, %c0_21] : memref<9x4x16xbf16, #tpu.memory_space<vmem>>, vector<1x4x16xbf16>
    %22 = vector.shape_cast %21 : vector<1x4x16xbf16> to vector<4x16xbf16>
    %cst_22 = arith.constant dense<0.000000e+00> : vector<128x16xf32>
    %23 = tpu.matmul %20, %22, %cst_22 {dimension_numbers = #tpu.dot_dimension_numbers<[1], [0], [0], [1], [0, 0, 1, 1], [], []>} : vector<128x4xbf16>, vector<4x16xbf16>, vector<128x16xf32> -> vector<128x16xf32>
    %24 = arith.addf %16, %23 : vector<128x16xf32>
    %c1_23 = arith.constant 1 : index
    %c0_24 = arith.constant 0 : index
    %c1_25 = arith.constant 1 : index
    %c0_26 = arith.constant 0 : index
    %c0_27 = arith.constant 0 : index
    %25 = vector.load %arg0[%c1_23, %c0_24, %c1_25, %c0_26, %c0_27] : memref<4x2x9x9x4xf32, #tpu.memory_space<vmem>>, vector<1x2x8x8x4xf32>
    %26 = vector.shape_cast %25 : vector<1x2x8x8x4xf32> to vector<2x8x8x4xf32>
    %27 = vector.shape_cast %26 : vector<2x8x8x4xf32> to vector<128x4xf32>
    %28 = arith.truncf %27 : vector<128x4xf32> to vector<128x4xbf16>
    %c3_28 = arith.constant 3 : index
    %c0_29 = arith.constant 0 : index
    %c0_30 = arith.constant 0 : index
    %29 = vector.load %arg1[%c3_28, %c0_29, %c0_30] : memref<9x4x16xbf16, #tpu.memory_space<vmem>>, vector<1x4x16xbf16>
    %30 = vector.shape_cast %29 : vector<1x4x16xbf16> to vector<4x16xbf16>
    %cst_31 = arith.constant dense<0.000000e+00> : vector<128x16xf32>
    %31 = tpu.matmul %28, %30, %cst_31 {dimension_numbers = #tpu.dot_dimension_numbers<[1], [0], [0], [1], [0, 0, 1, 1], [], []>} : vector<128x4xbf16>, vector<4x16xbf16>, vector<128x16xf32> -> vector<128x16xf32>
    %32 = arith.addf %24, %31 : vector<128x16xf32>
    %c0_32 = arith.constant 0 : index
    %c0_33 = arith.constant 0 : index
    %c1_34 = arith.constant 1 : index
    %c1_35 = arith.constant 1 : index
    %c0_36 = arith.constant 0 : index
    %33 = vector.load %arg0[%c0_32, %c0_33, %c1_34, %c1_35, %c0_36] : memref<4x2x9x9x4xf32, #tpu.memory_space<vmem>>, vector<1x2x8x8x4xf32>
    %34 = vector.shape_cast %33 : vector<1x2x8x8x4xf32> to vector<2x8x8x4xf32>
    %35 = vector.shape_cast %34 : vector<2x8x8x4xf32> to vector<128x4xf32>
    %36 = arith.truncf %35 : vector<128x4xf32> to vector<128x4xbf16>
    %c4 = arith.constant 4 : index
    %c0_37 = arith.constant 0 : index
    %c0_38 = arith.constant 0 : index
    %37 = vector.load %arg1[%c4, %c0_37, %c0_38] : memref<9x4x16xbf16, #tpu.memory_space<vmem>>, vector<1x4x16xbf16>
    %38 = vector.shape_cast %37 : vector<1x4x16xbf16> to vector<4x16xbf16>
    %cst_39 = arith.constant dense<0.000000e+00> : vector<128x16xf32>
    %39 = tpu.matmul %36, %38, %cst_39 {dimension_numbers = #tpu.dot_dimension_numbers<[1], [0], [0], [1], [0, 0, 1, 1], [], []>} : vector<128x4xbf16>, vector<4x16xbf16>, vector<128x16xf32> -> vector<128x16xf32>
    %40 = arith.addf %32, %39 : vector<128x16xf32>
    %c1_40 = arith.constant 1 : index
    %c0_41 = arith.constant 0 : index
    %c1_42 = arith.constant 1 : index
    %c1_43 = arith.constant 1 : index
    %c0_44 = arith.constant 0 : index
    %41 = vector.load %arg0[%c1_40, %c0_41, %c1_42, %c1_43, %c0_44] : memref<4x2x9x9x4xf32, #tpu.memory_space<vmem>>, vector<1x2x8x8x4xf32>
    %42 = vector.shape_cast %41 : vector<1x2x8x8x4xf32> to vector<2x8x8x4xf32>
    %43 = vector.shape_cast %42 : vector<2x8x8x4xf32> to vector<128x4xf32>
    %44 = arith.truncf %43 : vector<128x4xf32> to vector<128x4xbf16>
    %c5 = arith.constant 5 : index
    %c0_45 = arith.constant 0 : index
    %c0_46 = arith.constant 0 : index
    %45 = vector.load %arg1[%c5, %c0_45, %c0_46] : memref<9x4x16xbf16, #tpu.memory_space<vmem>>, vector<1x4x16xbf16>
    %46 = vector.shape_cast %45 : vector<1x4x16xbf16> to vector<4x16xbf16>
    %cst_47 = arith.constant dense<0.000000e+00> : vector<128x16xf32>
    %47 = tpu.matmul %44, %46, %cst_47 {dimension_numbers = #tpu.dot_dimension_numbers<[1], [0], [0], [1], [0, 0, 1, 1], [], []>} : vector<128x4xbf16>, vector<4x16xbf16>, vector<128x16xf32> -> vector<128x16xf32>
    %48 = arith.addf %40, %47 : vector<128x16xf32>
    %c3_48 = arith.constant 3 : index
    %c0_49 = arith.constant 0 : index
    %c1_50 = arith.constant 1 : index
    %c0_51 = arith.constant 0 : index
    %c0_52 = arith.constant 0 : index
    %49 = vector.load %arg0[%c3_48, %c0_49, %c1_50, %c0_51, %c0_52] : memref<4x2x9x9x4xf32, #tpu.memory_space<vmem>>, vector<1x2x8x8x4xf32>
    %50 = vector.shape_cast %49 : vector<1x2x8x8x4xf32> to vector<2x8x8x4xf32>
    %51 = vector.shape_cast %50 : vector<2x8x8x4xf32> to vector<128x4xf32>
    %52 = arith.truncf %51 : vector<128x4xf32> to vector<128x4xbf16>
    %c6 = arith.constant 6 : index
    %c0_53 = arith.constant 0 : index
    %c0_54 = arith.constant 0 : index
    %53 = vector.load %arg1[%c6, %c0_53, %c0_54] : memref<9x4x16xbf16, #tpu.memory_space<vmem>>, vector<1x4x16xbf16>
    %54 = vector.shape_cast %53 : vector<1x4x16xbf16> to vector<4x16xbf16>
    %cst_55 = arith.constant dense<0.000000e+00> : vector<128x16xf32>
    %55 = tpu.matmul %52, %54, %cst_55 {dimension_numbers = #tpu.dot_dimension_numbers<[1], [0], [0], [1], [0, 0, 1, 1], [], []>} : vector<128x4xbf16>, vector<4x16xbf16>, vector<128x16xf32> -> vector<128x16xf32>
    %56 = arith.addf %48, %55 : vector<128x16xf32>
    %c2_56 = arith.constant 2 : index
    %c0_57 = arith.constant 0 : index
    %c1_58 = arith.constant 1 : index
    %c1_59 = arith.constant 1 : index
    %c0_60 = arith.constant 0 : index
    %57 = vector.load %arg0[%c2_56, %c0_57, %c1_58, %c1_59, %c0_60] : memref<4x2x9x9x4xf32, #tpu.memory_space<vmem>>, vector<1x2x8x8x4xf32>
    %58 = vector.shape_cast %57 : vector<1x2x8x8x4xf32> to vector<2x8x8x4xf32>
    %59 = vector.shape_cast %58 : vector<2x8x8x4xf32> to vector<128x4xf32>
    %60 = arith.truncf %59 : vector<128x4xf32> to vector<128x4xbf16>
    %c7 = arith.constant 7 : index
    %c0_61 = arith.constant 0 : index
    %c0_62 = arith.constant 0 : index
    %61 = vector.load %arg1[%c7, %c0_61, %c0_62] : memref<9x4x16xbf16, #tpu.memory_space<vmem>>, vector<1x4x16xbf16>
    %62 = vector.shape_cast %61 : vector<1x4x16xbf16> to vector<4x16xbf16>
    %cst_63 = arith.constant dense<0.000000e+00> : vector<128x16xf32>
    %63 = tpu.matmul %60, %62, %cst_63 {dimension_numbers = #tpu.dot_dimension_numbers<[1], [0], [0], [1], [0, 0, 1, 1], [], []>} : vector<128x4xbf16>, vector<4x16xbf16>, vector<128x16xf32> -> vector<128x16xf32>
    %64 = arith.addf %56, %63 : vector<128x16xf32>
    %c3_64 = arith.constant 3 : index
    %c0_65 = arith.constant 0 : index
    %c1_66 = arith.constant 1 : index
    %c1_67 = arith.constant 1 : index
    %c0_68 = arith.constant 0 : index
    %65 = vector.load %arg0[%c3_64, %c0_65, %c1_66, %c1_67, %c0_68] : memref<4x2x9x9x4xf32, #tpu.memory_space<vmem>>, vector<1x2x8x8x4xf32>
    %66 = vector.shape_cast %65 : vector<1x2x8x8x4xf32> to vector<2x8x8x4xf32>
    %67 = vector.shape_cast %66 : vector<2x8x8x4xf32> to vector<128x4xf32>
    %68 = arith.truncf %67 : vector<128x4xf32> to vector<128x4xbf16>
    %c8 = arith.constant 8 : index
    %c0_69 = arith.constant 0 : index
    %c0_70 = arith.constant 0 : index
    %69 = vector.load %arg1[%c8, %c0_69, %c0_70] : memref<9x4x16xbf16, #tpu.memory_space<vmem>>, vector<1x4x16xbf16>
    %70 = vector.shape_cast %69 : vector<1x4x16xbf16> to vector<4x16xbf16>
    %cst_71 = arith.constant dense<0.000000e+00> : vector<128x16xf32>
    %71 = tpu.matmul %68, %70, %cst_71 {dimension_numbers = #tpu.dot_dimension_numbers<[1], [0], [0], [1], [0, 0, 1, 1], [], []>} : vector<128x4xbf16>, vector<4x16xbf16>, vector<128x16xf32> -> vector<128x16xf32>
    %72 = arith.addf %64, %71 : vector<128x16xf32>
    %73 = vector.extract_strided_slice %72 {offsets = [0, 0], sizes = [128, 8], strides = [1, 1]} : vector<128x16xf32> to vector<128x8xf32>
    %c0_72 = arith.constant 0 : index
    %c0_73 = arith.constant 0 : index
    %c0_74 = arith.constant 0 : index
    %74 = vector.load %arg5[%c0_72, %c0_73, %c0_74] : memref<5x1x8xf32, #tpu.memory_space<vmem>>, vector<1x1x8xf32>
    %75 = vector.shape_cast %74 : vector<1x1x8xf32> to vector<1x8xf32>
    %c0_75 = arith.constant 0 : index
    %c0_76 = arith.constant 0 : index
    %c0_77 = arith.constant 0 : index
    %76 = vector.load %arg6[%c0_75, %c0_76, %c0_77] : memref<5x1x8xf32, #tpu.memory_space<vmem>>, vector<1x1x8xf32>
    %77 = vector.shape_cast %76 : vector<1x1x8xf32> to vector<1x8xf32>
    %cst_78 = arith.constant dense<0.000000e+00> : vector<8xf32>
    %78 = vector.multi_reduction <add>, %73, %cst_78 [0] : vector<128x8xf32> to vector<8xf32>
    %79 = vector.shape_cast %78 : vector<8xf32> to vector<1x8xf32>
    %80 = arith.mulf %73, %73 : vector<128x8xf32>
    %cst_79 = arith.constant dense<0.000000e+00> : vector<8xf32>
    %81 = vector.multi_reduction <add>, %80, %cst_79 [0] : vector<128x8xf32> to vector<8xf32>
    %82 = vector.shape_cast %81 : vector<8xf32> to vector<1x8xf32>
    %cst_80 = arith.constant 7.812500e-03 : f32
    %83 = vector.broadcast %cst_80 : f32 to vector<1x8xf32>
    %84 = arith.mulf %79, %83 : vector<1x8xf32>
    %cst_81 = arith.constant 7.812500e-03 : f32
    %85 = vector.broadcast %cst_81 : f32 to vector<1x8xf32>
    %86 = arith.mulf %82, %85 : vector<1x8xf32>
    %87 = arith.mulf %84, %84 : vector<1x8xf32>
    %88 = arith.subf %86, %87 : vector<1x8xf32>
    %cst_82 = arith.constant 0.000000e+00 : f32
    %89 = vector.broadcast %cst_82 : f32 to vector<1x8xf32>
    %90 = arith.maximumf %88, %89 : vector<1x8xf32>
    %cst_83 = arith.constant 9.99999974E-6 : f32
    %91 = vector.broadcast %cst_83 : f32 to vector<1x8xf32>
    %92 = arith.addf %90, %91 : vector<1x8xf32>
    %93 = math.rsqrt %92 : vector<1x8xf32>
    %94 = arith.mulf %75, %93 : vector<1x8xf32>
    %95 = arith.mulf %84, %94 : vector<1x8xf32>
    %96 = arith.subf %77, %95 : vector<1x8xf32>
    %97 = vector.broadcast %94 : vector<1x8xf32> to vector<128x8xf32>
    %98 = arith.mulf %73, %97 : vector<128x8xf32>
    %99 = vector.broadcast %96 : vector<1x8xf32> to vector<128x8xf32>
    %100 = arith.addf %98, %99 : vector<128x8xf32>
    %cst_84 = arith.constant 0.000000e+00 : f32
    %101 = vector.broadcast %cst_84 : f32 to vector<128x8xf32>
    %102 = arith.maximumf %100, %101 : vector<128x8xf32>
    %103 = vector.extract_strided_slice %72 {offsets = [0, 8], sizes = [128, 8], strides = [1, 1]} : vector<128x16xf32> to vector<128x8xf32>
    %c1_85 = arith.constant 1 : index
    %c0_86 = arith.constant 0 : index
    %c0_87 = arith.constant 0 : index
    %104 = vector.load %arg5[%c1_85, %c0_86, %c0_87] : memref<5x1x8xf32, #tpu.memory_space<vmem>>, vector<1x1x8xf32>
    %105 = vector.shape_cast %104 : vector<1x1x8xf32> to vector<1x8xf32>
    %c1_88 = arith.constant 1 : index
    %c0_89 = arith.constant 0 : index
    %c0_90 = arith.constant 0 : index
    %106 = vector.load %arg6[%c1_88, %c0_89, %c0_90] : memref<5x1x8xf32, #tpu.memory_space<vmem>>, vector<1x1x8xf32>
    %107 = vector.shape_cast %106 : vector<1x1x8xf32> to vector<1x8xf32>
    %cst_91 = arith.constant dense<0.000000e+00> : vector<8xf32>
    %108 = vector.multi_reduction <add>, %103, %cst_91 [0] : vector<128x8xf32> to vector<8xf32>
    %109 = vector.shape_cast %108 : vector<8xf32> to vector<1x8xf32>
    %110 = arith.mulf %103, %103 : vector<128x8xf32>
    %cst_92 = arith.constant dense<0.000000e+00> : vector<8xf32>
    %111 = vector.multi_reduction <add>, %110, %cst_92 [0] : vector<128x8xf32> to vector<8xf32>
    %112 = vector.shape_cast %111 : vector<8xf32> to vector<1x8xf32>
    %cst_93 = arith.constant 7.812500e-03 : f32
    %113 = vector.broadcast %cst_93 : f32 to vector<1x8xf32>
    %114 = arith.mulf %109, %113 : vector<1x8xf32>
    %cst_94 = arith.constant 7.812500e-03 : f32
    %115 = vector.broadcast %cst_94 : f32 to vector<1x8xf32>
    %116 = arith.mulf %112, %115 : vector<1x8xf32>
    %117 = arith.mulf %114, %114 : vector<1x8xf32>
    %118 = arith.subf %116, %117 : vector<1x8xf32>
    %cst_95 = arith.constant 0.000000e+00 : f32
    %119 = vector.broadcast %cst_95 : f32 to vector<1x8xf32>
    %120 = arith.maximumf %118, %119 : vector<1x8xf32>
    %cst_96 = arith.constant 9.99999974E-6 : f32
    %121 = vector.broadcast %cst_96 : f32 to vector<1x8xf32>
    %122 = arith.addf %120, %121 : vector<1x8xf32>
    %123 = math.rsqrt %122 : vector<1x8xf32>
    %124 = arith.mulf %105, %123 : vector<1x8xf32>
    %125 = arith.mulf %114, %124 : vector<1x8xf32>
    %126 = arith.subf %107, %125 : vector<1x8xf32>
    %127 = vector.broadcast %124 : vector<1x8xf32> to vector<128x8xf32>
    %128 = arith.mulf %103, %127 : vector<128x8xf32>
    %129 = vector.broadcast %126 : vector<1x8xf32> to vector<128x8xf32>
    %130 = arith.addf %128, %129 : vector<128x8xf32>
    %cst_97 = arith.constant 0.000000e+00 : f32
    %131 = vector.broadcast %cst_97 : f32 to vector<2x10x10x8xf32>
    %c0_98 = arith.constant 0 : index
    %c0_99 = arith.constant 0 : index
    %c0_100 = arith.constant 0 : index
    %c0_101 = arith.constant 0 : index
    %132 = vector.load %arg8[%c0_98, %c0_99, %c0_100, %c0_101] : memref<2x10x10x8xf32, #tpu.memory_space<vmem>>, vector<2x10x10x8xf32>
    tpu.vector_store %arg8[%c0_98, %c0_99, %c0_100, %c0_101], %131 {strides = array<i32>} : memref<2x10x10x8xf32, #tpu.memory_space<vmem>>, vector<2x10x10x8xf32>,
    %133 = vector.shape_cast %102 : vector<128x8xf32> to vector<2x8x8x8xf32>
    %c0_102 = arith.constant 0 : index
    %c1_103 = arith.constant 1 : index
    %c1_104 = arith.constant 1 : index
    %c0_105 = arith.constant 0 : index
    %134 = vector.load %arg8[%c0_102, %c1_103, %c1_104, %c0_105] : memref<2x10x10x8xf32, #tpu.memory_space<vmem>>, vector<2x8x8x8xf32>
    tpu.vector_store %arg8[%c0_102, %c1_103, %c1_104, %c0_105], %133 {strides = array<i32>} : memref<2x10x10x8xf32, #tpu.memory_space<vmem>>, vector<2x8x8x8xf32>,
    %cst_106 = arith.constant 0.000000e+00 : f32
    %135 = vector.broadcast %cst_106 : f32 to vector<128x8xf32>
    %c0_107 = arith.constant 0 : index
    %c0_108 = arith.constant 0 : index
    %c0_109 = arith.constant 0 : index
    %c0_110 = arith.constant 0 : index
    %136 = vector.load %arg8[%c0_107, %c0_108, %c0_109, %c0_110] : memref<2x10x10x8xf32, #tpu.memory_space<vmem>>, vector<2x8x8x8xf32>
    %137 = vector.shape_cast %136 : vector<2x8x8x8xf32> to vector<128x8xf32>
    %138 = arith.truncf %137 : vector<128x8xf32> to vector<128x8xbf16>
    %c0_111 = arith.constant 0 : index
    %c0_112 = arith.constant 0 : index
    %c0_113 = arith.constant 0 : index
    %139 = vector.load %arg2[%c0_111, %c0_112, %c0_113] : memref<9x8x8xbf16, #tpu.memory_space<vmem>>, vector<1x8x8xbf16>
    %140 = vector.shape_cast %139 : vector<1x8x8xbf16> to vector<8x8xbf16>
    %cst_114 = arith.constant dense<0.000000e+00> : vector<128x8xf32>
    %141 = tpu.matmul %138, %140, %cst_114 {dimension_numbers = #tpu.dot_dimension_numbers<[1], [0], [0], [1], [0, 0, 1, 1], [], []>} : vector<128x8xbf16>, vector<8x8xbf16>, vector<128x8xf32> -> vector<128x8xf32>
    %142 = arith.addf %135, %141 : vector<128x8xf32>
    %c0_115 = arith.constant 0 : index
    %c0_116 = arith.constant 0 : index
    %c1_117 = arith.constant 1 : index
    %c0_118 = arith.constant 0 : index
    %143 = vector.load %arg8[%c0_115, %c0_116, %c1_117, %c0_118] : memref<2x10x10x8xf32, #tpu.memory_space<vmem>>, vector<2x8x8x8xf32>
    %144 = vector.shape_cast %143 : vector<2x8x8x8xf32> to vector<128x8xf32>
    %145 = arith.truncf %144 : vector<128x8xf32> to vector<128x8xbf16>
    %c1_119 = arith.constant 1 : index
    %c0_120 = arith.constant 0 : index
    %c0_121 = arith.constant 0 : index
    %146 = vector.load %arg2[%c1_119, %c0_120, %c0_121] : memref<9x8x8xbf16, #tpu.memory_space<vmem>>, vector<1x8x8xbf16>
    %147 = vector.shape_cast %146 : vector<1x8x8xbf16> to vector<8x8xbf16>
    %cst_122 = arith.constant dense<0.000000e+00> : vector<128x8xf32>
    %148 = tpu.matmul %145, %147, %cst_122 {dimension_numbers = #tpu.dot_dimension_numbers<[1], [0], [0], [1], [0, 0, 1, 1], [], []>} : vector<128x8xbf16>, vector<8x8xbf16>, vector<128x8xf32> -> vector<128x8xf32>
    %149 = arith.addf %142, %148 : vector<128x8xf32>
    %c0_123 = arith.constant 0 : index
    %c0_124 = arith.constant 0 : index
    %c2_125 = arith.constant 2 : index
    %c0_126 = arith.constant 0 : index
    %150 = vector.load %arg8[%c0_123, %c0_124, %c2_125, %c0_126] : memref<2x10x10x8xf32, #tpu.memory_space<vmem>>, vector<2x8x8x8xf32>
    %151 = vector.shape_cast %150 : vector<2x8x8x8xf32> to vector<128x8xf32>
    %152 = arith.truncf %151 : vector<128x8xf32> to vector<128x8xbf16>
    %c2_127 = arith.constant 2 : index
    %c0_128 = arith.constant 0 : index
    %c0_129 = arith.constant 0 : index
    %153 = vector.load %arg2[%c2_127, %c0_128, %c0_129] : memref<9x8x8xbf16, #tpu.memory_space<vmem>>, vector<1x8x8xbf16>
    %154 = vector.shape_cast %153 : vector<1x8x8xbf16> to vector<8x8xbf16>
    %cst_130 = arith.constant dense<0.000000e+00> : vector<128x8xf32>
    %155 = tpu.matmul %152, %154, %cst_130 {dimension_numbers = #tpu.dot_dimension_numbers<[1], [0], [0], [1], [0, 0, 1, 1], [], []>} : vector<128x8xbf16>, vector<8x8xbf16>, vector<128x8xf32> -> vector<128x8xf32>
    %156 = arith.addf %149, %155 : vector<128x8xf32>
    %c0_131 = arith.constant 0 : index
    %c1_132 = arith.constant 1 : index
    %c0_133 = arith.constant 0 : index
    %c0_134 = arith.constant 0 : index
    %157 = vector.load %arg8[%c0_131, %c1_132, %c0_133, %c0_134] : memref<2x10x10x8xf32, #tpu.memory_space<vmem>>, vector<2x8x8x8xf32>
    %158 = vector.shape_cast %157 : vector<2x8x8x8xf32> to vector<128x8xf32>
    %159 = arith.truncf %158 : vector<128x8xf32> to vector<128x8xbf16>
    %c3_135 = arith.constant 3 : index
    %c0_136 = arith.constant 0 : index
    %c0_137 = arith.constant 0 : index
    %160 = vector.load %arg2[%c3_135, %c0_136, %c0_137] : memref<9x8x8xbf16, #tpu.memory_space<vmem>>, vector<1x8x8xbf16>
    %161 = vector.shape_cast %160 : vector<1x8x8xbf16> to vector<8x8xbf16>
    %cst_138 = arith.constant dense<0.000000e+00> : vector<128x8xf32>
    %162 = tpu.matmul %159, %161, %cst_138 {dimension_numbers = #tpu.dot_dimension_numbers<[1], [0], [0], [1], [0, 0, 1, 1], [], []>} : vector<128x8xbf16>, vector<8x8xbf16>, vector<128x8xf32> -> vector<128x8xf32>
    %163 = arith.addf %156, %162 : vector<128x8xf32>
    %c0_139 = arith.constant 0 : index
    %c1_140 = arith.constant 1 : index
    %c1_141 = arith.constant 1 : index
    %c0_142 = arith.constant 0 : index
    %164 = vector.load %arg8[%c0_139, %c1_140, %c1_141, %c0_142] : memref<2x10x10x8xf32, #tpu.memory_space<vmem>>, vector<2x8x8x8xf32>
    %165 = vector.shape_cast %164 : vector<2x8x8x8xf32> to vector<128x8xf32>
    %166 = arith.truncf %165 : vector<128x8xf32> to vector<128x8xbf16>
    %c4_143 = arith.constant 4 : index
    %c0_144 = arith.constant 0 : index
    %c0_145 = arith.constant 0 : index
    %167 = vector.load %arg2[%c4_143, %c0_144, %c0_145] : memref<9x8x8xbf16, #tpu.memory_space<vmem>>, vector<1x8x8xbf16>
    %168 = vector.shape_cast %167 : vector<1x8x8xbf16> to vector<8x8xbf16>
    %cst_146 = arith.constant dense<0.000000e+00> : vector<128x8xf32>
    %169 = tpu.matmul %166, %168, %cst_146 {dimension_numbers = #tpu.dot_dimension_numbers<[1], [0], [0], [1], [0, 0, 1, 1], [], []>} : vector<128x8xbf16>, vector<8x8xbf16>, vector<128x8xf32> -> vector<128x8xf32>
    %170 = arith.addf %163, %169 : vector<128x8xf32>
    %c0_147 = arith.constant 0 : index
    %c1_148 = arith.constant 1 : index
    %c2_149 = arith.constant 2 : index
    %c0_150 = arith.constant 0 : index
    %171 = vector.load %arg8[%c0_147, %c1_148, %c2_149, %c0_150] : memref<2x10x10x8xf32, #tpu.memory_space<vmem>>, vector<2x8x8x8xf32>
    %172 = vector.shape_cast %171 : vector<2x8x8x8xf32> to vector<128x8xf32>
    %173 = arith.truncf %172 : vector<128x8xf32> to vector<128x8xbf16>
    %c5_151 = arith.constant 5 : index
    %c0_152 = arith.constant 0 : index
    %c0_153 = arith.constant 0 : index
    %174 = vector.load %arg2[%c5_151, %c0_152, %c0_153] : memref<9x8x8xbf16, #tpu.memory_space<vmem>>, vector<1x8x8xbf16>
    %175 = vector.shape_cast %174 : vector<1x8x8xbf16> to vector<8x8xbf16>
    %cst_154 = arith.constant dense<0.000000e+00> : vector<128x8xf32>
    %176 = tpu.matmul %173, %175, %cst_154 {dimension_numbers = #tpu.dot_dimension_numbers<[1], [0], [0], [1], [0, 0, 1, 1], [], []>} : vector<128x8xbf16>, vector<8x8xbf16>, vector<128x8xf32> -> vector<128x8xf32>
    %177 = arith.addf %170, %176 : vector<128x8xf32>
    %c0_155 = arith.constant 0 : index
    %c2_156 = arith.constant 2 : index
    %c0_157 = arith.constant 0 : index
    %c0_158 = arith.constant 0 : index
    %178 = vector.load %arg8[%c0_155, %c2_156, %c0_157, %c0_158] : memref<2x10x10x8xf32, #tpu.memory_space<vmem>>, vector<2x8x8x8xf32>
    %179 = vector.shape_cast %178 : vector<2x8x8x8xf32> to vector<128x8xf32>
    %180 = arith.truncf %179 : vector<128x8xf32> to vector<128x8xbf16>
    %c6_159 = arith.constant 6 : index
    %c0_160 = arith.constant 0 : index
    %c0_161 = arith.constant 0 : index
    %181 = vector.load %arg2[%c6_159, %c0_160, %c0_161] : memref<9x8x8xbf16, #tpu.memory_space<vmem>>, vector<1x8x8xbf16>
    %182 = vector.shape_cast %181 : vector<1x8x8xbf16> to vector<8x8xbf16>
    %cst_162 = arith.constant dense<0.000000e+00> : vector<128x8xf32>
    %183 = tpu.matmul %180, %182, %cst_162 {dimension_numbers = #tpu.dot_dimension_numbers<[1], [0], [0], [1], [0, 0, 1, 1], [], []>} : vector<128x8xbf16>, vector<8x8xbf16>, vector<128x8xf32> -> vector<128x8xf32>
    %184 = arith.addf %177, %183 : vector<128x8xf32>
    %c0_163 = arith.constant 0 : index
    %c2_164 = arith.constant 2 : index
    %c1_165 = arith.constant 1 : index
    %c0_166 = arith.constant 0 : index
    %185 = vector.load %arg8[%c0_163, %c2_164, %c1_165, %c0_166] : memref<2x10x10x8xf32, #tpu.memory_space<vmem>>, vector<2x8x8x8xf32>
    %186 = vector.shape_cast %185 : vector<2x8x8x8xf32> to vector<128x8xf32>
    %187 = arith.truncf %186 : vector<128x8xf32> to vector<128x8xbf16>
    %c7_167 = arith.constant 7 : index
    %c0_168 = arith.constant 0 : index
    %c0_169 = arith.constant 0 : index
    %188 = vector.load %arg2[%c7_167, %c0_168, %c0_169] : memref<9x8x8xbf16, #tpu.memory_space<vmem>>, vector<1x8x8xbf16>
    %189 = vector.shape_cast %188 : vector<1x8x8xbf16> to vector<8x8xbf16>
    %cst_170 = arith.constant dense<0.000000e+00> : vector<128x8xf32>
    %190 = tpu.matmul %187, %189, %cst_170 {dimension_numbers = #tpu.dot_dimension_numbers<[1], [0], [0], [1], [0, 0, 1, 1], [], []>} : vector<128x8xbf16>, vector<8x8xbf16>, vector<128x8xf32> -> vector<128x8xf32>
    %191 = arith.addf %184, %190 : vector<128x8xf32>
    %c0_171 = arith.constant 0 : index
    %c2_172 = arith.constant 2 : index
    %c2_173 = arith.constant 2 : index
    %c0_174 = arith.constant 0 : index
    %192 = vector.load %arg8[%c0_171, %c2_172, %c2_173, %c0_174] : memref<2x10x10x8xf32, #tpu.memory_space<vmem>>, vector<2x8x8x8xf32>
    %193 = vector.shape_cast %192 : vector<2x8x8x8xf32> to vector<128x8xf32>
    %194 = arith.truncf %193 : vector<128x8xf32> to vector<128x8xbf16>
    %c8_175 = arith.constant 8 : index
    %c0_176 = arith.constant 0 : index
    %c0_177 = arith.constant 0 : index
    %195 = vector.load %arg2[%c8_175, %c0_176, %c0_177] : memref<9x8x8xbf16, #tpu.memory_space<vmem>>, vector<1x8x8xbf16>
    %196 = vector.shape_cast %195 : vector<1x8x8xbf16> to vector<8x8xbf16>
    %cst_178 = arith.constant dense<0.000000e+00> : vector<128x8xf32>
    %197 = tpu.matmul %194, %196, %cst_178 {dimension_numbers = #tpu.dot_dimension_numbers<[1], [0], [0], [1], [0, 0, 1, 1], [], []>} : vector<128x8xbf16>, vector<8x8xbf16>, vector<128x8xf32> -> vector<128x8xf32>
    %198 = arith.addf %191, %197 : vector<128x8xf32>
    %c2_179 = arith.constant 2 : index
    %c0_180 = arith.constant 0 : index
    %c0_181 = arith.constant 0 : index
    %199 = vector.load %arg5[%c2_179, %c0_180, %c0_181] : memref<5x1x8xf32, #tpu.memory_space<vmem>>, vector<1x1x8xf32>
    %200 = vector.shape_cast %199 : vector<1x1x8xf32> to vector<1x8xf32>
    %c2_182 = arith.constant 2 : index
    %c0_183 = arith.constant 0 : index
    %c0_184 = arith.constant 0 : index
    %201 = vector.load %arg6[%c2_182, %c0_183, %c0_184] : memref<5x1x8xf32, #tpu.memory_space<vmem>>, vector<1x1x8xf32>
    %202 = vector.shape_cast %201 : vector<1x1x8xf32> to vector<1x8xf32>
    %cst_185 = arith.constant dense<0.000000e+00> : vector<8xf32>
    %203 = vector.multi_reduction <add>, %198, %cst_185 [0] : vector<128x8xf32> to vector<8xf32>
    %204 = vector.shape_cast %203 : vector<8xf32> to vector<1x8xf32>
    %205 = arith.mulf %198, %198 : vector<128x8xf32>
    %cst_186 = arith.constant dense<0.000000e+00> : vector<8xf32>
    %206 = vector.multi_reduction <add>, %205, %cst_186 [0] : vector<128x8xf32> to vector<8xf32>
    %207 = vector.shape_cast %206 : vector<8xf32> to vector<1x8xf32>
    %cst_187 = arith.constant 7.812500e-03 : f32
    %208 = vector.broadcast %cst_187 : f32 to vector<1x8xf32>
    %209 = arith.mulf %204, %208 : vector<1x8xf32>
    %cst_188 = arith.constant 7.812500e-03 : f32
    %210 = vector.broadcast %cst_188 : f32 to vector<1x8xf32>
    %211 = arith.mulf %207, %210 : vector<1x8xf32>
    %212 = arith.mulf %209, %209 : vector<1x8xf32>
    %213 = arith.subf %211, %212 : vector<1x8xf32>
    %cst_189 = arith.constant 0.000000e+00 : f32
    %214 = vector.broadcast %cst_189 : f32 to vector<1x8xf32>
    %215 = arith.maximumf %213, %214 : vector<1x8xf32>
    %cst_190 = arith.constant 9.99999974E-6 : f32
    %216 = vector.broadcast %cst_190 : f32 to vector<1x8xf32>
    %217 = arith.addf %215, %216 : vector<1x8xf32>
    %218 = math.rsqrt %217 : vector<1x8xf32>
    %219 = arith.mulf %200, %218 : vector<1x8xf32>
    %220 = arith.mulf %209, %219 : vector<1x8xf32>
    %221 = arith.subf %202, %220 : vector<1x8xf32>
    %222 = vector.broadcast %219 : vector<1x8xf32> to vector<128x8xf32>
    %223 = arith.mulf %198, %222 : vector<128x8xf32>
    %224 = vector.broadcast %221 : vector<1x8xf32> to vector<128x8xf32>
    %225 = arith.addf %223, %224 : vector<128x8xf32>
    %226 = arith.addf %225, %130 : vector<128x8xf32>
    %cst_191 = arith.constant 0.000000e+00 : f32
    %227 = vector.broadcast %cst_191 : f32 to vector<128x8xf32>
    %228 = arith.maximumf %226, %227 : vector<128x8xf32>
    %229 = vector.shape_cast %228 : vector<128x8xf32> to vector<2x8x8x8xf32>
    %c0_192 = arith.constant 0 : index
    %c1_193 = arith.constant 1 : index
    %c1_194 = arith.constant 1 : index
    %c0_195 = arith.constant 0 : index
    %230 = vector.load %arg8[%c0_192, %c1_193, %c1_194, %c0_195] : memref<2x10x10x8xf32, #tpu.memory_space<vmem>>, vector<2x8x8x8xf32>
    tpu.vector_store %arg8[%c0_192, %c1_193, %c1_194, %c0_195], %229 {strides = array<i32>} : memref<2x10x10x8xf32, #tpu.memory_space<vmem>>, vector<2x8x8x8xf32>,
    %cst_196 = arith.constant 0.000000e+00 : f32
    %231 = vector.broadcast %cst_196 : f32 to vector<128x8xf32>
    %c0_197 = arith.constant 0 : index
    %c0_198 = arith.constant 0 : index
    %c0_199 = arith.constant 0 : index
    %c0_200 = arith.constant 0 : index
    %232 = vector.load %arg8[%c0_197, %c0_198, %c0_199, %c0_200] : memref<2x10x10x8xf32, #tpu.memory_space<vmem>>, vector<2x8x8x8xf32>
    %233 = vector.shape_cast %232 : vector<2x8x8x8xf32> to vector<128x8xf32>
    %234 = arith.truncf %233 : vector<128x8xf32> to vector<128x8xbf16>
    %c0_201 = arith.constant 0 : index
    %c0_202 = arith.constant 0 : index
    %c0_203 = arith.constant 0 : index
    %235 = vector.load %arg3[%c0_201, %c0_202, %c0_203] : memref<9x8x8xbf16, #tpu.memory_space<vmem>>, vector<1x8x8xbf16>
    %236 = vector.shape_cast %235 : vector<1x8x8xbf16> to vector<8x8xbf16>
    %cst_204 = arith.constant dense<0.000000e+00> : vector<128x8xf32>
    %237 = tpu.matmul %234, %236, %cst_204 {dimension_numbers = #tpu.dot_dimension_numbers<[1], [0], [0], [1], [0, 0, 1, 1], [], []>} : vector<128x8xbf16>, vector<8x8xbf16>, vector<128x8xf32> -> vector<128x8xf32>
    %238 = arith.addf %231, %237 : vector<128x8xf32>
    %c0_205 = arith.constant 0 : index
    %c0_206 = arith.constant 0 : index
    %c1_207 = arith.constant 1 : index
    %c0_208 = arith.constant 0 : index
    %239 = vector.load %arg8[%c0_205, %c0_206, %c1_207, %c0_208] : memref<2x10x10x8xf32, #tpu.memory_space<vmem>>, vector<2x8x8x8xf32>
    %240 = vector.shape_cast %239 : vector<2x8x8x8xf32> to vector<128x8xf32>
    %241 = arith.truncf %240 : vector<128x8xf32> to vector<128x8xbf16>
    %c1_209 = arith.constant 1 : index
    %c0_210 = arith.constant 0 : index
    %c0_211 = arith.constant 0 : index
    %242 = vector.load %arg3[%c1_209, %c0_210, %c0_211] : memref<9x8x8xbf16, #tpu.memory_space<vmem>>, vector<1x8x8xbf16>
    %243 = vector.shape_cast %242 : vector<1x8x8xbf16> to vector<8x8xbf16>
    %cst_212 = arith.constant dense<0.000000e+00> : vector<128x8xf32>
    %244 = tpu.matmul %241, %243, %cst_212 {dimension_numbers = #tpu.dot_dimension_numbers<[1], [0], [0], [1], [0, 0, 1, 1], [], []>} : vector<128x8xbf16>, vector<8x8xbf16>, vector<128x8xf32> -> vector<128x8xf32>
    %245 = arith.addf %238, %244 : vector<128x8xf32>
    %c0_213 = arith.constant 0 : index
    %c0_214 = arith.constant 0 : index
    %c2_215 = arith.constant 2 : index
    %c0_216 = arith.constant 0 : index
    %246 = vector.load %arg8[%c0_213, %c0_214, %c2_215, %c0_216] : memref<2x10x10x8xf32, #tpu.memory_space<vmem>>, vector<2x8x8x8xf32>
    %247 = vector.shape_cast %246 : vector<2x8x8x8xf32> to vector<128x8xf32>
    %248 = arith.truncf %247 : vector<128x8xf32> to vector<128x8xbf16>
    %c2_217 = arith.constant 2 : index
    %c0_218 = arith.constant 0 : index
    %c0_219 = arith.constant 0 : index
    %249 = vector.load %arg3[%c2_217, %c0_218, %c0_219] : memref<9x8x8xbf16, #tpu.memory_space<vmem>>, vector<1x8x8xbf16>
    %250 = vector.shape_cast %249 : vector<1x8x8xbf16> to vector<8x8xbf16>
    %cst_220 = arith.constant dense<0.000000e+00> : vector<128x8xf32>
    %251 = tpu.matmul %248, %250, %cst_220 {dimension_numbers = #tpu.dot_dimension_numbers<[1], [0], [0], [1], [0, 0, 1, 1], [], []>} : vector<128x8xbf16>, vector<8x8xbf16>, vector<128x8xf32> -> vector<128x8xf32>
    %252 = arith.addf %245, %251 : vector<128x8xf32>
    %c0_221 = arith.constant 0 : index
    %c1_222 = arith.constant 1 : index
    %c0_223 = arith.constant 0 : index
    %c0_224 = arith.constant 0 : index
    %253 = vector.load %arg8[%c0_221, %c1_222, %c0_223, %c0_224] : memref<2x10x10x8xf32, #tpu.memory_space<vmem>>, vector<2x8x8x8xf32>
    %254 = vector.shape_cast %253 : vector<2x8x8x8xf32> to vector<128x8xf32>
    %255 = arith.truncf %254 : vector<128x8xf32> to vector<128x8xbf16>
    %c3_225 = arith.constant 3 : index
    %c0_226 = arith.constant 0 : index
    %c0_227 = arith.constant 0 : index
    %256 = vector.load %arg3[%c3_225, %c0_226, %c0_227] : memref<9x8x8xbf16, #tpu.memory_space<vmem>>, vector<1x8x8xbf16>
    %257 = vector.shape_cast %256 : vector<1x8x8xbf16> to vector<8x8xbf16>
    %cst_228 = arith.constant dense<0.000000e+00> : vector<128x8xf32>
    %258 = tpu.matmul %255, %257, %cst_228 {dimension_numbers = #tpu.dot_dimension_numbers<[1], [0], [0], [1], [0, 0, 1, 1], [], []>} : vector<128x8xbf16>, vector<8x8xbf16>, vector<128x8xf32> -> vector<128x8xf32>
    %259 = arith.addf %252, %258 : vector<128x8xf32>
    %c0_229 = arith.constant 0 : index
    %c1_230 = arith.constant 1 : index
    %c1_231 = arith.constant 1 : index
    %c0_232 = arith.constant 0 : index
    %260 = vector.load %arg8[%c0_229, %c1_230, %c1_231, %c0_232] : memref<2x10x10x8xf32, #tpu.memory_space<vmem>>, vector<2x8x8x8xf32>
    %261 = vector.shape_cast %260 : vector<2x8x8x8xf32> to vector<128x8xf32>
    %262 = arith.truncf %261 : vector<128x8xf32> to vector<128x8xbf16>
    %c4_233 = arith.constant 4 : index
    %c0_234 = arith.constant 0 : index
    %c0_235 = arith.constant 0 : index
    %263 = vector.load %arg3[%c4_233, %c0_234, %c0_235] : memref<9x8x8xbf16, #tpu.memory_space<vmem>>, vector<1x8x8xbf16>
    %264 = vector.shape_cast %263 : vector<1x8x8xbf16> to vector<8x8xbf16>
    %cst_236 = arith.constant dense<0.000000e+00> : vector<128x8xf32>
    %265 = tpu.matmul %262, %264, %cst_236 {dimension_numbers = #tpu.dot_dimension_numbers<[1], [0], [0], [1], [0, 0, 1, 1], [], []>} : vector<128x8xbf16>, vector<8x8xbf16>, vector<128x8xf32> -> vector<128x8xf32>
    %266 = arith.addf %259, %265 : vector<128x8xf32>
    %c0_237 = arith.constant 0 : index
    %c1_238 = arith.constant 1 : index
    %c2_239 = arith.constant 2 : index
    %c0_240 = arith.constant 0 : index
    %267 = vector.load %arg8[%c0_237, %c1_238, %c2_239, %c0_240] : memref<2x10x10x8xf32, #tpu.memory_space<vmem>>, vector<2x8x8x8xf32>
    %268 = vector.shape_cast %267 : vector<2x8x8x8xf32> to vector<128x8xf32>
    %269 = arith.truncf %268 : vector<128x8xf32> to vector<128x8xbf16>
    %c5_241 = arith.constant 5 : index
    %c0_242 = arith.constant 0 : index
    %c0_243 = arith.constant 0 : index
    %270 = vector.load %arg3[%c5_241, %c0_242, %c0_243] : memref<9x8x8xbf16, #tpu.memory_space<vmem>>, vector<1x8x8xbf16>
    %271 = vector.shape_cast %270 : vector<1x8x8xbf16> to vector<8x8xbf16>
    %cst_244 = arith.constant dense<0.000000e+00> : vector<128x8xf32>
    %272 = tpu.matmul %269, %271, %cst_244 {dimension_numbers = #tpu.dot_dimension_numbers<[1], [0], [0], [1], [0, 0, 1, 1], [], []>} : vector<128x8xbf16>, vector<8x8xbf16>, vector<128x8xf32> -> vector<128x8xf32>
    %273 = arith.addf %266, %272 : vector<128x8xf32>
    %c0_245 = arith.constant 0 : index
    %c2_246 = arith.constant 2 : index
    %c0_247 = arith.constant 0 : index
    %c0_248 = arith.constant 0 : index
    %274 = vector.load %arg8[%c0_245, %c2_246, %c0_247, %c0_248] : memref<2x10x10x8xf32, #tpu.memory_space<vmem>>, vector<2x8x8x8xf32>
    %275 = vector.shape_cast %274 : vector<2x8x8x8xf32> to vector<128x8xf32>
    %276 = arith.truncf %275 : vector<128x8xf32> to vector<128x8xbf16>
    %c6_249 = arith.constant 6 : index
    %c0_250 = arith.constant 0 : index
    %c0_251 = arith.constant 0 : index
    %277 = vector.load %arg3[%c6_249, %c0_250, %c0_251] : memref<9x8x8xbf16, #tpu.memory_space<vmem>>, vector<1x8x8xbf16>
    %278 = vector.shape_cast %277 : vector<1x8x8xbf16> to vector<8x8xbf16>
    %cst_252 = arith.constant dense<0.000000e+00> : vector<128x8xf32>
    %279 = tpu.matmul %276, %278, %cst_252 {dimension_numbers = #tpu.dot_dimension_numbers<[1], [0], [0], [1], [0, 0, 1, 1], [], []>} : vector<128x8xbf16>, vector<8x8xbf16>, vector<128x8xf32> -> vector<128x8xf32>
    %280 = arith.addf %273, %279 : vector<128x8xf32>
    %c0_253 = arith.constant 0 : index
    %c2_254 = arith.constant 2 : index
    %c1_255 = arith.constant 1 : index
    %c0_256 = arith.constant 0 : index
    %281 = vector.load %arg8[%c0_253, %c2_254, %c1_255, %c0_256] : memref<2x10x10x8xf32, #tpu.memory_space<vmem>>, vector<2x8x8x8xf32>
    %282 = vector.shape_cast %281 : vector<2x8x8x8xf32> to vector<128x8xf32>
    %283 = arith.truncf %282 : vector<128x8xf32> to vector<128x8xbf16>
    %c7_257 = arith.constant 7 : index
    %c0_258 = arith.constant 0 : index
    %c0_259 = arith.constant 0 : index
    %284 = vector.load %arg3[%c7_257, %c0_258, %c0_259] : memref<9x8x8xbf16, #tpu.memory_space<vmem>>, vector<1x8x8xbf16>
    %285 = vector.shape_cast %284 : vector<1x8x8xbf16> to vector<8x8xbf16>
    %cst_260 = arith.constant dense<0.000000e+00> : vector<128x8xf32>
    %286 = tpu.matmul %283, %285, %cst_260 {dimension_numbers = #tpu.dot_dimension_numbers<[1], [0], [0], [1], [0, 0, 1, 1], [], []>} : vector<128x8xbf16>, vector<8x8xbf16>, vector<128x8xf32> -> vector<128x8xf32>
    %287 = arith.addf %280, %286 : vector<128x8xf32>
    %c0_261 = arith.constant 0 : index
    %c2_262 = arith.constant 2 : index
    %c2_263 = arith.constant 2 : index
    %c0_264 = arith.constant 0 : index
    %288 = vector.load %arg8[%c0_261, %c2_262, %c2_263, %c0_264] : memref<2x10x10x8xf32, #tpu.memory_space<vmem>>, vector<2x8x8x8xf32>
    %289 = vector.shape_cast %288 : vector<2x8x8x8xf32> to vector<128x8xf32>
    %290 = arith.truncf %289 : vector<128x8xf32> to vector<128x8xbf16>
    %c8_265 = arith.constant 8 : index
    %c0_266 = arith.constant 0 : index
    %c0_267 = arith.constant 0 : index
    %291 = vector.load %arg3[%c8_265, %c0_266, %c0_267] : memref<9x8x8xbf16, #tpu.memory_space<vmem>>, vector<1x8x8xbf16>
    %292 = vector.shape_cast %291 : vector<1x8x8xbf16> to vector<8x8xbf16>
    %cst_268 = arith.constant dense<0.000000e+00> : vector<128x8xf32>
    %293 = tpu.matmul %290, %292, %cst_268 {dimension_numbers = #tpu.dot_dimension_numbers<[1], [0], [0], [1], [0, 0, 1, 1], [], []>} : vector<128x8xbf16>, vector<8x8xbf16>, vector<128x8xf32> -> vector<128x8xf32>
    %294 = arith.addf %287, %293 : vector<128x8xf32>
    %c3_269 = arith.constant 3 : index
    %c0_270 = arith.constant 0 : index
    %c0_271 = arith.constant 0 : index
    %295 = vector.load %arg5[%c3_269, %c0_270, %c0_271] : memref<5x1x8xf32, #tpu.memory_space<vmem>>, vector<1x1x8xf32>
    %296 = vector.shape_cast %295 : vector<1x1x8xf32> to vector<1x8xf32>
    %c3_272 = arith.constant 3 : index
    %c0_273 = arith.constant 0 : index
    %c0_274 = arith.constant 0 : index
    %297 = vector.load %arg6[%c3_272, %c0_273, %c0_274] : memref<5x1x8xf32, #tpu.memory_space<vmem>>, vector<1x1x8xf32>
    %298 = vector.shape_cast %297 : vector<1x1x8xf32> to vector<1x8xf32>
    %cst_275 = arith.constant dense<0.000000e+00> : vector<8xf32>
    %299 = vector.multi_reduction <add>, %294, %cst_275 [0] : vector<128x8xf32> to vector<8xf32>
    %300 = vector.shape_cast %299 : vector<8xf32> to vector<1x8xf32>
    %301 = arith.mulf %294, %294 : vector<128x8xf32>
    %cst_276 = arith.constant dense<0.000000e+00> : vector<8xf32>
    %302 = vector.multi_reduction <add>, %301, %cst_276 [0] : vector<128x8xf32> to vector<8xf32>
    %303 = vector.shape_cast %302 : vector<8xf32> to vector<1x8xf32>
    %cst_277 = arith.constant 7.812500e-03 : f32
    %304 = vector.broadcast %cst_277 : f32 to vector<1x8xf32>
    %305 = arith.mulf %300, %304 : vector<1x8xf32>
    %cst_278 = arith.constant 7.812500e-03 : f32
    %306 = vector.broadcast %cst_278 : f32 to vector<1x8xf32>
    %307 = arith.mulf %303, %306 : vector<1x8xf32>
    %308 = arith.mulf %305, %305 : vector<1x8xf32>
    %309 = arith.subf %307, %308 : vector<1x8xf32>
    %cst_279 = arith.constant 0.000000e+00 : f32
    %310 = vector.broadcast %cst_279 : f32 to vector<1x8xf32>
    %311 = arith.maximumf %309, %310 : vector<1x8xf32>
    %cst_280 = arith.constant 9.99999974E-6 : f32
    %312 = vector.broadcast %cst_280 : f32 to vector<1x8xf32>
    %313 = arith.addf %311, %312 : vector<1x8xf32>
    %314 = math.rsqrt %313 : vector<1x8xf32>
    %315 = arith.mulf %296, %314 : vector<1x8xf32>
    %316 = arith.mulf %305, %315 : vector<1x8xf32>
    %317 = arith.subf %298, %316 : vector<1x8xf32>
    %318 = vector.broadcast %315 : vector<1x8xf32> to vector<128x8xf32>
    %319 = arith.mulf %294, %318 : vector<128x8xf32>
    %320 = vector.broadcast %317 : vector<1x8xf32> to vector<128x8xf32>
    %321 = arith.addf %319, %320 : vector<128x8xf32>
    %cst_281 = arith.constant 0.000000e+00 : f32
    %322 = vector.broadcast %cst_281 : f32 to vector<128x8xf32>
    %323 = arith.maximumf %321, %322 : vector<128x8xf32>
    %324 = vector.shape_cast %323 : vector<128x8xf32> to vector<2x8x8x8xf32>
    %c0_282 = arith.constant 0 : index
    %c1_283 = arith.constant 1 : index
    %c1_284 = arith.constant 1 : index
    %c0_285 = arith.constant 0 : index
    %325 = vector.load %arg8[%c0_282, %c1_283, %c1_284, %c0_285] : memref<2x10x10x8xf32, #tpu.memory_space<vmem>>, vector<2x8x8x8xf32>
    tpu.vector_store %arg8[%c0_282, %c1_283, %c1_284, %c0_285], %324 {strides = array<i32>} : memref<2x10x10x8xf32, #tpu.memory_space<vmem>>, vector<2x8x8x8xf32>,
    %cst_286 = arith.constant 0.000000e+00 : f32
    %326 = vector.broadcast %cst_286 : f32 to vector<128x8xf32>
    %c0_287 = arith.constant 0 : index
    %c0_288 = arith.constant 0 : index
    %c0_289 = arith.constant 0 : index
    %c0_290 = arith.constant 0 : index
    %327 = vector.load %arg8[%c0_287, %c0_288, %c0_289, %c0_290] : memref<2x10x10x8xf32, #tpu.memory_space<vmem>>, vector<2x8x8x8xf32>
    %328 = vector.shape_cast %327 : vector<2x8x8x8xf32> to vector<128x8xf32>
    %329 = arith.truncf %328 : vector<128x8xf32> to vector<128x8xbf16>
    %c0_291 = arith.constant 0 : index
    %c0_292 = arith.constant 0 : index
    %c0_293 = arith.constant 0 : index
    %330 = vector.load %arg4[%c0_291, %c0_292, %c0_293] : memref<9x8x8xbf16, #tpu.memory_space<vmem>>, vector<1x8x8xbf16>
    %331 = vector.shape_cast %330 : vector<1x8x8xbf16> to vector<8x8xbf16>
    %cst_294 = arith.constant dense<0.000000e+00> : vector<128x8xf32>
    %332 = tpu.matmul %329, %331, %cst_294 {dimension_numbers = #tpu.dot_dimension_numbers<[1], [0], [0], [1], [0, 0, 1, 1], [], []>} : vector<128x8xbf16>, vector<8x8xbf16>, vector<128x8xf32> -> vector<128x8xf32>
    %333 = arith.addf %326, %332 : vector<128x8xf32>
    %c0_295 = arith.constant 0 : index
    %c0_296 = arith.constant 0 : index
    %c1_297 = arith.constant 1 : index
    %c0_298 = arith.constant 0 : index
    %334 = vector.load %arg8[%c0_295, %c0_296, %c1_297, %c0_298] : memref<2x10x10x8xf32, #tpu.memory_space<vmem>>, vector<2x8x8x8xf32>
    %335 = vector.shape_cast %334 : vector<2x8x8x8xf32> to vector<128x8xf32>
    %336 = arith.truncf %335 : vector<128x8xf32> to vector<128x8xbf16>
    %c1_299 = arith.constant 1 : index
    %c0_300 = arith.constant 0 : index
    %c0_301 = arith.constant 0 : index
    %337 = vector.load %arg4[%c1_299, %c0_300, %c0_301] : memref<9x8x8xbf16, #tpu.memory_space<vmem>>, vector<1x8x8xbf16>
    %338 = vector.shape_cast %337 : vector<1x8x8xbf16> to vector<8x8xbf16>
    %cst_302 = arith.constant dense<0.000000e+00> : vector<128x8xf32>
    %339 = tpu.matmul %336, %338, %cst_302 {dimension_numbers = #tpu.dot_dimension_numbers<[1], [0], [0], [1], [0, 0, 1, 1], [], []>} : vector<128x8xbf16>, vector<8x8xbf16>, vector<128x8xf32> -> vector<128x8xf32>
    %340 = arith.addf %333, %339 : vector<128x8xf32>
    %c0_303 = arith.constant 0 : index
    %c0_304 = arith.constant 0 : index
    %c2_305 = arith.constant 2 : index
    %c0_306 = arith.constant 0 : index
    %341 = vector.load %arg8[%c0_303, %c0_304, %c2_305, %c0_306] : memref<2x10x10x8xf32, #tpu.memory_space<vmem>>, vector<2x8x8x8xf32>
    %342 = vector.shape_cast %341 : vector<2x8x8x8xf32> to vector<128x8xf32>
    %343 = arith.truncf %342 : vector<128x8xf32> to vector<128x8xbf16>
    %c2_307 = arith.constant 2 : index
    %c0_308 = arith.constant 0 : index
    %c0_309 = arith.constant 0 : index
    %344 = vector.load %arg4[%c2_307, %c0_308, %c0_309] : memref<9x8x8xbf16, #tpu.memory_space<vmem>>, vector<1x8x8xbf16>
    %345 = vector.shape_cast %344 : vector<1x8x8xbf16> to vector<8x8xbf16>
    %cst_310 = arith.constant dense<0.000000e+00> : vector<128x8xf32>
    %346 = tpu.matmul %343, %345, %cst_310 {dimension_numbers = #tpu.dot_dimension_numbers<[1], [0], [0], [1], [0, 0, 1, 1], [], []>} : vector<128x8xbf16>, vector<8x8xbf16>, vector<128x8xf32> -> vector<128x8xf32>
    %347 = arith.addf %340, %346 : vector<128x8xf32>
    %c0_311 = arith.constant 0 : index
    %c1_312 = arith.constant 1 : index
    %c0_313 = arith.constant 0 : index
    %c0_314 = arith.constant 0 : index
    %348 = vector.load %arg8[%c0_311, %c1_312, %c0_313, %c0_314] : memref<2x10x10x8xf32, #tpu.memory_space<vmem>>, vector<2x8x8x8xf32>
    %349 = vector.shape_cast %348 : vector<2x8x8x8xf32> to vector<128x8xf32>
    %350 = arith.truncf %349 : vector<128x8xf32> to vector<128x8xbf16>
    %c3_315 = arith.constant 3 : index
    %c0_316 = arith.constant 0 : index
    %c0_317 = arith.constant 0 : index
    %351 = vector.load %arg4[%c3_315, %c0_316, %c0_317] : memref<9x8x8xbf16, #tpu.memory_space<vmem>>, vector<1x8x8xbf16>
    %352 = vector.shape_cast %351 : vector<1x8x8xbf16> to vector<8x8xbf16>
    %cst_318 = arith.constant dense<0.000000e+00> : vector<128x8xf32>
    %353 = tpu.matmul %350, %352, %cst_318 {dimension_numbers = #tpu.dot_dimension_numbers<[1], [0], [0], [1], [0, 0, 1, 1], [], []>} : vector<128x8xbf16>, vector<8x8xbf16>, vector<128x8xf32> -> vector<128x8xf32>
    %354 = arith.addf %347, %353 : vector<128x8xf32>
    %c0_319 = arith.constant 0 : index
    %c1_320 = arith.constant 1 : index
    %c1_321 = arith.constant 1 : index
    %c0_322 = arith.constant 0 : index
    %355 = vector.load %arg8[%c0_319, %c1_320, %c1_321, %c0_322] : memref<2x10x10x8xf32, #tpu.memory_space<vmem>>, vector<2x8x8x8xf32>
    %356 = vector.shape_cast %355 : vector<2x8x8x8xf32> to vector<128x8xf32>
    %357 = arith.truncf %356 : vector<128x8xf32> to vector<128x8xbf16>
    %c4_323 = arith.constant 4 : index
    %c0_324 = arith.constant 0 : index
    %c0_325 = arith.constant 0 : index
    %358 = vector.load %arg4[%c4_323, %c0_324, %c0_325] : memref<9x8x8xbf16, #tpu.memory_space<vmem>>, vector<1x8x8xbf16>
    %359 = vector.shape_cast %358 : vector<1x8x8xbf16> to vector<8x8xbf16>
    %cst_326 = arith.constant dense<0.000000e+00> : vector<128x8xf32>
    %360 = tpu.matmul %357, %359, %cst_326 {dimension_numbers = #tpu.dot_dimension_numbers<[1], [0], [0], [1], [0, 0, 1, 1], [], []>} : vector<128x8xbf16>, vector<8x8xbf16>, vector<128x8xf32> -> vector<128x8xf32>
    %361 = arith.addf %354, %360 : vector<128x8xf32>
    %c0_327 = arith.constant 0 : index
    %c1_328 = arith.constant 1 : index
    %c2_329 = arith.constant 2 : index
    %c0_330 = arith.constant 0 : index
    %362 = vector.load %arg8[%c0_327, %c1_328, %c2_329, %c0_330] : memref<2x10x10x8xf32, #tpu.memory_space<vmem>>, vector<2x8x8x8xf32>
    %363 = vector.shape_cast %362 : vector<2x8x8x8xf32> to vector<128x8xf32>
    %364 = arith.truncf %363 : vector<128x8xf32> to vector<128x8xbf16>
    %c5_331 = arith.constant 5 : index
    %c0_332 = arith.constant 0 : index
    %c0_333 = arith.constant 0 : index
    %365 = vector.load %arg4[%c5_331, %c0_332, %c0_333] : memref<9x8x8xbf16, #tpu.memory_space<vmem>>, vector<1x8x8xbf16>
    %366 = vector.shape_cast %365 : vector<1x8x8xbf16> to vector<8x8xbf16>
    %cst_334 = arith.constant dense<0.000000e+00> : vector<128x8xf32>
    %367 = tpu.matmul %364, %366, %cst_334 {dimension_numbers = #tpu.dot_dimension_numbers<[1], [0], [0], [1], [0, 0, 1, 1], [], []>} : vector<128x8xbf16>, vector<8x8xbf16>, vector<128x8xf32> -> vector<128x8xf32>
    %368 = arith.addf %361, %367 : vector<128x8xf32>
    %c0_335 = arith.constant 0 : index
    %c2_336 = arith.constant 2 : index
    %c0_337 = arith.constant 0 : index
    %c0_338 = arith.constant 0 : index
    %369 = vector.load %arg8[%c0_335, %c2_336, %c0_337, %c0_338] : memref<2x10x10x8xf32, #tpu.memory_space<vmem>>, vector<2x8x8x8xf32>
    %370 = vector.shape_cast %369 : vector<2x8x8x8xf32> to vector<128x8xf32>
    %371 = arith.truncf %370 : vector<128x8xf32> to vector<128x8xbf16>
    %c6_339 = arith.constant 6 : index
    %c0_340 = arith.constant 0 : index
    %c0_341 = arith.constant 0 : index
    %372 = vector.load %arg4[%c6_339, %c0_340, %c0_341] : memref<9x8x8xbf16, #tpu.memory_space<vmem>>, vector<1x8x8xbf16>
    %373 = vector.shape_cast %372 : vector<1x8x8xbf16> to vector<8x8xbf16>
    %cst_342 = arith.constant dense<0.000000e+00> : vector<128x8xf32>
    %374 = tpu.matmul %371, %373, %cst_342 {dimension_numbers = #tpu.dot_dimension_numbers<[1], [0], [0], [1], [0, 0, 1, 1], [], []>} : vector<128x8xbf16>, vector<8x8xbf16>, vector<128x8xf32> -> vector<128x8xf32>
    %375 = arith.addf %368, %374 : vector<128x8xf32>
    %c0_343 = arith.constant 0 : index
    %c2_344 = arith.constant 2 : index
    %c1_345 = arith.constant 1 : index
    %c0_346 = arith.constant 0 : index
    %376 = vector.load %arg8[%c0_343, %c2_344, %c1_345, %c0_346] : memref<2x10x10x8xf32, #tpu.memory_space<vmem>>, vector<2x8x8x8xf32>
    %377 = vector.shape_cast %376 : vector<2x8x8x8xf32> to vector<128x8xf32>
    %378 = arith.truncf %377 : vector<128x8xf32> to vector<128x8xbf16>
    %c7_347 = arith.constant 7 : index
    %c0_348 = arith.constant 0 : index
    %c0_349 = arith.constant 0 : index
    %379 = vector.load %arg4[%c7_347, %c0_348, %c0_349] : memref<9x8x8xbf16, #tpu.memory_space<vmem>>, vector<1x8x8xbf16>
    %380 = vector.shape_cast %379 : vector<1x8x8xbf16> to vector<8x8xbf16>
    %cst_350 = arith.constant dense<0.000000e+00> : vector<128x8xf32>
    %381 = tpu.matmul %378, %380, %cst_350 {dimension_numbers = #tpu.dot_dimension_numbers<[1], [0], [0], [1], [0, 0, 1, 1], [], []>} : vector<128x8xbf16>, vector<8x8xbf16>, vector<128x8xf32> -> vector<128x8xf32>
    %382 = arith.addf %375, %381 : vector<128x8xf32>
    %c0_351 = arith.constant 0 : index
    %c2_352 = arith.constant 2 : index
    %c2_353 = arith.constant 2 : index
    %c0_354 = arith.constant 0 : index
    %383 = vector.load %arg8[%c0_351, %c2_352, %c2_353, %c0_354] : memref<2x10x10x8xf32, #tpu.memory_space<vmem>>, vector<2x8x8x8xf32>
    %384 = vector.shape_cast %383 : vector<2x8x8x8xf32> to vector<128x8xf32>
    %385 = arith.truncf %384 : vector<128x8xf32> to vector<128x8xbf16>
    %c8_355 = arith.constant 8 : index
    %c0_356 = arith.constant 0 : index
    %c0_357 = arith.constant 0 : index
    %386 = vector.load %arg4[%c8_355, %c0_356, %c0_357] : memref<9x8x8xbf16, #tpu.memory_space<vmem>>, vector<1x8x8xbf16>
    %387 = vector.shape_cast %386 : vector<1x8x8xbf16> to vector<8x8xbf16>
    %cst_358 = arith.constant dense<0.000000e+00> : vector<128x8xf32>
    %388 = tpu.matmul %385, %387, %cst_358 {dimension_numbers = #tpu.dot_dimension_numbers<[1], [0], [0], [1], [0, 0, 1, 1], [], []>} : vector<128x8xbf16>, vector<8x8xbf16>, vector<128x8xf32> -> vector<128x8xf32>
    %389 = arith.addf %382, %388 : vector<128x8xf32>
    %c4_359 = arith.constant 4 : index
    %c0_360 = arith.constant 0 : index
    %c0_361 = arith.constant 0 : index
    %390 = vector.load %arg5[%c4_359, %c0_360, %c0_361] : memref<5x1x8xf32, #tpu.memory_space<vmem>>, vector<1x1x8xf32>
    %391 = vector.shape_cast %390 : vector<1x1x8xf32> to vector<1x8xf32>
    %c4_362 = arith.constant 4 : index
    %c0_363 = arith.constant 0 : index
    %c0_364 = arith.constant 0 : index
    %392 = vector.load %arg6[%c4_362, %c0_363, %c0_364] : memref<5x1x8xf32, #tpu.memory_space<vmem>>, vector<1x1x8xf32>
    %393 = vector.shape_cast %392 : vector<1x1x8xf32> to vector<1x8xf32>
    %cst_365 = arith.constant dense<0.000000e+00> : vector<8xf32>
    %394 = vector.multi_reduction <add>, %389, %cst_365 [0] : vector<128x8xf32> to vector<8xf32>
    %395 = vector.shape_cast %394 : vector<8xf32> to vector<1x8xf32>
    %396 = arith.mulf %389, %389 : vector<128x8xf32>
    %cst_366 = arith.constant dense<0.000000e+00> : vector<8xf32>
    %397 = vector.multi_reduction <add>, %396, %cst_366 [0] : vector<128x8xf32> to vector<8xf32>
    %398 = vector.shape_cast %397 : vector<8xf32> to vector<1x8xf32>
    %cst_367 = arith.constant 7.812500e-03 : f32
    %399 = vector.broadcast %cst_367 : f32 to vector<1x8xf32>
    %400 = arith.mulf %395, %399 : vector<1x8xf32>
    %cst_368 = arith.constant 7.812500e-03 : f32
    %401 = vector.broadcast %cst_368 : f32 to vector<1x8xf32>
    %402 = arith.mulf %398, %401 : vector<1x8xf32>
    %403 = arith.mulf %400, %400 : vector<1x8xf32>
    %404 = arith.subf %402, %403 : vector<1x8xf32>
    %cst_369 = arith.constant 0.000000e+00 : f32
    %405 = vector.broadcast %cst_369 : f32 to vector<1x8xf32>
    %406 = arith.maximumf %404, %405 : vector<1x8xf32>
    %cst_370 = arith.constant 9.99999974E-6 : f32
    %407 = vector.broadcast %cst_370 : f32 to vector<1x8xf32>
    %408 = arith.addf %406, %407 : vector<1x8xf32>
    %409 = math.rsqrt %408 : vector<1x8xf32>
    %410 = arith.mulf %391, %409 : vector<1x8xf32>
    %411 = arith.mulf %400, %410 : vector<1x8xf32>
    %412 = arith.subf %393, %411 : vector<1x8xf32>
    %413 = vector.broadcast %410 : vector<1x8xf32> to vector<128x8xf32>
    %414 = arith.mulf %389, %413 : vector<128x8xf32>
    %415 = vector.broadcast %412 : vector<1x8xf32> to vector<128x8xf32>
    %416 = arith.addf %414, %415 : vector<128x8xf32>
    %417 = arith.addf %416, %228 : vector<128x8xf32>
    %cst_371 = arith.constant 0.000000e+00 : f32
    %418 = vector.broadcast %cst_371 : f32 to vector<128x8xf32>
    %419 = arith.maximumf %417, %418 : vector<128x8xf32>
    %c0_372 = arith.constant 0 : index
    %c0_373 = arith.constant 0 : index
    %420 = vector.load %arg7[%c0_372, %c0_373] : memref<128x8xf32, #tpu.memory_space<vmem>>, vector<128x8xf32>
    tpu.vector_store %arg7[%c0_372, %c0_373], %419 {strides = array<i32>} : memref<128x8xf32, #tpu.memory_space<vmem>>, vector<128x8xf32>,
    return
  }
}

</mosaic_0001>

<bundles_post_ra>
// kernel: encoder_forward.1
= control target key start
LH: loop header
LB: loop body
LE: loop exit
PB: predicated region body
PF: predicated region fallthrough
CT: control target
= control target key end

     0   :  { %vm106_vm0 = vcmask 1041408   ;;  %vm81_vm1 = vcmask 31744   ;;  %s8993_s0 = inlined_call_operand.vmem [shape: f32[4,2,9,9,4], index: 0, kind: input, shape index: {}]   ;;  %s8994_s1 = inlined_call_operand.vmem [shape: bf16[9,4,16], index: 1, kind: input, shape index: {}]   ;;  %s8995_s2 = inlined_call_operand.vmem [shape: bf16[9,8,8], index: 2, kind: input, shape index: {}]   ;;  %s8996_s3 = inlined_call_operand.vmem [shape: bf16[9,8,8], index: 3, kind: input, shape index: {}]   ;;  %s8997_s4 = inlined_call_operand.vmem [shape: bf16[9,8,8], index: 4, kind: input, shape index: {}]   ;;  %s8998_s5 = inlined_call_operand.vmem [shape: f32[5,1,8], index: 5, kind: input, shape index: {}]   ;;  %s8999_s6 = inlined_call_operand.vmem [shape: f32[5,1,8], index: 6, kind: input, shape index: {}]   ;;  %s9000_s7 = inlined_call_operand.hbm [shape: f32[128,8], index: 7, kind: output, shape index: {}]  }
   0x1   :  { %v5221_v0 = vld [vmem:[%s8994_s1 + $0x2] sm:$0x3]  ;;  %v53_v1 = vld [vmem:[%s8994_s1] sm:$0x3]  ;;  %v5254_v5 = vld [vmem:[%s8994_s1 + $0x4] sm:$0x3] }
   0x2   :  { %v5205_v2 = vld [vmem:[%s8993_s0 + $0x241] sm:$0xff]  ;;  %v108_v3 = vsel %vm106_vm0, %v5221_v0, 0  ;;  %v184_v4 = vsel %vm106_vm0, %v53_v1, 0  ;;  %v286_v7 = vsel %vm106_vm0, %v5254_v5, 0  ;;  %v5769_v9 = vld [vmem:[%s8993_s0 + $0x251] sm:$0xff] }
   0x3   :  { %v5279_v6 = vld [vmem:[%s8994_s1 + $0x6] sm:$0x3]  ;;  %117 = vmatpush.bf16.msra.mxu0 %v108_v3  ;;  %193 = vmatpush.bf16.msra.mxu1 %v184_v4  ;;  %v5777_v11 = vld [vmem:[%s8993_s0 + $0x370] sm:$0xff]  ;;  %v71_v12 = vpack.c.bf16 %v5769_v9, %v5205_v2  ;;  %v5304_v16 = vld [vmem:[%s8994_s1 + $0x8] sm:$0x3] }
   0x4   :  { %v405_v8 = vsel %vm106_vm0, %v5279_v6, 0  ;;  %v5189_v10 = vld [vmem:[%s8993_s0 + $0x360] sm:$0xff]  ;;  %295 = vmatpush.bf16.msra.mxu2 %v286_v7  ;;  %v5787_v15 = vld [vmem:[%s8993_s0 + $0x371] sm:$0xff]  ;;  %v524_v18 = vsel %vm106_vm0, %v5304_v16, 0 }
   0x5   :  { %414 = vmatpush.bf16.msra.mxu3 %v405_v8  ;;  %v45_v13 = vpack.c.bf16 %v5777_v11, %v5189_v10  ;;  %v5238_v14 = vld [vmem:[%s8993_s0 + $0x361] sm:$0xff]  ;;  %v5263_v19 = vld [vmem:[%s8993_s0 + $0x130] sm:$0xff] }
   0x6   :  { %v251_v17 = vpack.c.bf16 %v5787_v15, %v5238_v14  ;;  %v5264_v20 = vld [vmem:[%s8993_s0 + $0x140] sm:$0xff]  ;;  %5222 = vmatmul.msk.bf16.vlgmr.msra.gmra.mxu0 %vm81_vm1, %v71_v12 }
   0x7   :  { %5230 = vmatmul.msk.bf16.vlgmr.msra.gmra.mxu1 %vm81_vm1, %v45_v13  ;;  %v370_v21 = vpack.c.bf16 %v5264_v20, %v5263_v19  ;;  %533 = vmatpush.bf16.msrb.mxu0 %v524_v18 }
   0x8   :  { %5255 = vmatmul.msk.bf16.vlgmr.msra.gmra.mxu2 %vm81_vm1, %v251_v17 }
   0x9   :  { %5280 = vmatmul.msk.bf16.vlgmr.msra.gmra.mxu3 %vm81_vm1, %v370_v21 }
   0xa   :  { %12 = vsyncpa [#allocation4], 0  ;;  %v5807_v22 = vld [vmem:[%s8993_s0 + $0x261] sm:$0xff]  ;;  %v5812_v23 = vld [vmem:[%s8993_s0 + $0x271] sm:$0xff]  ;;  %vm1512_vm2 = vcmask 1043456   ;;  %vm1067_vm3 = vcmask 64512  }
   0xb   :  { %v5817_v24 = vld [vmem:[%s8993_s0 + $0x380] sm:$0xff]  ;;  %v5822_v25 = vld [vmem:[%s8993_s0 + $0x390] sm:$0xff]  ;;  %v72_v30 = vpack.c.bf16 %v5812_v23, %v5807_v22  ;;  %v5354_v21 = vld [vmem:[%s8994_s1 + $0xc] sm:$0x3]  ;;  %vm1235_vm4 = vcmask 130112   ;;  %vm1380_vm5 = vcmask 58368  }
   0xc   :  { %v5827_v26 = vld [vmem:[%s8993_s0 + $0x381] sm:$0xff]  ;;  %v5832_v27 = vld [vmem:[%s8993_s0 + $0x391] sm:$0xff]  ;;  %v46_v31 = vpack.c.bf16 %v5822_v25, %v5817_v24  ;;  %s5703_s24 = smov 120   ;;  %s5704_s8 = smov 8  }
   0xd   :  { %v5265_v28 = vld [vmem:[%s8993_s0 + $0x150] sm:$0xff]  ;;  %v5266_v29 = vld [vmem:[%s8993_s0 + $0x160] sm:$0xff]  ;;  %v252_v32 = vpack.c.bf16 %v5832_v27, %v5827_v26 }
   0xe   :  { %v371_v33 = vpack.c.bf16 %v5266_v29, %v5265_v28  ;;  %v5853_v34 = vld [vmem:[%s8993_s0 + $0x281] sm:$0xff]  ;;  %v5858_v35 = vld [vmem:[%s8993_s0 + $0x291] sm:$0xff]  ;;  %v5379_v28 = vld [vmem:[%s8994_s1 + $0xe] sm:$0x3] }
   0xf   :  { %v5863_v36 = vld [vmem:[%s8993_s0 + $0x3a0] sm:$0xff]  ;;  %v5868_v37 = vld [vmem:[%s8993_s0 + $0x3b0] sm:$0xff]  ;;  %v73_v42 = vpack.c.bf16 %v5858_v35, %v5853_v34  ;;  %v5329_v29 = vld [vmem:[%s8994_s1 + $0xa] sm:$0x3] }
  0x10   :  { %v5873_v38 = vld [vmem:[%s8993_s0 + $0x3a1] sm:$0xff]  ;;  %v5878_v39 = vld [vmem:[%s8993_s0 + $0x3b1] sm:$0xff]  ;;  %v47_v43 = vpack.c.bf16 %v5868_v37, %v5863_v36 }
  0x11   :  { %v5267_v40 = vld [vmem:[%s8993_s0 + $0x170] sm:$0xff]  ;;  %v5268_v41 = vld [vmem:[%s8993_s0 + $0x180] sm:$0xff]  ;;  %v253_v44 = vpack.c.bf16 %v5878_v39, %v5873_v38 }
  0x12   :  { %v372_v45 = vpack.c.bf16 %v5268_v41, %v5267_v40  ;;  %v5899_v46 = vld [vmem:[%s8993_s0 + $0x2a1] sm:$0xff]  ;;  %v5904_v47 = vld [vmem:[%s8993_s0 + $0x2b1] sm:$0xff] }
  0x13   :  { %v5909_v48 = vld [vmem:[%s8993_s0 + $0x3c0] sm:$0xff]  ;;  %v5914_v49 = vld [vmem:[%s8993_s0 + $0x3d0] sm:$0xff]  ;;  %v74_v54 = vpack.c.bf16 %v5904_v47, %v5899_v46 }
  0x14   :  { %v5919_v50 = vld [vmem:[%s8993_s0 + $0x3c1] sm:$0xff]  ;;  %v5924_v51 = vld [vmem:[%s8993_s0 + $0x3d1] sm:$0xff]  ;;  %v48_v55 = vpack.c.bf16 %v5914_v49, %v5909_v48 }
  0x15   :  { %v5269_v52 = vld [vmem:[%s8993_s0 + $0x190] sm:$0xff]  ;;  %v5270_v53 = vld [vmem:[%s8993_s0 + $0x1a0] sm:$0xff]  ;;  %v254_v56 = vpack.c.bf16 %v5924_v51, %v5919_v50 }
  0x16   :  { %5223 = vmatmul.msk.bf16.gmra.mxu0 %vm81_vm1, %v72_v30  ;;  %v373_v57 = vpack.c.bf16 %v5270_v53, %v5269_v52  ;;  %v5213_v58 = vld [vmem:[%s8993_s0 + $0x2d1] sm:$0xff]  ;;  %v5948_v59 = vld [vmem:[%s8993_s0 + $0x2e1] sm:$0xff]  ;;  %v761_v30 = vsel %vm106_vm0, %v5354_v21, 0 }
  0x17   :  { %5231 = vmatmul.msk.bf16.gmra.mxu1 %vm81_vm1, %v46_v31  ;;  %v5197_v60 = vld [vmem:[%s8993_s0 + $0x3f0] sm:$0xff]  ;;  %v5956_v61 = vld [vmem:[%s8993_s0 + $0x400] sm:$0xff]  ;;  %v75_v2 = vpack.c.bf16 %v5948_v59, %v5213_v58  ;;  %v880_v31 = vsel %vm106_vm0, %v5379_v28, 0  ;;  %770 = vmatpush.bf16.msrb.mxu2 %v761_v30 }
  0x18   :  { %5256 = vmatmul.msk.bf16.gmra.mxu2 %vm81_vm1, %v252_v32  ;;  %v5246_v62 = vld [vmem:[%s8993_s0 + $0x3f1] sm:$0xff]  ;;  %v5964_v63 = vld [vmem:[%s8993_s0 + $0x401] sm:$0xff]  ;;  %v49_v3 = vpack.c.bf16 %v5956_v61, %v5197_v60  ;;  %v642_v32 = vsel %vm106_vm0, %v5329_v29, 0  ;;  %889 = vmatpush.bf16.msrb.mxu3 %v880_v31 }
  0x19   :  { %5281 = vmatmul.msk.bf16.gmra.mxu3 %vm81_vm1, %v371_v33  ;;  %v5271_v0 = vld [vmem:[%s8993_s0 + $0x1c0] sm:$0xff]  ;;  %v5272_v1 = vld [vmem:[%s8993_s0 + $0x1d0] sm:$0xff]  ;;  %v255_v4 = vpack.c.bf16 %v5964_v63, %v5246_v62  ;;  %651 = vmatpush.bf16.msrb.mxu1 %v642_v32 }
  0x1a   :  { %v374_v5 = vpack.c.bf16 %v5272_v1, %v5271_v0  ;;  %v5982_v6 = vld [vmem:[%s8993_s0 + $0x2f1] sm:$0xff]  ;;  %v5987_v7 = vld [vmem:[%s8993_s0 + $0x301] sm:$0xff] }
  0x1b   :  { %v5992_v8 = vld [vmem:[%s8993_s0 + $0x410] sm:$0xff]  ;;  %v5997_v10 = vld [vmem:[%s8993_s0 + $0x420] sm:$0xff]  ;;  %v76_v17 = vpack.c.bf16 %v5987_v7, %v5982_v6 }
  0x1c   :  { %v6002_v12 = vld [vmem:[%s8993_s0 + $0x411] sm:$0xff]  ;;  %v6007_v13 = vld [vmem:[%s8993_s0 + $0x421] sm:$0xff]  ;;  %v50_v18 = vpack.c.bf16 %v5997_v10, %v5992_v8 }
  0x1d   :  { %v5273_v14 = vld [vmem:[%s8993_s0 + $0x1e0] sm:$0xff]  ;;  %v5274_v16 = vld [vmem:[%s8993_s0 + $0x1f0] sm:$0xff]  ;;  %v256_v19 = vpack.c.bf16 %v6007_v13, %v6002_v12 }
  0x1e   :  { %v375_v20 = vpack.c.bf16 %v5274_v16, %v5273_v14  ;;  %v6040_v33 = vld [vmem:[%s8993_s0 + $0x311] sm:$0xff]  ;;  %v6045_v40 = vld [vmem:[%s8993_s0 + $0x321] sm:$0xff] }
  0x1f   :  { %v6050_v41 = vld [vmem:[%s8993_s0 + $0x430] sm:$0xff]  ;;  %v77_v53 = vpack.c.bf16 %v6045_v40, %v6040_v33  ;;  %v6095_v62 = vld [vmem:[%s8993_s0 + $0x341] sm:$0xff] }
  0x20   :  { %v5276_v52 = vld [vmem:[%s8993_s0 + $0x210] sm:$0xff]  ;;  %v6105_v1 = vld [vmem:[%s8993_s0 + $0x460] sm:$0xff] }
  0x21   :  { %v6090_v60 = vld [vmem:[%s8993_s0 + $0x331] sm:$0xff]  ;;  %v5314_v28 = vld [vmem:[%s8993_s0 + $0x141] sm:$0xff] }
  0x22   :  { %v6100_v0 = vld [vmem:[%s8993_s0 + $0x450] sm:$0xff]  ;;  %v78_v14 = vpack.c.bf16 %v6095_v62, %v6090_v60 }
  0x23   :  { %v52_v16 = vpack.c.bf16 %v6105_v1, %v6100_v0  ;;  %v5313_v21 = vld [vmem:[%s8993_s0 + $0x131] sm:$0xff] }
  0x24   :  { %v607_v30 = vpack.c.bf16 %v5314_v28, %v5313_v21  ;;  %v727_v21 = vpack.c.bf16 %v5863_v36, %v5822_v25 }
  0x26   :  { %5224 = vmatmul.msk.bf16.gmra.mxu0 %vm81_vm1, %v73_v42  ;;  %v6055_v42 = vld [vmem:[%s8993_s0 + $0x440] sm:$0xff] }
  0x27   :  { %5232 = vmatmul.msk.bf16.gmra.mxu1 %vm81_vm1, %v47_v43  ;;  %v6060_v43 = vld [vmem:[%s8993_s0 + $0x431] sm:$0xff] }
  0x28   :  { %5257 = vmatmul.msk.bf16.gmra.mxu2 %vm81_vm1, %v253_v44  ;;  %v6065_v44 = vld [vmem:[%s8993_s0 + $0x441] sm:$0xff] }
  0x29   :  { %5282 = vmatmul.msk.bf16.gmra.mxu3 %vm81_vm1, %v372_v45  ;;  %v5275_v45 = vld [vmem:[%s8993_s0 + $0x200] sm:$0xff] }
  0x36   :  { %5225 = vmatmul.msk.bf16.gmra.mxu0 %vm81_vm1, %v74_v54  ;;  %v51_v54 = vpack.c.bf16 %v6055_v42, %v6050_v41 }
  0x37   :  { %5233 = vmatmul.msk.bf16.gmra.mxu1 %vm81_vm1, %v48_v55  ;;  %v257_v55 = vpack.c.bf16 %v6065_v44, %v6060_v43 }
  0x38   :  { %5258 = vmatmul.msk.bf16.gmra.mxu2 %vm81_vm1, %v254_v56  ;;  %v376_v56 = vpack.c.bf16 %v5276_v52, %v5275_v45  ;;  %v726_v45 = vpack.c.bf16 %v5817_v24, %v5777_v11  ;;  %v5291_v11 = vld [vmem:[%s8993_s0 + $0x41] sm:$0xff] }
  0x39   :  { %5283 = vmatmul.msk.bf16.gmra.mxu3 %vm81_vm1, %v373_v57  ;;  %v5404_v57 = vld [vmem:[%s8994_s1 + $0x10] sm:$0x3]  ;;  %v5316_v24 = vld [vmem:[%s8993_s0 + $0x161] sm:$0xff] }
  0x3a   :  { %v998_v58 = vsel %vm106_vm0, %v5404_v57, 0 }
  0x3b   :  { %1007 = vmatpush.bf16.msra.mxu0 %v998_v58 }
  0x46   :  { %5226 = vmatmul.msk.bf16.gmra.mxu0 %vm81_vm1, %v75_v2  ;;  %v6110_v2 = vld [vmem:[%s8993_s0 + $0x451] sm:$0xff] }
  0x47   :  { %5234 = vmatmul.msk.bf16.gmra.mxu1 %vm81_vm1, %v49_v3  ;;  %v6115_v3 = vld [vmem:[%s8993_s0 + $0x461] sm:$0xff] }
  0x48   :  { %5259 = vmatmul.msk.bf16.gmra.mxu2 %vm81_vm1, %v255_v4  ;;  %v5277_v4 = vld [vmem:[%s8993_s0 + $0x220] sm:$0xff] }
  0x49   :  { %5284 = vmatmul.msk.bf16.gmra.mxu3 %vm81_vm1, %v374_v5  ;;  %v5278_v5 = vld [vmem:[%s8993_s0 + $0x230] sm:$0xff] }
  0x56   :  { %5227 = vmatmul.msk.bf16.gmra.mxu0 %vm81_vm1, %v76_v17  ;;  %v258_v17 = vpack.c.bf16 %v6115_v3, %v6110_v2 }
  0x57   :  { %5235 = vmatmul.msk.bf16.gmra.mxu1 %vm81_vm1, %v50_v18  ;;  %v377_v18 = vpack.c.bf16 %v5278_v5, %v5277_v4 }
  0x58   :  { %5260 = vmatmul.msk.bf16.gmra.mxu2 %vm81_vm1, %v256_v19  ;;  %v5288_v19 = vld [vmem:[%s8993_s0 + $0x11] sm:$0xff] }
  0x59   :  { %5285 = vmatmul.msk.bf16.gmra.mxu3 %vm81_vm1, %v375_v20  ;;  %v5289_v20 = vld [vmem:[%s8993_s0 + $0x21] sm:$0xff] }
  0x5a   :  { %v489_v29 = vpack.c.bf16 %v5289_v20, %v5288_v19 }
  0x66   :  { %5228 = vmatmul.msk.bf16.gmra.mxu0 %vm81_vm1, %v77_v53  ;;  %v845_v53 = vpack.c.bf16 %v5807_v22, %v5769_v9  ;;  %v5290_v9 = vld [vmem:[%s8993_s0 + $0x31] sm:$0xff] }
  0x67   :  { %5236 = vmatmul.msk.bf16.gmra.mxu1 %vm81_vm1, %v51_v54  ;;  %v5315_v22 = vld [vmem:[%s8993_s0 + $0x151] sm:$0xff] }
  0x68   :  { %5261 = vmatmul.msk.bf16.gmra.mxu2 %vm81_vm1, %v257_v55 }
  0x69   :  { %5286 = vmatmul.msk.bf16.gmra.mxu3 %vm81_vm1, %v376_v56 }
  0x76   :  { %5229 = vmatmul.msk.bf16.gmra.mxu0 %vm81_vm1, %v78_v14 }
  0x77   :  { %5237 = vmatmul.msk.bf16.gmra.mxu1 %vm81_vm1, %v52_v16  ;;  %v490_v16 = vpack.c.bf16 %v5291_v11, %v5290_v9 }
  0x78   :  { %5262 = vmatmul.msk.bf16.gmra.mxu2 %vm81_vm1, %v258_v17  ;;  %v608_v17 = vpack.c.bf16 %v5316_v24, %v5315_v22  ;;  %v728_v24 = vpack.c.bf16 %v5909_v48, %v5868_v37 }
  0x79   :  { %5287 = vmatmul.msk.bf16.gmra.mxu3 %vm81_vm1, %v377_v18 }
  0x83   :  { %v119_v31 = vpop.f32.mrf.mxu0 }
  0x84   :  { %v195_v32 = vpop.f32.mrf.mxu1 }
  0x85   :  { %v196_v52 = vadd.f32 %v195_v32, %v119_v31 }
  0x86   :  { %5305 = vmatmul.msk.bf16.vlgmr.msrb.gmra.mxu0 %vm81_vm1, %v489_v29 }
  0x87   :  { %5330 = vmatmul.msk.bf16.vlgmr.msrb.gmra.mxu1 %vm81_vm1, %v607_v30  ;;  %v846_v30 = vpack.c.bf16 %v5853_v34, %v5812_v23  ;;  %v5292_v23 = vld [vmem:[%s8993_s0 + $0x51] sm:$0xff]  ;;  %v5293_v34 = vld [vmem:[%s8993_s0 + $0x61] sm:$0xff] }
  0x88   :  { %5355 = vmatmul.msk.bf16.vlgmr.msrb.gmra.mxu2 %vm81_vm1, %v726_v45 }
  0x89   :  { %5380 = vmatmul.msk.bf16.vlgmr.msrb.gmra.mxu3 %vm81_vm1, %v845_v53 }
  0x8b   :  { %v297_v54 = vpop.f32.mrf.mxu2  ;;  %v121_v56 = vpop.f32.mrf.mxu0 }
  0x8c   :  { %v337_v55 = vadd.f32 %v297_v54, %v196_v52  ;;  %v197_v57 = vpop.f32.mrf.mxu1  ;;  %v416_v4 = vpop.f32.mrf.mxu3 }
  0x8d   :  { %v198_v58 = vadd.f32 %v197_v57, %v121_v56  ;;  %v5318_v56 = vld [vmem:[%s8993_s0 + $0x181] sm:$0xff] }
  0x8e   :  { %v6153_v5 = vadd.f32 %v416_v4, %v337_v55  ;;  %v5317_v55 = vld [vmem:[%s8993_s0 + $0x171] sm:$0xff] }
  0x8f   :  { %v609_v4 = vpack.c.bf16 %v5318_v56, %v5317_v55 }
  0x93   :  { %v299_v14 = vpop.f32.mrf.mxu2  ;;  %v124_v19 = vpop.f32.mrf.mxu0 }
  0x94   :  { %v338_v18 = vadd.f32 %v299_v14, %v198_v58  ;;  %v200_v20 = vpop.f32.mrf.mxu1  ;;  %v418_v29 = vpop.f32.mrf.mxu3  ;;  %v491_v58 = vpack.c.bf16 %v5293_v34, %v5292_v23 }
  0x95   :  { %v201_v28 = vadd.f32 %v200_v20, %v124_v19 }
  0x96   :  { %v6171_v31 = vadd.f32 %v418_v29, %v338_v18  ;;  %5306 = vmatmul.msk.bf16.gmra.mxu0 %vm81_vm1, %v490_v16 }
  0x97   :  { %5331 = vmatmul.msk.bf16.gmra.mxu1 %vm81_vm1, %v608_v17  ;;  %v847_v17 = vpack.c.bf16 %v5899_v46, %v5858_v35  ;;  %v5294_v35 = vld [vmem:[%s8993_s0 + $0x71] sm:$0xff]  ;;  %v5295_v46 = vld [vmem:[%s8993_s0 + $0x81] sm:$0xff] }
  0x98   :  { %5356 = vmatmul.msk.bf16.gmra.mxu2 %vm81_vm1, %v727_v21 }
  0x99   :  { %5381 = vmatmul.msk.bf16.gmra.mxu3 %vm81_vm1, %v846_v30  ;;  %v5319_v30 = vld [vmem:[%s8993_s0 + $0x191] sm:$0xff] }
  0x9b   :  { %v302_v32 = vpop.f32.mrf.mxu2  ;;  %v126_v52 = vpop.f32.mrf.mxu0 }
  0x9c   :  { %v339_v45 = vadd.f32 %v302_v32, %v201_v28  ;;  %v202_v53 = vpop.f32.mrf.mxu1  ;;  %v421_v36 = vpop.f32.mrf.mxu3  ;;  %v5320_v32 = vld [vmem:[%s8993_s0 + $0x1a1] sm:$0xff] }
  0x9d   :  { %v203_v25 = vadd.f32 %v202_v53, %v126_v52  ;;  %v5370_v52 = vld [vmem:[%s8993_s0 + $0x2c1] sm:$0xff] }
  0x9e   :  { %v6177_v54 = vadd.f32 %v421_v36, %v339_v45  ;;  %v5345_v45 = vld [vmem:[%s8993_s0 + $0x3e0] sm:$0xff]  ;;  %v610_v36 = vpack.c.bf16 %v5320_v32, %v5319_v30  ;;  %v730_v32 = vpack.c.bf16 %v5992_v8, %v5956_v61 }
  0x9f   :  { %v729_v56 = vpack.c.bf16 %v5345_v45, %v5914_v49 }
  0xa3   :  { %v304_v57 = vpop.f32.mrf.mxu2  ;;  %v129_v11 = vpop.f32.mrf.mxu0 }
  0xa4   :  { %v340_v9 = vadd.f32 %v304_v57, %v203_v25  ;;  %v205_v22 = vpop.f32.mrf.mxu1  ;;  %v423_v16 = vpop.f32.mrf.mxu3  ;;  %v492_v25 = vpack.c.bf16 %v5295_v46, %v5294_v35 }
  0xa5   :  { %v206_v14 = vadd.f32 %v205_v22, %v129_v11 }
  0xa6   :  { %v6195_v18 = vadd.f32 %v423_v16, %v340_v9  ;;  %5307 = vmatmul.msk.bf16.gmra.mxu0 %vm81_vm1, %v491_v58 }
  0xa7   :  { %5332 = vmatmul.msk.bf16.gmra.mxu1 %vm81_vm1, %v609_v4  ;;  %v848_v4 = vpack.c.bf16 %v5370_v52, %v5904_v47  ;;  %v5296_v47 = vld [vmem:[%s8993_s0 + $0xa1] sm:$0xff] }
  0xa8   :  { %5357 = vmatmul.msk.bf16.gmra.mxu2 %vm81_vm1, %v728_v24 }
  0xa9   :  { %5382 = vmatmul.msk.bf16.gmra.mxu3 %vm81_vm1, %v847_v17 }
  0xab   :  { %v307_v19 = vpop.f32.mrf.mxu2  ;;  %v131_v21 = vpop.f32.mrf.mxu0 }
  0xac   :  { %v341_v20 = vadd.f32 %v307_v19, %v206_v14  ;;  %v207_v28 = vpop.f32.mrf.mxu1  ;;  %v426_v48 = vpop.f32.mrf.mxu3  ;;  %v5297_v19 = vld [vmem:[%s8993_s0 + $0xb1] sm:$0xff] }
  0xad   :  { %v208_v37 = vadd.f32 %v207_v28, %v131_v21  ;;  %v5322_v21 = vld [vmem:[%s8993_s0 + $0x1d1] sm:$0xff] }
  0xae   :  { %v6201_v29 = vadd.f32 %v426_v48, %v341_v20  ;;  %v5321_v20 = vld [vmem:[%s8993_s0 + $0x1c1] sm:$0xff] }
  0xaf   :  { %v611_v48 = vpack.c.bf16 %v5322_v21, %v5321_v20 }
  0xb3   :  { %v309_v53 = vpop.f32.mrf.mxu2  ;;  %v134_v34 = vpop.f32.mrf.mxu0 }
  0xb4   :  { %v342_v23 = vadd.f32 %v309_v53, %v208_v37  ;;  %v210_v55 = vpop.f32.mrf.mxu1  ;;  %v428_v58 = vpop.f32.mrf.mxu3  ;;  %v493_v37 = vpack.c.bf16 %v5297_v19, %v5296_v47  ;;  %v849_v53 = vpack.c.bf16 %v5982_v6, %v5948_v59  ;;  %v5298_v59 = vld [vmem:[%s8993_s0 + $0xc1] sm:$0xff]  ;;  %v5299_v6 = vld [vmem:[%s8993_s0 + $0xd1] sm:$0xff]  ;;  %v850_v47 = vpack.c.bf16 %v6040_v33, %v5987_v7 }
  0xb5   :  { %v211_v57 = vadd.f32 %v210_v55, %v134_v34  ;;  %v5300_v7 = vld [vmem:[%s8993_s0 + $0xe1] sm:$0xff]  ;;  %v5301_v33 = vld [vmem:[%s8993_s0 + $0xf1] sm:$0xff] }
  0xb6   :  { %v6223_v9 = vadd.f32 %v428_v58, %v342_v23  ;;  %5308 = vmatmul.msk.bf16.gmra.mxu0 %vm81_vm1, %v492_v25 }
  0xb7   :  { %5333 = vmatmul.msk.bf16.gmra.mxu1 %vm81_vm1, %v610_v36 }
  0xb8   :  { %5358 = vmatmul.msk.bf16.gmra.mxu2 %vm81_vm1, %v729_v56  ;;  %v5323_v56 = vld [vmem:[%s8993_s0 + $0x1e1] sm:$0xff] }
  0xb9   :  { %5383 = vmatmul.msk.bf16.gmra.mxu3 %vm81_vm1, %v848_v4  ;;  %v494_v4 = vpack.c.bf16 %v5299_v6, %v5298_v59 }
  0xbb   :  { %v312_v11 = vpop.f32.mrf.mxu2  ;;  %v136_v24 = vpop.f32.mrf.mxu0 }
  0xbc   :  { %v343_v22 = vadd.f32 %v312_v11, %v211_v57  ;;  %v212_v14 = vpop.f32.mrf.mxu1  ;;  %v431_v49 = vpop.f32.mrf.mxu3  ;;  %v5324_v57 = vld [vmem:[%s8993_s0 + $0x1f1] sm:$0xff] }
  0xbd   :  { %v213_v16 = vadd.f32 %v212_v14, %v136_v24  ;;  %v612_v11 = vpack.c.bf16 %v5324_v57, %v5323_v56  ;;  %v731_v14 = vpack.c.bf16 %v6050_v41, %v5997_v10  ;;  %v5327_v57 = vld [vmem:[%s8993_s0 + $0x221] sm:$0xff] }
  0xbe   :  { %v6229_v17 = vadd.f32 %v431_v49, %v343_v22 }
  0xc3   :  { %v314_v28 = vpop.f32.mrf.mxu2  ;;  %v139_v46 = vpop.f32.mrf.mxu0 }
  0xc4   :  { %v344_v35 = vadd.f32 %v314_v28, %v213_v16  ;;  %v215_v30 = vpop.f32.mrf.mxu1  ;;  %v433_v52 = vpop.f32.mrf.mxu3 }
  0xc5   :  { %v216_v45 = vadd.f32 %v215_v30, %v139_v46  ;;  %v495_v46 = vpack.c.bf16 %v5301_v33, %v5300_v7 }
  0xc6   :  { %v6247_v25 = vadd.f32 %v433_v52, %v344_v35  ;;  %5309 = vmatmul.msk.bf16.gmra.mxu0 %vm81_vm1, %v493_v37  ;;  %v5325_v37 = vld [vmem:[%s8993_s0 + $0x201] sm:$0xff]  ;;  %v732_v52 = vpack.c.bf16 %v6100_v0, %v6055_v42 }
  0xc7   :  { %5334 = vmatmul.msk.bf16.gmra.mxu1 %vm81_vm1, %v611_v48  ;;  %v5326_v48 = vld [vmem:[%s8993_s0 + $0x211] sm:$0xff] }
  0xc8   :  { %5359 = vmatmul.msk.bf16.gmra.mxu2 %vm81_vm1, %v730_v32  ;;  %v613_v30 = vpack.c.bf16 %v5326_v48, %v5325_v37 }
  0xc9   :  { %5384 = vmatmul.msk.bf16.gmra.mxu3 %vm81_vm1, %v849_v53 }
  0xcb   :  { %v317_v36 = vpop.f32.mrf.mxu2  ;;  %v6253_v34 = vpop.f32.mrf.mxu0 }
  0xcc   :  { %v345_v23 = vadd.f32 %v317_v36, %v216_v45  ;;  %v6255_v61 = vpop.f32.mrf.mxu1  ;;  %v436_v8 = vpop.f32.mrf.mxu3 }
  0xce   :  { %v6257_v55 = vadd.f32 %v436_v8, %v345_v23  ;;  %v851_v23 = vpack.c.bf16 %v6090_v60, %v6045_v40  ;;  %v5302_v40 = vld [vmem:[%s8993_s0 + $0x101] sm:$0xff]  ;;  %v5303_v60 = vld [vmem:[%s8993_s0 + $0x111] sm:$0xff] }
  0xd3   :  { %v6271_v58 = vpop.f32.mrf.mxu2  ;;  %v144_v22 = vpop.f32.mrf.mxu0 }
  0xd4   :  { %v220_v24 = vpop.f32.mrf.mxu1  ;;  %v6275_v49 = vpop.f32.mrf.mxu3 }
  0xd5   :  { %v221_v16 = vadd.f32 %v220_v24, %v144_v22  ;;  %v5378_v22 = vld [vmem:[%s8993_s0 + $0x351] sm:$0xff] }
  0xd6   :  { %5310 = vmatmul.msk.bf16.gmra.mxu0 %vm81_vm1, %v494_v4  ;;  %v5328_v4 = vld [vmem:[%s8993_s0 + $0x231] sm:$0xff]  ;;  %v852_v33 = vpack.c.bf16 %v5378_v22, %v6095_v62  ;;  %v963_v62 = vpack.c.bf16 %v5827_v26, %v5787_v15  ;;  %v964_v26 = vpack.c.bf16 %v5873_v38, %v5832_v27  ;;  %v965_v38 = vpack.c.bf16 %v5919_v50, %v5878_v39  ;;  %v5395_v39 = vld [vmem:[%s8993_s0 + $0x3e1] sm:$0xff] }
  0xd7   :  { %5335 = vmatmul.msk.bf16.gmra.mxu1 %vm81_vm1, %v612_v11  ;;  %v5353_v11 = vld [vmem:[%s8993_s0 + $0x470] sm:$0xff]  ;;  %v966_v50 = vpack.c.bf16 %v5395_v39, %v5924_v51 }
  0xd8   :  { %5360 = vmatmul.msk.bf16.gmra.mxu2 %vm81_vm1, %v731_v14  ;;  %v496_v14 = vpack.c.bf16 %v5303_v60, %v5302_v40 }
  0xd9   :  { %5385 = vmatmul.msk.bf16.gmra.mxu3 %vm81_vm1, %v850_v47 }
  0xdb   :  { %v322_v19 = vpop.f32.mrf.mxu2  ;;  %v6283_v21 = vpop.f32.mrf.mxu0 }
  0xdc   :  { %v347_v20 = vadd.f32 %v322_v19, %v221_v16  ;;  %v6285_v28 = vpop.f32.mrf.mxu1  ;;  %v441_v10 = vpop.f32.mrf.mxu3  ;;  %v614_v16 = vpack.c.bf16 %v5328_v4, %v5327_v57 }
  0xde   :  { %v6287_v41 = vadd.f32 %v441_v10, %v347_v20  ;;  %v733_v20 = vpack.c.bf16 %v5353_v11, %v6105_v1 }
  0xe3   :  { %v6301_v35 = vpop.f32.mrf.mxu2  ;;  %v149_v32 = vpop.f32.mrf.mxu0 }
  0xe4   :  { %v225_v45 = vpop.f32.mrf.mxu1  ;;  %v6305_v36 = vpop.f32.mrf.mxu3 }
  0xe5   :  { %v226_v53 = vadd.f32 %v225_v45, %v149_v32 }
  0xe6   :  { %5311 = vmatmul.msk.bf16.gmra.mxu0 %vm81_vm1, %v495_v46 }
  0xe7   :  { %5336 = vmatmul.msk.bf16.gmra.mxu1 %vm81_vm1, %v613_v30 }
  0xe8   :  { %5361 = vmatmul.msk.bf16.gmra.mxu2 %vm81_vm1, %v732_v52 }
  0xe9   :  { %5386 = vmatmul.msk.bf16.gmra.mxu3 %vm81_vm1, %v851_v23 }
  0xeb   :  { %v327_v8 = vpop.f32.mrf.mxu2  ;;  %v6313_v6 = vpop.f32.mrf.mxu0 }
  0xec   :  { %v349_v59 = vadd.f32 %v327_v8, %v226_v53  ;;  %v6315_v56 = vpop.f32.mrf.mxu1  ;;  %v446_v42 = vpop.f32.mrf.mxu3 }
  0xee   :  { %v6317_v0 = vadd.f32 %v446_v42, %v349_v59 }
  0xf3   :  { %v6337_v24 = vpop.f32.mrf.mxu2  ;;  %v154_v47 = vpop.f32.mrf.mxu0 }
  0xf4   :  { %v230_v19 = vpop.f32.mrf.mxu1  ;;  %v6340_v7 = vpop.f32.mrf.mxu3 }
  0xf5   :  { %v231_v10 = vadd.f32 %v230_v19, %v154_v47 }
  0xf6   :  { %5312 = vmatmul.msk.bf16.gmra.mxu0 %vm81_vm1, %v496_v14 }
  0xf7   :  { %5337 = vmatmul.msk.bf16.gmra.mxu1 %vm81_vm1, %v614_v16 }
  0xf8   :  { %5362 = vmatmul.msk.bf16.gmra.mxu2 %vm81_vm1, %v733_v20 }
  0xf9   :  { %5387 = vmatmul.msk.bf16.gmra.mxu3 %vm81_vm1, %v852_v33 }
  0xfb   :  { %v332_v37 = vpop.f32.mrf.mxu2  ;;  %v6347_v46 = vpop.f32.mrf.mxu0 }
  0xfc   :  { %v351_v48 = vadd.f32 %v332_v37, %v231_v10  ;;  %v6349_v30 = vpop.f32.mrf.mxu1  ;;  %v451_v1 = vpop.f32.mrf.mxu3 }
  0xfe   :  { %v6351_v32 = vadd.f32 %v451_v1, %v351_v48 }
 0x103   :  { %v6353_v45 = vpop.f32.mrf.mxu2  ;;  %v535_v52 = vpop.f32.mrf.mxu0 }
 0x104   :  { %v653_v53 = vpop.f32.mrf.mxu1  ;;  %v6357_v23 = vpop.f32.mrf.mxu3  ;;  %v575_v8 = vadd.f32 %v535_v52, %v6153_v5 }
 0x106   :  { %v693_v59 = vadd.f32 %v653_v53, %v575_v8  ;;  %5405 = vmatmul.msk.bf16.vlgmr.msra.gmra.mxu0 %vm81_vm1, %v963_v62 }
 0x10b   :  { %v772_v42 = vpop.f32.mrf.mxu2  ;;  %v537_v60 = vpop.f32.mrf.mxu0 }
 0x10c   :  { %v812_v40 = vadd.f32 %v772_v42, %v693_v59  ;;  %v6361_v57 = vpop.f32.mrf.mxu1  ;;  %v6364_v4 = vadd.f32 %v537_v60, %v6171_v31  ;;  %v891_v11 = vpop.f32.mrf.mxu3 }
 0x10e   :  { %v6366_v22 = vadd.f32 %v891_v11, %v812_v40 }
 0x113   :  { %v6368_v15 = vpop.f32.mrf.mxu2  ;;  %v540_v5 = vpop.f32.mrf.mxu0 }
 0x114   :  { %v658_v14 = vpop.f32.mrf.mxu1  ;;  %v577_v16 = vadd.f32 %v540_v5, %v6177_v54  ;;  %v6373_v47 = vpop.f32.mrf.mxu3 }
 0x116   :  { %v695_v19 = vadd.f32 %v658_v14, %v577_v16  ;;  %5406 = vmatmul.msk.bf16.gmra.mxu0 %vm81_vm1, %v964_v26 }
 0x11b   :  { %v777_v20 = vpop.f32.mrf.mxu2  ;;  %v542_v10 = vpop.f32.mrf.mxu0 }
 0x11c   :  { %v814_v31 = vadd.f32 %v777_v20, %v695_v19  ;;  %v6376_v33 = vpop.f32.mrf.mxu1  ;;  %v6379_v37 = vadd.f32 %v542_v10, %v6195_v18  ;;  %v896_v48 = vpop.f32.mrf.mxu3 }
 0x11e   :  { %v933_v1 = vadd.f32 %v896_v48, %v814_v31 }
 0x123   :  { %v6381_v27 = vpop.f32.mrf.mxu2  ;;  %v545_v54 = vpop.f32.mrf.mxu0 }
 0x124   :  { %v663_v62 = vpop.f32.mrf.mxu1  ;;  %v579_v52 = vadd.f32 %v545_v54, %v6201_v29  ;;  %v6386_v53 = vpop.f32.mrf.mxu3 }
 0x126   :  { %v697_v8 = vadd.f32 %v663_v62, %v579_v52  ;;  %5407 = vmatmul.msk.bf16.gmra.mxu0 %vm81_vm1, %v965_v38 }
 0x12b   :  { %v782_v59 = vpop.f32.mrf.mxu2  ;;  %v547_v18 = vpop.f32.mrf.mxu0 }
 0x12c   :  { %v816_v42 = vadd.f32 %v782_v59, %v697_v8  ;;  %v6390_v40 = vadd.f32 %v547_v18, %v6223_v9  ;;  %v901_v60 = vpop.f32.mrf.mxu3  ;;  %v967_v9 = vpack.c.bf16 %v6002_v12, %v5964_v63  ;;  %v969_v63 = vpack.c.bf16 %v6110_v2, %v6065_v44 }
 0x12e   :  { %v935_v11 = vadd.f32 %v901_v60, %v816_v42 }
 0x133   :  { %v550_v29 = vpop.f32.mrf.mxu0 }
 0x134   :  { %v6397_v26 = vadd.f32 %v550_v29, %v6229_v17  ;;  %v968_v17 = vpack.c.bf16 %v6060_v43, %v6007_v13  ;;  %v6427_v13 = vpop.f32.mrf.mxu1  ;;  %v5403_v43 = vld [vmem:[%s8993_s0 + $0x471] sm:$0xff]  ;;  %v6435_v44 = vpop.f32.mrf.mxu3  ;;  %s5177_s0 = sshll.u32 %s9000_s7, 4  ;;  %s5178_s0 = int_to_ptr.hbm [resolvable:$true] %s5177_s0 }
 0x135   :  { %v970_v48 = vpack.c.bf16 %v5403_v43, %v6115_v3  ;;  %9049 = vst [vmem:[#allocation6_spill] sm:$0xff] %v6435_v44 }
 0x136   :  { %5408 = vmatmul.msk.bf16.gmra.mxu0 %vm81_vm1, %v966_v50 }
 0x13b   :  { %v552_v5 = vpop.f32.mrf.mxu0 }
 0x13c   :  { %v6401_v14 = vadd.f32 %v552_v5, %v6247_v25  ;;  %v6447_v52 = vpop.f32.mrf.mxu3 }
 0x13d   :  { %9050 = vst [vmem:[#allocation7_spill] sm:$0xff] %v6447_v52 }
 0x143   :  { %v555_v16 = vpop.f32.mrf.mxu0 }
 0x144   :  { %v6406_v19 = vadd.f32 %v555_v16, %v6257_v55  ;;  %v6454_v18 = vpop.f32.mrf.mxu3 }
 0x145   :  { %9052 = vst [vmem:[#allocation9_spill] sm:$0xff] %v6454_v18 }
 0x146   :  { %5409 = vmatmul.msk.bf16.gmra.mxu0 %vm81_vm1, %v967_v9 }
 0x14b   :  { %v6409_v51 = vpop.f32.mrf.mxu0 }
 0x14c   :  { %v6460_v50 = vpop.f32.mrf.mxu3 }
 0x14d   :  { %9053 = vst [vmem:[#allocation10_spill] sm:$0xff] %v6460_v50 }
 0x153   :  { %v560_v20 = vpop.f32.mrf.mxu0 }
 0x154   :  { %v6414_v31 = vadd.f32 %v560_v20, %v6287_v41  ;;  %v6432_v41 = vpop.f32.mrf.mxu2  ;;  %v6468_v20 = vpop.f32.mrf.mxu3 }
 0x155   :  { %9056 = vst [vmem:[#allocation13_spill] sm:$0xff] %v6468_v20 }
 0x156   :  { %5410 = vmatmul.msk.bf16.gmra.mxu0 %vm81_vm1, %v968_v17 }
 0x15b   :  { %v6417_v25 = vpop.f32.mrf.mxu0 }
 0x15c   :  { %v6443_v54 = vpop.f32.mrf.mxu2 }
 0x163   :  { %v565_v12 = vpop.f32.mrf.mxu0 }
 0x164   :  { %v6422_v55 = vadd.f32 %v565_v12, %v6317_v0  ;;  %v6441_v0 = vpop.f32.mrf.mxu1  ;;  %v6449_v42 = vpop.f32.mrf.mxu2 }
 0x166   :  { %5411 = vmatmul.msk.bf16.gmra.mxu0 %vm81_vm1, %v969_v63  ;;  %v5415_v63 = vld [vmem:[%s8995_s2 + $0x4] sm:$0xf] }
 0x167   :  { %v1514_v43 = vsel %vm1512_vm2, %v5415_v63, 0 }
 0x168   :  { %1523 = vmatpush.bf16.msra.mxu1 %v1514_v43 }
 0x16b   :  { %v6425_v10 = vpop.f32.mrf.mxu0 }
 0x16c   :  { %v670_v8 = vpop.f32.mrf.mxu1  ;;  %v6458_v39 = vpop.f32.mrf.mxu2 }
 0x173   :  { %v570_v38 = vpop.f32.mrf.mxu0 }
 0x174   :  { %v6438_v2 = vadd.f32 %v570_v38, %v6351_v32  ;;  %v673_v60 = vpop.f32.mrf.mxu1  ;;  %v6464_v16 = vpop.f32.mrf.mxu2 }
 0x175   :  { %v6476_v38 = vpop.f32.mrf.mxu3 }
 0x176   :  { %5412 = vmatmul.msk.bf16.gmra.mxu0 %vm81_vm1, %v970_v48  ;;  %9058 = vst [vmem:[#allocation15_spill] sm:$0xff] %v6476_v38 }
 0x17b   :  { %v6445_v62 = vpop.f32.mrf.mxu0 }
 0x17c   :  { %v675_v9 = vpop.f32.mrf.mxu1  ;;  %v797_v12 = vpop.f32.mrf.mxu2 }
 0x183   :  { %v1009_v59 = vpop.f32.mrf.mxu0 }
 0x184   :  { %v6452_v3 = vadd.f32 %v1009_v59, %v6366_v22  ;;  %v678_v22 = vpop.f32.mrf.mxu1 }
 0x186   :  { %9051 = vst [vmem:[#allocation8_spill] sm:$0xff] %v6452_v3  ;;  %v6480_v3 = vpop.f32.mrf.mxu3 }
 0x187   :  { %9060 = vst [vmem:[#allocation17_spill] sm:$0xff] %v6480_v3 }
 0x18b   :  { %v6456_v32 = vpop.f32.mrf.mxu0 }
 0x18c   :  { %v680_v59 = vpop.f32.mrf.mxu1 }
 0x18e   :  { %v6484_v18 = vpop.f32.mrf.mxu3 }
 0x18f   :  { %9062 = vst [vmem:[#allocation19_spill] sm:$0xff] %v6484_v18  ;;  %v228_v18 = vadd.f32 %v6315_v56, %v6313_v6 }
 0x193   :  { %v1014_v29 = vpop.f32.mrf.mxu0 }
 0x194   :  { %v6462_v5 = vadd.f32 %v1014_v29, %v933_v1 }
 0x196   :  { %9054 = vst [vmem:[#allocation11_spill] sm:$0xff] %v6462_v5  ;;  %v799_v5 = vpop.f32.mrf.mxu2 }
 0x19b   :  { %v6466_v17 = vpop.f32.mrf.mxu0 }
 0x19c   :  { %9055 = vst [vmem:[#allocation12_spill] sm:$0xff] %v6466_v17  ;;  %v683_v17 = vpop.f32.mrf.mxu1 }
 0x19e   :  { %v802_v50 = vpop.f32.mrf.mxu2 }
 0x1a3   :  { %v1019_v48 = vpop.f32.mrf.mxu0 }
 0x1a4   :  { %v6474_v1 = vadd.f32 %v1019_v48, %v935_v11  ;;  %v685_v63 = vpop.f32.mrf.mxu1  ;;  %v6490_v48 = vpop.f32.mrf.mxu3 }
 0x1a5   :  { %9065 = vst [vmem:[#allocation22_spill] sm:$0xff] %v6490_v48  ;;  %v350_v48 = vadd.f32 %v6337_v24, %v228_v18 }
 0x1a6   :  { %9057 = vst [vmem:[#allocation14_spill] sm:$0xff] %v6474_v1  ;;  %v804_v43 = vpop.f32.mrf.mxu2  ;;  %v218_v1 = vadd.f32 %v6255_v61, %v6253_v34 }
 0x1a7   :  { %v469_v24 = vadd.f32 %v6340_v7, %v350_v48 }
 0x1ab   :  { %v6478_v29 = vpop.f32.mrf.mxu0 }
 0x1ac   :  { %9059 = vst [vmem:[#allocation16_spill] sm:$0xff] %v6478_v29  ;;  %v346_v29 = vadd.f32 %v6271_v58, %v218_v1  ;;  %v688_v3 = vpop.f32.mrf.mxu1  ;;  %v694_v58 = vadd.f32 %v6361_v57, %v6364_v4  ;;  %v926_v56 = vpop.f32.mrf.mxu3  ;;  %v701_v4 = vadd.f32 %v673_v60, %v6406_v19  ;;  %v703_v19 = vadd.f32 %v678_v22, %v6414_v31  ;;  %v9072_v1 = vld [vmem:[#allocation13_spill] sm:$0xff] }
 0x1ae   :  { %v465_v61 = vadd.f32 %v6275_v49, %v346_v29  ;;  %v813_v6 = vadd.f32 %v6368_v15, %v694_v58  ;;  %v698_v49 = vadd.f32 %v6427_v13, %v6390_v40  ;;  %v588_v15 = vadd.f32 %v6425_v10, %v469_v24  ;;  %v9077_v58 = vld [vmem:[#allocation11_spill] sm:$0xff] }
 0x1b3   :  { %v6482_v20 = vpop.f32.mrf.mxu0 }
 0x1b4   :  { %9061 = vst [vmem:[#allocation18_spill] sm:$0xff] %v6482_v20  ;;  %v223_v20 = vadd.f32 %v6285_v28, %v6283_v21  ;;  %v696_v21 = vadd.f32 %v6376_v33, %v6379_v37  ;;  %v817_v33 = vadd.f32 %v6432_v41, %v698_v49  ;;  %v690_v40 = vpop.f32.mrf.mxu1 }
 0x1b6   :  { %v348_v38 = vadd.f32 %v6301_v35, %v223_v20  ;;  %v584_v35 = vadd.f32 %v6409_v51, %v465_v61 }
 0x1b8   :  { %v467_v28 = vadd.f32 %v6305_v36, %v348_v38  ;;  %v700_v36 = vadd.f32 %v670_v8, %v6401_v14  ;;  %v820_v14 = vadd.f32 %v6458_v39, %v701_v4  ;;  %v9069_v39 = vld [vmem:[#allocation9_spill] sm:$0xff] }
 0x1ba   :  { %v586_v57 = vadd.f32 %v6417_v25, %v467_v28  ;;  %v819_v51 = vadd.f32 %v6449_v42, %v700_v36  ;;  %v9068_v42 = vld [vmem:[#allocation7_spill] sm:$0xff]  ;;  %v9078_v28 = vld [vmem:[#allocation22_spill] sm:$0xff] }
 0x1bb   :  { %v6486_v52 = vpop.f32.mrf.mxu0 }
 0x1bc   :  { %9063 = vst [vmem:[#allocation20_spill] sm:$0xff] %v6486_v52  ;;  %v233_v52 = vadd.f32 %v6349_v30, %v6347_v46  ;;  %v815_v30 = vadd.f32 %v6381_v27, %v696_v21  ;;  %v702_v27 = vadd.f32 %v675_v9, %v584_v35  ;;  %v704_v13 = vadd.f32 %v680_v59, %v586_v57  ;;  %v9074_v59 = vld [vmem:[#allocation8_spill] sm:$0xff] }
 0x1bd   :  { %v938_v9 = vadd.f32 %v9069_v39, %v819_v51  ;;  %v1105_v29 = vmul.f32 %v9074_v59, %v9074_v59  ;;  %v1107_v21 = vmul.f32 %v9077_v58, %v9077_v58  ;;  %v1236_v49 = vsel %vm1235_vm4, %v9074_v59, 0.0 }
 0x1be   :  { %v352_v44 = vadd.f32 %v6353_v45, %v233_v52  ;;  %v699_v45 = vadd.f32 %v6441_v0, %v6397_v26  ;;  %v934_v26 = vadd.f32 %v6386_v53, %v815_v30  ;;  %v821_v10 = vadd.f32 %v6464_v16, %v702_v27  ;;  %v9067_v52 = vld [vmem:[#allocation6_spill] sm:$0xff]  ;;  %v9079_v27 = vld [vmem:[#allocation16_spill] sm:$0xff] }
 0x1bf   :  { %v822_v0 = vadd.f32 %v797_v12, %v703_v19  ;;  %v707_v53 = vadd.f32 %v688_v3, %v6438_v2  ;;  %v936_v8 = vadd.f32 %v9067_v52, %v817_v33  ;;  %v823_v18 = vadd.f32 %v799_v5, %v704_v13  ;;  %v9071_v2 = vld [vmem:[#allocation12_spill] sm:$0xff]  ;;  %v9073_v5 = vld [vmem:[#allocation15_spill] sm:$0xff] }
 0x1c0   :  { %v471_v46 = vadd.f32 %v6357_v23, %v352_v44  ;;  %v932_v23 = vadd.f32 %v6373_v47, %v813_v6  ;;  %v818_v37 = vadd.f32 %v6443_v54, %v699_v45  ;;  %v705_v47 = vadd.f32 %v683_v17, %v6422_v55  ;;  %v9070_v17 = vld [vmem:[#allocation10_spill] sm:$0xff] }
 0x1c1   :  { %v706_v54 = vadd.f32 %v685_v63, %v588_v15  ;;  %v939_v22 = vadd.f32 %v9070_v17, %v820_v14  ;;  %v6548_v3 = vadd.f32 %v9071_v2, %v934_v26  ;;  %v6551_v38 = vadd.f32 %v9072_v1, %v821_v10  ;;  %v9075_v63 = vld [vmem:[#allocation17_spill] sm:$0xff] }
 0x1c2   :  { %v590_v7 = vadd.f32 %v6445_v62, %v471_v46  ;;  %v6538_v44 = vadd.f32 %v6456_v32, %v932_v23  ;;  %v937_v31 = vadd.f32 %v9068_v42, %v818_v37  ;;  %v824_v60 = vadd.f32 %v802_v50, %v705_v47  ;;  %v928_v32 = vpop.f32.mrf.mxu3  ;;  %v9081_v47 = vld [vmem:[#allocation14_spill] sm:$0xff] }
 0x1c3   :  { %v6488_v11 = vpop.f32.mrf.mxu0  ;;  %v825_v16 = vadd.f32 %v804_v43, %v706_v54  ;;  %v6554_v50 = vadd.f32 %v9073_v5, %v822_v0  ;;  %v6559_v43 = vadd.f32 %v9075_v63, %v823_v18  ;;  %v1068_v46 = vsel %vm1067_vm3, %v9074_v59, 0.0  ;;  %v9082_v0 = vld [vmem:[#allocation18_spill] sm:$0xff]  ;;  %v9083_v1 = vld [vmem:[#allocation20_spill] sm:$0xff] }
 0x1c4   :  { %9064 = vst [vmem:[#allocation21_spill] sm:$0xff] %v6488_v11  ;;  %v807_v11 = vpop.f32.mrf.mxu2  ;;  %v708_v62 = vadd.f32 %v690_v40, %v590_v7  ;;  %v1106_v12 = vmul.f32 %v6538_v44, %v6538_v44  ;;  %v1069_v61 = vsel %vm1067_vm3, %v6538_v44, 0.0  ;;  %v1237_v57 = vsel %vm1235_vm4, %v6538_v44, 0.0 }
 0x1c5   :  { %9066 = vst [vmem:[#allocation23_spill] sm:$0xff] %v6538_v44  ;;  %v826_v20 = vadd.f32 %v807_v11, %v707_v53  ;;  %v9076_v11 = vld [vmem:[#allocation19_spill] sm:$0xff]  ;;  %v6569_v6 = vadd.f32 %v9078_v28, %v825_v16  ;;  %v1108_v36 = vmul.f32 %v6548_v3, %v6548_v3  ;;  %v1273_v4 = vsel %vm1235_vm4, %v1105_v29, 0.0 }
 0x1c6   :  { %v6562_v48 = vadd.f32 %v9076_v11, %v824_v60  ;;  %v1122_v45 = vsel %vm1067_vm3, %v1106_v12, 0.0  ;;  %v1070_v15 = vadd.f32 %v1069_v61, %v1068_v46  ;;  %v1274_v7 = vsel %vm1235_vm4, %v1106_v12, 0.0 }
 0x1c7   :  { %v6571_v35 = vadd.f32 %v926_v56, %v826_v20  ;;  %v1121_v56 = vsel %vm1067_vm3, %v1105_v29, 0.0  ;;  %v1071_v23 = vsel %vm1067_vm3, %v9077_v58, 0.0  ;;  %v1124_v33 = vsel %vm1067_vm3, %v1107_v21, 0.0 }
 0x1c8   :  { %v1239_v37 = vsel %vm1235_vm4, %v9077_v58, 0.0  ;;  %v6595_v40 = vadd.f32 %v9079_v27, %v936_v8  ;;  %v1123_v26 = vadd.f32 %v1122_v45, %v1121_v56  ;;  %v1238_v51 = vadd.f32 %v1237_v57, %v1236_v49 }
 0x1c9   :  { %v1276_v14 = vsel %vm1235_vm4, %v1107_v21, 0.0  ;;  %v1073_v19 = vsel %vm1067_vm3, %v6548_v3, 0.0  ;;  %v1126_v10 = vsel %vm1067_vm3, %v1108_v36, 0.0  ;;  %v1241_v13 = vsel %vm1235_vm4, %v6548_v3, 0.0 }
 0x1ca   :  { %9080 = vst [vmem:[#allocation6_spill] sm:$0xff] %v6595_v40  ;;  %v6606_v54 = vadd.f32 %v9082_v0, %v937_v31  ;;  %v1275_v53 = vadd.f32 %v1274_v7, %v1273_v4  ;;  %v1125_v52 = vadd.f32 %v1124_v33, %v1123_v26  ;;  %v1240_v8 = vadd.f32 %v1239_v37, %v1238_v51 }
 0x1cb   :  { %v6504_v34 = vpop.f32.mrf.mxu0  ;;  %v1278_v42 = vsel %vm1235_vm4, %v1108_v36, 0.0  ;;  %v1075_v18 = vsel %vm1067_vm3, %v9081_v47, 0.0  ;;  %v1243_v60 = vsel %vm1235_vm4, %v9081_v47, 0.0  ;;  %v1110_v39 = vmul.f32 %v6595_v40, %v6595_v40  ;;  %v9085_v49 = vld [vmem:[#allocation21_spill] sm:$0xff] }
 0x1cc   :  { %v809_v41 = vpop.f32.mrf.mxu2  ;;  %v1277_v16 = vadd.f32 %v1276_v14, %v1275_v53  ;;  %v1242_v31 = vadd.f32 %v1241_v13, %v1240_v8  ;;  %v1111_v2 = vmul.f32 %v6606_v54, %v6606_v54  ;;  %v6620_v5 = vadd.f32 %v9083_v1, %v938_v9 }
 0x1cd   :  { %v827_v55 = vadd.f32 %v809_v41, %v708_v62  ;;  %v1109_v41 = vmul.f32 %v9081_v47, %v9081_v47  ;;  %v1072_v62 = vadd.f32 %v1071_v23, %v1070_v15  ;;  %v1077_v61 = vsel %vm1067_vm3, %v6595_v40, 0.0 }
 0x1ce   :  { %9084 = vst [vmem:[#allocation7_spill] sm:$0xff] %v6620_v5  ;;  %v1279_v29 = vadd.f32 %v1278_v42, %v1277_v16  ;;  %v1244_v11 = vadd.f32 %v1243_v60, %v1242_v31  ;;  %v1130_v21 = vsel %vm1067_vm3, %v1110_v39, 0.0  ;;  %v1245_v28 = vsel %vm1235_vm4, %v6595_v40, 0.0 }
 0x1cf   :  { %v6573_v24 = vadd.f32 %v928_v32, %v827_v55  ;;  %v1074_v20 = vadd.f32 %v1073_v19, %v1072_v62  ;;  %v1127_v55 = vadd.f32 %v1126_v10, %v1125_v52  ;;  %v1128_v32 = vsel %vm1067_vm3, %v1109_v41, 0.0 }
 0x1d0   :  { %v1280_v12 = vsel %vm1235_vm4, %v1109_v41, 0.0  ;;  %v1282_v46 = vsel %vm1235_vm4, %v1110_v39, 0.0  ;;  %v6629_v45 = vadd.f32 %v9085_v49, %v939_v22  ;;  %v1079_v9 = vsel %vm1067_vm3, %v6606_v54, 0.0 }
 0x1d1   :  { %v1076_v63 = vadd.f32 %v1075_v18, %v1074_v20  ;;  %v1129_v57 = vadd.f32 %v1128_v32, %v1127_v55  ;;  %v1281_v36 = vadd.f32 %v1280_v12, %v1279_v29  ;;  %v1247_v56 = vsel %vm1235_vm4, %v6606_v54, 0.0 }
 0x1d2   :  { %9086 = vst [vmem:[#allocation9_spill] sm:$0xff] %v6629_v45  ;;  %v1132_v4 = vsel %vm1067_vm3, %v1111_v2, 0.0  ;;  %v1284_v15 = vsel %vm1235_vm4, %v1111_v2, 0.0  ;;  %v1112_v7 = vmul.f32 %v6620_v5, %v6620_v5  ;;  %v6641_v23 = vadd.f32 %v6504_v34, %v6551_v38 }
 0x1d3   :  { %v6533_v25 = vpop.f32.mrf.mxu0  ;;  %v1078_v22 = vadd.f32 %v1077_v61, %v1076_v63  ;;  %v1131_v33 = vadd.f32 %v1130_v21, %v1129_v57  ;;  %v1246_v37 = vadd.f32 %v1245_v28, %v1244_v11  ;;  %v1283_v27 = vadd.f32 %v1282_v46, %v1281_v36 }
 0x1d4   :  { %9087 = vst [vmem:[#allocation10_spill] sm:$0xff] %v6641_v23  ;;  %v1081_v26 = vsel %vm1067_vm3, %v6620_v5, 0.0  ;;  %v1249_v51 = vsel %vm1235_vm4, %v6620_v5, 0.0  ;;  %v1113_v14 = vmul.f32 %v6629_v45, %v6629_v45  ;;  %v6651_v19 = vadd.f32 %v6533_v25, %v6554_v50 }
 0x1d5   :  { %v1080_v10 = vadd.f32 %v1079_v9, %v1078_v22  ;;  %v1133_v34 = vadd.f32 %v1132_v4, %v1131_v33  ;;  %v1248_v38 = vadd.f32 %v1247_v56, %v1246_v37  ;;  %v1285_v13 = vadd.f32 %v1284_v15, %v1283_v27 }
 0x1d6   :  { %9088 = vst [vmem:[#allocation12_spill] sm:$0xff] %v6651_v19  ;;  %v1134_v0 = vsel %vm1067_vm3, %v1112_v7, 0.0  ;;  %v1286_v53 = vsel %vm1235_vm4, %v1112_v7, 0.0  ;;  %v1083_v62 = vsel %vm1067_vm3, %v6629_v45, 0.0  ;;  %v1114_v52 = vmul.f32 %v6641_v23, %v6641_v23 }
 0x1d7   :  { %v1082_v8 = vadd.f32 %v1081_v26, %v1080_v10  ;;  %v1250_v42 = vadd.f32 %v1249_v51, %v1248_v38  ;;  %v1251_v25 = vsel %vm1235_vm4, %v6629_v45, 0.0  ;;  %v1136_v18 = vsel %vm1067_vm3, %v1113_v14, 0.0 }
 0x1d8   :  { %v1288_v60 = vsel %vm1235_vm4, %v1113_v14, 0.0  ;;  %v1085_v39 = vsel %vm1067_vm3, %v6641_v23, 0.0  ;;  %v1115_v16 = vmul.f32 %v6651_v19, %v6651_v19  ;;  %v1135_v20 = vadd.f32 %v1134_v0, %v1133_v34 }
 0x1d9   :  { %v1287_v55 = vadd.f32 %v1286_v53, %v1285_v13  ;;  %v1084_v31 = vadd.f32 %v1083_v62, %v1082_v8  ;;  %v1252_v12 = vadd.f32 %v1251_v25, %v1250_v42  ;;  %v1290_v2 = vsel %vm1235_vm4, %v1114_v52, 0.0 }
 0x1da   :  { %v1137_v1 = vadd.f32 %v1136_v18, %v1135_v20  ;;  %v1087_v61 = vsel %vm1067_vm3, %v6651_v19, 0.0  ;;  %v1292_v9 = vsel %vm1235_vm4, %v1115_v16, 0.0 }
 0x1db   :  { %v6577_v30 = vpop.f32.mrf.mxu0  ;;  %v1289_v29 = vadd.f32 %v1288_v60, %v1287_v55  ;;  %v1086_v63 = vadd.f32 %v1085_v39, %v1084_v31 }
 0x1dc   :  { %v6663_v50 = vadd.f32 %v6577_v30, %v6559_v43  ;;  %v1138_v43 = vsel %vm1067_vm3, %v1114_v52, 0.0  ;;  %v1253_v30 = vsel %vm1235_vm4, %v6641_v23, 0.0 }
 0x1dd   :  { %v1139_v28 = vadd.f32 %v1138_v43, %v1137_v1  ;;  %v1254_v46 = vadd.f32 %v1253_v30, %v1252_v12  ;;  %v1291_v49 = vadd.f32 %v1290_v2, %v1289_v29 }
 0x1de   :  { %9089 = vst [vmem:[#allocation13_spill] sm:$0xff] %v6663_v50  ;;  %v1116_v11 = vmul.f32 %v6663_v50, %v6663_v50  ;;  %v1089_v56 = vsel %vm1067_vm3, %v6663_v50, 0.0  ;;  %v1257_v4 = vsel %vm1235_vm4, %v6663_v50, 0.0 }
 0x1df   :  { %v1293_v14 = vadd.f32 %v1292_v9, %v1291_v49 }
 0x1e0   :  { %v1142_v33 = vsel %vm1067_vm3, %v1116_v11, 0.0  ;;  %v1294_v37 = vsel %vm1235_vm4, %v1116_v11, 0.0 }
 0x1e1   :  { %v1295_v62 = vadd.f32 %v1294_v37, %v1293_v14 }
 0x1e3   :  { %v1039_v17 = vpop.f32.mrf.mxu0 }
 0x1e4   :  { %v6672_v32 = vadd.f32 %v1039_v17, %v6562_v48  ;;  %v1140_v48 = vsel %vm1067_vm3, %v1115_v16, 0.0  ;;  %v1255_v17 = vsel %vm1235_vm4, %v6651_v19, 0.0 }
 0x1e5   :  { %v1141_v7 = vadd.f32 %v1140_v48, %v1139_v28  ;;  %v1256_v22 = vadd.f32 %v1255_v17, %v1254_v46 }
 0x1e6   :  { %9090 = vst [vmem:[#allocation15_spill] sm:$0xff] %v6672_v32  ;;  %v1117_v57 = vmul.f32 %v6672_v32, %v6672_v32  ;;  %v1091_v27 = vsel %vm1067_vm3, %v6672_v32, 0.0  ;;  %v1259_v26 = vsel %vm1235_vm4, %v6672_v32, 0.0 }
 0x1e7   :  { %v1143_v53 = vadd.f32 %v1142_v33, %v1141_v7 }
 0x1e8   :  { %v1144_v34 = vsel %vm1067_vm3, %v1117_v57, 0.0  ;;  %v1296_v38 = vsel %vm1235_vm4, %v1117_v57, 0.0 }
 0x1e9   :  { %v1145_v39 = vadd.f32 %v1144_v34, %v1143_v53  ;;  %v1297_v16 = vadd.f32 %v1296_v38, %v1295_v62 }
 0x1eb   :  { %v1041_v41 = vpop.f32.mrf.mxu0 }
 0x1ec   :  { %v6686_v21 = vadd.f32 %v1041_v41, %v6569_v6  ;;  %v1088_v6 = vadd.f32 %v1087_v61, %v1086_v63 }
 0x1ee   :  { %9091 = vst [vmem:[#allocation8_spill] sm:$0xff] %v6686_v21  ;;  %v1118_v51 = vmul.f32 %v6686_v21, %v6686_v21  ;;  %v1090_v10 = vadd.f32 %v1089_v56, %v1088_v6  ;;  %v1093_v13 = vsel %vm1067_vm3, %v6686_v21, 0.0  ;;  %v1261_v41 = vsel %vm1235_vm4, %v6686_v21, 0.0 }
 0x1f0   :  { %v1092_v52 = vadd.f32 %v1091_v27, %v1090_v10  ;;  %v1146_v42 = vsel %vm1067_vm3, %v1118_v51, 0.0  ;;  %v1298_v25 = vsel %vm1235_vm4, %v1118_v51, 0.0 }
 0x1f1   :  { %v1147_v2 = vadd.f32 %v1146_v42, %v1145_v39  ;;  %v1299_v1 = vadd.f32 %v1298_v25, %v1297_v16 }
 0x1f2   :  { %v1094_v20 = vadd.f32 %v1093_v13, %v1092_v52 }
 0x1f3   :  { %v1044_v36 = vpop.f32.mrf.mxu0 }
 0x1f4   :  { %v6696_v15 = vadd.f32 %v1044_v36, %v6571_v35  ;;  %v1258_v35 = vadd.f32 %v1257_v4, %v1256_v22 }
 0x1f6   :  { %9092 = vst [vmem:[#allocation17_spill] sm:$0xff] %v6696_v15  ;;  %v1119_v0 = vmul.f32 %v6696_v15, %v6696_v15  ;;  %v1260_v8 = vadd.f32 %v1259_v26, %v1258_v35  ;;  %v1095_v18 = vsel %vm1067_vm3, %v6696_v15, 0.0  ;;  %v1263_v60 = vsel %vm1235_vm4, %v6696_v15, 0.0 }
 0x1f7   :  { %v1096_v29 = vadd.f32 %v1095_v18, %v1094_v20 }
 0x1f8   :  { %v1262_v55 = vadd.f32 %v1261_v41, %v1260_v8  ;;  %v1148_v12 = vsel %vm1067_vm3, %v1119_v0, 0.0  ;;  %v1300_v43 = vsel %vm1235_vm4, %v1119_v0, 0.0 }
 0x1f9   :  { %v1149_v17 = vadd.f32 %v1148_v12, %v1147_v2  ;;  %v1301_v28 = vadd.f32 %v1300_v43, %v1299_v1  ;;  %v5702_v1 = vmov 0.0  }
 0x1fa   :  { %v1264_v63 = vadd.f32 %v1263_v60, %v1262_v55  ;;  %1416 = vst.msk [vmem:[#allocation2 + $0x120] sm:$0xff] %vm1067_vm3, %v5702_v1 }
 0x1fb   :  { %v1046_v31 = vpop.f32.mrf.mxu0  ;;  %1417 = vst.msk [vmem:[#allocation2 + $0x128] sm:$0x3] %vm1380_vm5, %v5702_v1 }
 0x1fc   :  { %v6723_v30 = vadd.f32 %v1046_v31, %v6573_v24  ;;  %1379 = vst.msk [vmem:[#allocation2] sm:$0xff] %vm1067_vm3, %v5702_v1 }
 0x1fd   :  { %1381 = vst.msk [vmem:[#allocation2 + $0x8] sm:$0x3] %vm1380_vm5, %v5702_v1 }
 0x1fe   :  { %9093 = vst [vmem:[#allocation19_spill] sm:$0xff] %v6723_v30  ;;  %v1097_v11 = vsel %vm1067_vm3, %v6723_v30, 0.0  ;;  %v1120_v61 = vmul.f32 %v6723_v30, %v6723_v30  ;;  %v1265_v48 = vsel %vm1235_vm4, %v6723_v30, 0.0 }
 0x1ff   :  { %v1098_v46 = vadd.f32 %v1097_v11, %v1096_v29  ;;  %v1266_v49 = vadd.f32 %v1265_v48, %v1264_v63  ;;  %1382 = vst.msk [vmem:[#allocation2 + $0x10] sm:$0xff] %vm1067_vm3, %v5702_v1  ;;  %v1461_v11 = vld [vmem:[%s8995_s2] sm:$0xf] }
 0x200   :  { %v1150_v24 = vsel %vm1067_vm3, %v1120_v61, 0.0  ;;  %v1302_v57 = vsel %vm1235_vm4, %v1120_v61, 0.0  ;;  %1383 = vst.msk [vmem:[#allocation2 + $0x18] sm:$0x3] %vm1380_vm5, %v5702_v1  ;;  %v5432_v61 = vld [vmem:[%s8995_s2 + $0x8] sm:$0xf] }
 0x201   :  { %v1099_v36 = vrot.slane %v1098_v46, 4  ;;  %v1151_v9 = vadd.f32 %v1150_v24, %v1149_v17  ;;  %v1267_v56 = vrot.slane %v1266_v49, 4  ;;  %v1303_v4 = vadd.f32 %v1302_v57, %v1301_v28  ;;  %1384 = vst.msk [vmem:[#allocation2 + $0x20] sm:$0xff] %vm1067_vm3, %v5702_v1 }
 0x202   :  { %1385 = vst.msk [vmem:[#allocation2 + $0x28] sm:$0x3] %vm1380_vm5, %v5702_v1  ;;  %v1590_v17 = vsel %vm1512_vm2, %v1461_v11, 0  ;;  %v1692_v28 = vsel %vm1512_vm2, %v5432_v61, 0 }
 0x203   :  { %v1100_v6 = vadd.f32 %v1099_v36, %v1098_v46  ;;  %v1152_v7 = vrot.slane %v1151_v9, 4  ;;  %v1268_v22 = vadd.f32 %v1267_v56, %v1266_v49  ;;  %v1304_v33 = vrot.slane %v1303_v4, 4  ;;  %1386 = vst.msk [vmem:[#allocation2 + $0x30] sm:$0xff] %vm1067_vm3, %v5702_v1  ;;  %v5441_v46 = vld [vmem:[%s8995_s2 + $0xc] sm:$0xf]  ;;  %1599 = vmatpush.bf16.msra.mxu2 %v1590_v17  ;;  %1701 = vmatpush.bf16.msra.mxu3 %v1692_v28 }
 0x204   :  { %1387 = vst.msk [vmem:[#allocation2 + $0x38] sm:$0x3] %vm1380_vm5, %v5702_v1  ;;  %v1810_v57 = vsel %vm1512_vm2, %v5441_v46, 0 }
 0x205   :  { %v1101_v37 = vrot.slane %v1100_v6, 2  ;;  %v1153_v27 = vadd.f32 %v1152_v7, %v1151_v9  ;;  %v1269_v26 = vrot.slane %v1268_v22, 2  ;;  %v1305_v51 = vadd.f32 %v1304_v33, %v1303_v4  ;;  %1388 = vst.msk [vmem:[#allocation2 + $0x40] sm:$0xff] %vm1067_vm3, %v5702_v1  ;;  %1819 = vmatpush.bf16.msrb.mxu0 %v1810_v57  ;;  %v1065_v33 = vld [vmem:[%s8998_s5] sm:$0x1] }
 0x206   :  { %1389 = vst.msk [vmem:[#allocation2 + $0x48] sm:$0x3] %vm1380_vm5, %v5702_v1 }
 0x207   :  { %v1102_v14 = vadd.f32 %v1101_v37, %v1100_v6  ;;  %v1154_v10 = vrot.slane %v1153_v27, 2  ;;  %v1270_v35 = vadd.f32 %v1269_v26, %v1268_v22  ;;  %v1306_v34 = vrot.slane %v1305_v51, 2  ;;  %1390 = vst.msk [vmem:[#allocation2 + $0x50] sm:$0xff] %vm1067_vm3, %v5702_v1 }
 0x208   :  { %1391 = vst.msk [vmem:[#allocation2 + $0x58] sm:$0x3] %vm1380_vm5, %v5702_v1 }
 0x209   :  { %v1103_v38 = vrot.slane %v1102_v14, 1  ;;  %v1155_v13 = vadd.f32 %v1154_v10, %v1153_v27  ;;  %v1271_v41 = vrot.slane %v1270_v35, 1  ;;  %v1307_v0 = vadd.f32 %v1306_v34, %v1305_v51  ;;  %1392 = vst.msk [vmem:[#allocation2 + $0x60] sm:$0xff] %vm1067_vm3, %v5702_v1  ;;  %v5450_v51 = vld [vmem:[%s8995_s2 + $0x10] sm:$0xf] }
 0x20a   :  { %1393 = vst.msk [vmem:[#allocation2 + $0x68] sm:$0x3] %vm1380_vm5, %v5702_v1  ;;  %v1066_v34 = vld [vmem:[%s8999_s6] sm:$0x1] }
 0x20b   :  { %v1104_v53 = vadd.f32 %v1103_v38, %v1102_v14  ;;  %v1156_v62 = vrot.slane %v1155_v13, 1  ;;  %v1272_v52 = vadd.f32 %v1271_v41, %v1270_v35  ;;  %v1308_v8 = vrot.slane %v1307_v0, 1  ;;  %1394 = vst.msk [vmem:[#allocation2 + $0x70] sm:$0xff] %vm1067_vm3, %v5702_v1 }
 0x20c   :  { %1395 = vst.msk [vmem:[#allocation2 + $0x78] sm:$0x3] %vm1380_vm5, %v5702_v1  ;;  %v1928_v35 = vsel %vm1512_vm2, %v5450_v51, 0 }
 0x20d   :  { %v1157_v42 = vadd.f32 %v1156_v62, %v1155_v13  ;;  %v6733_v25 = vmul.f32 0.0078125, %v1104_v53  ;;  %v1309_v18 = vadd.f32 %v1308_v8, %v1307_v0  ;;  %v6735_v60 = vmul.f32 0.0078125, %v1272_v52  ;;  %1396 = vst.msk [vmem:[#allocation2 + $0x80] sm:$0xff] %vm1067_vm3, %v5702_v1  ;;  %1937 = vmatpush.bf16.msrb.mxu1 %v1928_v35  ;;  %v1437_v35 = vld [vmem:[#allocation2] sm:$0xff] }
 0x20e   :  { %1397 = vst.msk [vmem:[#allocation2 + $0x88] sm:$0x3] %vm1380_vm5, %v5702_v1 }
 0x20f   :  { %v1159_v39 = vmul.f32 0.0078125, %v1157_v42  ;;  %v1160_v16 = vmul.f32 %v6733_v25, %v6733_v25  ;;  %v1311_v20 = vmul.f32 0.0078125, %v1309_v18  ;;  %v1312_v55 = vmul.f32 %v6735_v60, %v6735_v60  ;;  %1398 = vst.msk [vmem:[#allocation2 + $0x90] sm:$0xff] %vm1067_vm3, %v5702_v1 }
 0x210   :  { %1399 = vst.msk [vmem:[#allocation2 + $0x98] sm:$0x3] %vm1380_vm5, %v5702_v1 }
 0x211   :  { %v1161_v31 = vsub.f32 %v1159_v39, %v1160_v16  ;;  %v1313_v12 = vsub.f32 %v1311_v20, %v1312_v55  ;;  %1400 = vst.msk [vmem:[#allocation2 + $0xa0] sm:$0xff] %vm1067_vm3, %v5702_v1 }
 0x212   :  { %1401 = vst.msk [vmem:[#allocation2 + $0xa8] sm:$0x3] %vm1380_vm5, %v5702_v1 }
 0x213   :  { %v1162_v43 = vmax.f32 %v1161_v31, 0.0  ;;  %v1314_v2 = vmax.f32 %v1313_v12, 0.0  ;;  %1402 = vst.msk [vmem:[#allocation2 + $0xb0] sm:$0xff] %vm1067_vm3, %v5702_v1 }
 0x214   :  { %1403 = vst.msk [vmem:[#allocation2 + $0xb8] sm:$0x3] %vm1380_vm5, %v5702_v1 }
 0x215   :  { %v1163_v29 = vadd.f32 1e-05, %v1162_v43  ;;  %v1315_v63 = vadd.f32 1e-05, %v1314_v2  ;;  %1404 = vst.msk [vmem:[#allocation2 + $0xc0] sm:$0xff] %vm1067_vm3, %v5702_v1 }
 0x216   :  { %1405 = vst.msk [vmem:[#allocation2 + $0xc8] sm:$0x3] %vm1380_vm5, %v5702_v1 }
 0x217   :  { %5666 = vrsqrt.f32 %v1163_v29  ;;  %vm1170_vm8 = vweird.f32 %v1163_v29  ;;  %vm1322_vm10 = vweird.f32 %v1315_v63  ;;  %1406 = vst.msk [vmem:[#allocation2 + $0xd0] sm:$0xff] %vm1067_vm3, %v5702_v1 }
 0x218   :  { %5668 = vrsqrt.f32 %v1315_v63  ;;  %1407 = vst.msk [vmem:[#allocation2 + $0xd8] sm:$0x3] %vm1380_vm5, %v5702_v1 }
 0x219   :  { %1408 = vst.msk [vmem:[#allocation2 + $0xe0] sm:$0xff] %vm1067_vm3, %v5702_v1 }
 0x21a   :  { %1409 = vst.msk [vmem:[#allocation2 + $0xe8] sm:$0x3] %vm1380_vm5, %v5702_v1 }
 0x21b   :  { %1410 = vst.msk [vmem:[#allocation2 + $0xf0] sm:$0xff] %vm1067_vm3, %v5702_v1 }
 0x21c   :  { %1411 = vst.msk [vmem:[#allocation2 + $0xf8] sm:$0x3] %vm1380_vm5, %v5702_v1 }
 0x21d   :  { %v5667_v48 = vpop.eup %5666  ;;  %1412 = vst.msk [vmem:[#allocation2 + $0x100] sm:$0xff] %vm1067_vm3, %v5702_v1 }
 0x21e   :  { %v5669_v49 = vpop.eup %5668  ;;  %v1165_v24 = vmul.f32 %v5667_v48, %v1163_v29  ;;  %vm1171_vm6 = vweird.f32 %v5667_v48  ;;  %1413 = vst.msk [vmem:[#allocation2 + $0x108] sm:$0x3] %vm1380_vm5, %v5702_v1 }
 0x21f   :  { %v1317_v36 = vmul.f32 %v5669_v49, %v1315_v63  ;;  %vm1323_vm7 = vweird.f32 %v5669_v49  ;;  %vm1172_vm9 = vmor %vm1170_vm8, %vm1171_vm6  ;;  %1414 = vst.msk [vmem:[#allocation2 + $0x110] sm:$0xff] %vm1067_vm3, %v5702_v1 }
 0x220   :  { %v1166_v9 = vmul.f32 %v5667_v48, %v1165_v24  ;;  %vm1324_vm11 = vmor %vm1322_vm10, %vm1323_vm7  ;;  %1415 = vst.msk [vmem:[#allocation2 + $0x118] sm:$0x3] %vm1380_vm5, %v5702_v1 }
 0x221   :  { %v1318_v56 = vmul.f32 %v5669_v49, %v1317_v36  ;;  %1418 = vst.msk [vmem:[#allocation2 + $0x130] sm:$0xff] %vm1067_vm3, %v5702_v1 }
 0x222   :  { %v1167_v4 = vmul.f32 0.5, %v1166_v9  ;;  %1419 = vst.msk [vmem:[#allocation2 + $0x138] sm:$0x3] %vm1380_vm5, %v5702_v1 }
 0x223   :  { %v1319_v6 = vmul.f32 0.5, %v1318_v56 }
 0x224   :  { %v1168_v7 = vsub.f32 1.5, %v1167_v4 }
 0x225   :  { %v1320_v22 = vsub.f32 1.5, %v1319_v6 }
 0x226   :  { %v1169_v37 = vmul.f32 %v5667_v48, %v1168_v7 }
 0x227   :  { %v1321_v27 = vmul.f32 %v5669_v49, %v1320_v22 }
 0x228   :  { %v1173_v26 = vsel %vm1172_vm9, %v5667_v48, %v1169_v37 }
 0x229   :  { %v1174_v14 = vmul.f32 %v1173_v26, %v1065_v33  ;;  %v1325_v10 = vsel %vm1324_vm11, %v5669_v49, %v1321_v27 }
 0x22a   :  { %1327 = vrot.lane.b32.xlu0 %v1325_v10, %s5703_s24  ;;  %v1462_v10 = vld [vmem:[#allocation2 + $0x1] sm:$0xff] }
 0x22b   :  { %v1175_v38 = vmul.f32 %v1174_v14, %v6733_v25  ;;  %v6811_v13 = vperm.slane %v1174_v14, 0 }
 0x22d   :  { %v1176_v41 = vsub.f32 %v1066_v34, %v1175_v38  ;;  %v1195_v0 = vmul.f32 %v6811_v13, %v6723_v30  ;;  %v1180_v8 = vmul.f32 %v6811_v13, %v9074_v59  ;;  %v1181_v42 = vmul.f32 %v6811_v13, %v6538_v44  ;;  %v1641_v34 = vld [vmem:[#allocation2 + $0x2] sm:$0xff] }
 0x22e   :  { %v1182_v18 = vmul.f32 %v6811_v13, %v9077_v58  ;;  %v1183_v16 = vmul.f32 %v6811_v13, %v6548_v3  ;;  %v1184_v55 = vmul.f32 %v6811_v13, %v9081_v47  ;;  %v1185_v12 = vmul.f32 %v6811_v13, %v6595_v40 }
 0x22f   :  { %v6823_v53 = vperm.slane %v1176_v41, 0  ;;  %v1186_v29 = vmul.f32 %v6811_v13, %v6606_v54  ;;  %v1187_v61 = vmul.f32 %v6811_v13, %v6620_v5  ;;  %v1188_v28 = vmul.f32 %v6811_v13, %v6629_v45 }
 0x230   :  { %v1189_v24 = vmul.f32 %v6811_v13, %v6641_v23  ;;  %v1190_v9 = vmul.f32 %v6811_v13, %v6651_v19  ;;  %v1191_v1 = vmul.f32 %v6811_v13, %v6663_v50  ;;  %v1192_v22 = vmul.f32 %v6811_v13, %v6672_v32 }
 0x231   :  { %v1214_v62 = vadd.f32 %v6823_v53, %v1195_v0  ;;  %v1199_v25 = vadd.f32 %v6823_v53, %v1180_v8  ;;  %v1200_v39 = vadd.f32 %v6823_v53, %v1181_v42  ;;  %v1201_v20 = vadd.f32 %v6823_v53, %v1182_v18 }
 0x232   :  { %v1202_v31 = vadd.f32 %v6823_v53, %v1183_v16  ;;  %v1203_v2 = vadd.f32 %v6823_v53, %v1184_v55  ;;  %v1204_v11 = vadd.f32 %v6823_v53, %v1185_v12  ;;  %v1205_v17 = vadd.f32 %v6823_v53, %v1186_v29 }
 0x233   :  { %v1230_v52 = vmax.f32 %v1214_v62, 0.0  ;;  %v1215_v43 = vmax.f32 %v1199_v25, 0.0  ;;  %v1216_v63 = vmax.f32 %v1200_v39, 0.0  ;;  %v1217_v48 = vmax.f32 %v1201_v20, 0.0 }
 0x234   :  { %v1218_v46 = vmax.f32 %v1202_v31, 0.0  ;;  %v1206_v49 = vadd.f32 %v6823_v53, %v1187_v61  ;;  %v1219_v57 = vmax.f32 %v1203_v2, 0.0  ;;  %v1207_v36 = vadd.f32 %v6823_v53, %v1188_v28 }
 0x235   :  { %1436 = vst.msk [vmem:[#allocation2 + $0x121] sm:$0xff] %vm1067_vm3, %v1230_v52  ;;  %v1220_v56 = vmax.f32 %v1204_v11, 0.0  ;;  %v1208_v4 = vadd.f32 %v6823_v53, %v1189_v24  ;;  %v1221_v6 = vmax.f32 %v1205_v17, 0.0  ;;  %v1209_v7 = vadd.f32 %v6823_v53, %v1190_v9 }
 0x236   :  { %1421 = vst.msk [vmem:[#allocation2 + $0x11] sm:$0xff] %vm1067_vm3, %v1215_v43  ;;  %v1222_v33 = vmax.f32 %v1206_v49, 0.0  ;;  %v1210_v37 = vadd.f32 %v6823_v53, %v1191_v1  ;;  %v1193_v27 = vmul.f32 %v6811_v13, %v6686_v21  ;;  %v1223_v26 = vmax.f32 %v1207_v36, 0.0 }
 0x237   :  { %1422 = vst.msk [vmem:[#allocation2 + $0x21] sm:$0xff] %vm1067_vm3, %v1216_v63  ;;  %v1211_v51 = vadd.f32 %v6823_v53, %v1192_v22  ;;  %v1194_v14 = vmul.f32 %v6811_v13, %v6696_v15  ;;  %v1224_v38 = vmax.f32 %v1208_v4, 0.0  ;;  %v1225_v0 = vmax.f32 %v1209_v7, 0.0 }
 0x238   :  { %1423 = vst.msk [vmem:[#allocation2 + $0x31] sm:$0xff] %vm1067_vm3, %v1217_v48  ;;  %v1212_v41 = vadd.f32 %v6823_v53, %v1193_v27  ;;  %v1226_v13 = vmax.f32 %v1210_v37, 0.0 }
 0x239   :  { %1424 = vst.msk [vmem:[#allocation2 + $0x41] sm:$0xff] %vm1067_vm3, %v1218_v46  ;;  %v1213_v62 = vadd.f32 %v6823_v53, %v1194_v14  ;;  %v1227_v20 = vmax.f32 %v1211_v51, 0.0 }
 0x23a   :  { %1425 = vst.msk [vmem:[#allocation2 + $0x51] sm:$0xff] %vm1067_vm3, %v1219_v57  ;;  %v1228_v53 = vmax.f32 %v1212_v41, 0.0 }
 0x23b   :  { %1426 = vst.msk [vmem:[#allocation2 + $0x61] sm:$0xff] %vm1067_vm3, %v1220_v56  ;;  %v1229_v31 = vmax.f32 %v1213_v62, 0.0  ;;  %v1649_v62 = vld [vmem:[#allocation2 + $0xa2] sm:$0xff] }
 0x23c   :  { %1427 = vst.msk [vmem:[#allocation2 + $0x71] sm:$0xff] %vm1067_vm3, %v1221_v6  ;;  %v7089_v30 = vld [vmem:[#allocation2 + $0x120] sm:$0xff] }
 0x23d   :  { %v6905_v52 = vld [vmem:[#allocation2 + $0x11] sm:$0xff]  ;;  %1428 = vst.msk [vmem:[#allocation2 + $0x81] sm:$0xff] %vm1067_vm3, %v1222_v33 }
 0x23e   :  { %v1438_v8 = vld [vmem:[#allocation2 + $0x10] sm:$0xff]  ;;  %v1478_v25 = vpack.c.bf16 %v6905_v52, %v1462_v10  ;;  %v1760_v16 = vld [vmem:[#allocation2 + $0x20] sm:$0xff]  ;;  %1429 = vst.msk [vmem:[#allocation2 + $0xb1] sm:$0xff] %vm1067_vm3, %v1223_v26 }
 0x23f   :  { %v6907_v42 = vld [vmem:[#allocation2 + $0x12] sm:$0xff]  ;;  %v1453_v18 = vpack.c.bf16 %v1438_v8, %v1437_v35  ;;  %v1775_v55 = vpack.c.bf16 %v1760_v16, %v1438_v8  ;;  %1430 = vst.msk [vmem:[#allocation2 + $0xc1] sm:$0xff] %vm1067_vm3, %v1224_v38  ;;  %v6923_v12 = vld [vmem:[#allocation2 + $0x21] sm:$0xff] }
 0x240   :  { %v1657_v39 = vpack.c.bf16 %v6907_v42, %v1641_v34  ;;  %5416 = vmatmul.msk.bf16.vlgmr.msra.gmra.mxu1 %vm1067_vm3, %v1478_v25  ;;  %1431 = vst.msk [vmem:[#allocation2 + $0xd1] sm:$0xff] %vm1067_vm3, %v1225_v0  ;;  %v6925_v43 = vld [vmem:[#allocation2 + $0x31] sm:$0xff]  ;;  %v6927_v29 = vld [vmem:[#allocation2 + $0x22] sm:$0xff]  ;;  %v1893_v32 = vpack.c.bf16 %v6923_v12, %v6905_v52 }
 0x241   :  { %5424 = vmatmul.msk.bf16.vlgmr.msra.gmra.mxu2 %vm1067_vm3, %v1453_v18  ;;  %5442 = vmatmul.msk.bf16.vlgmr.msrb.gmra.mxu0 %vm1067_vm3, %v1775_v55  ;;  %1432 = vst.msk [vmem:[#allocation2 + $0xe1] sm:$0xff] %vm1067_vm3, %v1226_v13  ;;  %v1440_v2 = vld [vmem:[#allocation2 + $0x30] sm:$0xff]  ;;  %v1762_v11 = vld [vmem:[#allocation2 + $0x40] sm:$0xff]  ;;  %v6933_v61 = vpack.c.bf16 %v6925_v43, %v6923_v12  ;;  %v2011_v21 = vpack.c.bf16 %v6927_v29, %v6907_v42 }
 0x242   :  { %5433 = vmatmul.msk.bf16.vlgmr.msra.gmra.mxu3 %vm1067_vm3, %v1657_v39  ;;  %1433 = vst.msk [vmem:[#allocation2 + $0xf1] sm:$0xff] %vm1067_vm3, %v1227_v20  ;;  %v6929_v63 = vld [vmem:[#allocation2 + $0x32] sm:$0xff]  ;;  %v6935_v48 = vpack.c.bf16 %v1440_v2, %v1760_v16  ;;  %v1776_v28 = vpack.c.bf16 %v1762_v11, %v1440_v2  ;;  %v6948_v46 = vld [vmem:[#allocation2 + $0x41] sm:$0xff] }
 0x243   :  { %1434 = vst.msk [vmem:[#allocation2 + $0x101] sm:$0xff] %vm1067_vm3, %v1228_v53  ;;  %v6939_v17 = vpack.c.bf16 %v6929_v63, %v6927_v29  ;;  %v6950_v49 = vld [vmem:[#allocation2 + $0x51] sm:$0xff]  ;;  %v6952_v57 = vld [vmem:[#allocation2 + $0x42] sm:$0xff] }
 0x244   :  { %1435 = vst.msk [vmem:[#allocation2 + $0x111] sm:$0xff] %vm1067_vm3, %v1229_v31  ;;  %v1442_v24 = vld [vmem:[#allocation2 + $0x50] sm:$0xff]  ;;  %v1764_v9 = vld [vmem:[#allocation2 + $0x60] sm:$0xff]  ;;  %v6958_v56 = vpack.c.bf16 %v6950_v49, %v6948_v46 }
 0x245   :  { %v6954_v36 = vld [vmem:[#allocation2 + $0x52] sm:$0xff]  ;;  %v6960_v4 = vpack.c.bf16 %v1442_v24, %v1762_v11  ;;  %v1777_v6 = vpack.c.bf16 %v1764_v9, %v1442_v24  ;;  %v6973_v7 = vld [vmem:[#allocation2 + $0x61] sm:$0xff] }
 0x246   :  { %v6964_v1 = vpack.c.bf16 %v6954_v36, %v6952_v57  ;;  %v6975_v22 = vld [vmem:[#allocation2 + $0x71] sm:$0xff]  ;;  %v6977_v37 = vld [vmem:[#allocation2 + $0x62] sm:$0xff] }
 0x247   :  { %v1444_v33 = vld [vmem:[#allocation2 + $0x70] sm:$0xff]  ;;  %v6981_v26 = vld [vmem:[#allocation2 + $0x80] sm:$0xff]  ;;  %v6985_v51 = vpack.c.bf16 %v6975_v22, %v6973_v7 }
 0x248   :  { %v6979_v27 = vld [vmem:[#allocation2 + $0x72] sm:$0xff]  ;;  %v6987_v14 = vpack.c.bf16 %v1444_v33, %v1764_v9  ;;  %v1778_v35 = vpack.c.bf16 %v6981_v26, %v1444_v33  ;;  %v1445_v34 = vld [vmem:[#allocation2 + $0xa0] sm:$0xff] }
 0x249   :  { %v6991_v10 = vpack.c.bf16 %v6979_v27, %v6977_v37  ;;  %v1470_v38 = vld [vmem:[#allocation2 + $0xa1] sm:$0xff]  ;;  %v7001_v41 = vld [vmem:[#allocation2 + $0xb1] sm:$0xff] }
 0x24a   :  { %v1446_v0 = vld [vmem:[#allocation2 + $0xb0] sm:$0xff]  ;;  %v1768_v13 = vld [vmem:[#allocation2 + $0xc0] sm:$0xff]  ;;  %v1482_v25 = vpack.c.bf16 %v7001_v41, %v1470_v38 }
 0x24b   :  { %v7003_v8 = vld [vmem:[#allocation2 + $0xb2] sm:$0xff]  ;;  %v1457_v18 = vpack.c.bf16 %v1446_v0, %v1445_v34  ;;  %v1779_v16 = vpack.c.bf16 %v1768_v13, %v1446_v0  ;;  %v7011_v20 = vld [vmem:[#allocation2 + $0xc1] sm:$0xff] }
 0x24c   :  { %v1661_v39 = vpack.c.bf16 %v7003_v8, %v1649_v62  ;;  %v7013_v55 = vld [vmem:[#allocation2 + $0xd1] sm:$0xff]  ;;  %v7015_v31 = vld [vmem:[#allocation2 + $0xc2] sm:$0xff]  ;;  %v5413_v0 = vld [vmem:[%s8998_s5 + $0x1] sm:$0x1] }
 0x24d   :  { %v1448_v53 = vld [vmem:[#allocation2 + $0xd0] sm:$0xff]  ;;  %v1770_v11 = vld [vmem:[#allocation2 + $0xe0] sm:$0xff] }
 0x24e   :  { %v7017_v2 = vld [vmem:[#allocation2 + $0xd2] sm:$0xff]  ;;  %v7023_v24 = vpack.c.bf16 %v1448_v53, %v1768_v13  ;;  %v7085_v50 = vld [vmem:[#allocation2 + $0x102] sm:$0xff] }
 0x24f   :  { %v7027_v9 = vpack.c.bf16 %v7017_v2, %v7015_v31  ;;  %v5459_v33 = vld [vmem:[%s8995_s2 + $0x14] sm:$0xf] }
 0x250   :  { %5417 = vmatmul.msk.bf16.gmra.mxu1 %vm1067_vm3, %v6933_v61  ;;  %v2046_v34 = vsel %vm1512_vm2, %v5459_v33, 0  ;;  %v1772_v33 = vld [vmem:[#allocation2 + $0x100] sm:$0xff]  ;;  %v1452_v15 = vld [vmem:[#allocation2 + $0x110] sm:$0xff] }
 0x251   :  { %5425 = vmatmul.msk.bf16.gmra.mxu2 %vm1067_vm3, %v6935_v48  ;;  %5443 = vmatmul.msk.bf16.gmra.mxu0 %vm1067_vm3, %v1776_v28  ;;  %v7021_v28 = vpack.c.bf16 %v7013_v55, %v7011_v20  ;;  %v7087_v5 = vld [vmem:[#allocation2 + $0x112] sm:$0xff]  ;;  %v7095_v45 = vpack.c.bf16 %v1452_v15, %v1772_v33 }
 0x252   :  { %5434 = vmatmul.msk.bf16.gmra.mxu3 %vm1067_vm3, %v6939_v17  ;;  %2055 = vmatpush.bf16.msrb.mxu2 %v2046_v34 }
 0x260   :  { %5418 = vmatmul.msk.bf16.gmra.mxu1 %vm1067_vm3, %v6958_v56 }
 0x261   :  { %5426 = vmatmul.msk.bf16.gmra.mxu2 %vm1067_vm3, %v6960_v4  ;;  %5444 = vmatmul.msk.bf16.gmra.mxu0 %vm1067_vm3, %v1777_v6  ;;  %v1780_v6 = vpack.c.bf16 %v1770_v11, %v1448_v53  ;;  %v7052_v53 = vld [vmem:[#allocation2 + $0xe2] sm:$0xff] }
 0x262   :  { %5435 = vmatmul.msk.bf16.gmra.mxu3 %vm1067_vm3, %v6964_v1 }
 0x270   :  { %5419 = vmatmul.msk.bf16.gmra.mxu1 %vm1067_vm3, %v6985_v51 }
 0x271   :  { %5427 = vmatmul.msk.bf16.gmra.mxu2 %vm1067_vm3, %v6987_v14  ;;  %5445 = vmatmul.msk.bf16.gmra.mxu0 %vm1067_vm3, %v1778_v35  ;;  %v5468_v35 = vld [vmem:[%s8995_s2 + $0x18] sm:$0xf] }
 0x272   :  { %5436 = vmatmul.msk.bf16.gmra.mxu3 %vm1067_vm3, %v6991_v10  ;;  %v2165_v38 = vsel %vm1512_vm2, %v5468_v35, 0 }
 0x273   :  { %2174 = vmatpush.bf16.msrb.mxu3 %v2165_v38  ;;  %v5477_v38 = vld [vmem:[%s8995_s2 + $0x1c] sm:$0xf] }
 0x280   :  { %5420 = vmatmul.msk.bf16.gmra.mxu1 %vm1067_vm3, %v1482_v25 }
 0x281   :  { %5428 = vmatmul.msk.bf16.gmra.mxu2 %vm1067_vm3, %v1457_v18  ;;  %5446 = vmatmul.msk.bf16.gmra.mxu0 %vm1067_vm3, %v1779_v16  ;;  %v7048_v18 = vld [vmem:[#allocation2 + $0xe1] sm:$0xff]  ;;  %v1450_v16 = vld [vmem:[#allocation2 + $0xf0] sm:$0xff] }
 0x282   :  { %5437 = vmatmul.msk.bf16.gmra.mxu3 %vm1067_vm3, %v1661_v39  ;;  %v7050_v39 = vld [vmem:[#allocation2 + $0xf1] sm:$0xff]  ;;  %v7060_v34 = vpack.c.bf16 %v1450_v16, %v1770_v11  ;;  %v5486_v11 = vld [vmem:[%s8995_s2 + $0x20] sm:$0xf]  ;;  %s5706_s2 = smov 128  }
 0x283   :  { %v7058_v35 = vpack.c.bf16 %v7050_v39, %v7048_v18 }
 0x290   :  { %5421 = vmatmul.msk.bf16.gmra.mxu1 %vm1067_vm3, %v7021_v28 }
 0x291   :  { %5429 = vmatmul.msk.bf16.gmra.mxu2 %vm1067_vm3, %v7023_v24  ;;  %5447 = vmatmul.msk.bf16.gmra.mxu0 %vm1067_vm3, %v1780_v6  ;;  %v7054_v6 = vld [vmem:[#allocation2 + $0xf2] sm:$0xff] }
 0x292   :  { %5438 = vmatmul.msk.bf16.gmra.mxu3 %vm1067_vm3, %v7027_v9 }
 0x29c   :  { %v1328_v62 = vpop.permute.xlu0 %1327 }
 0x29d   :  { %v1330_v13 = vmul.f32 %v5413_v0, %v1328_v62  ;;  %v7067_v0 = vpack.c.bf16 %v7054_v6, %v7052_v53  ;;  %v1781_v62 = vpack.c.bf16 %v1772_v33, %v1450_v16  ;;  %v7081_v16 = vld [vmem:[#allocation2 + $0x101] sm:$0xff] }
 0x29f   :  { %v1332_v25 = vperm.slane %v1330_v13, 0  ;;  %v2283_v13 = vsel %vm1512_vm2, %v5477_v38, 0  ;;  %v7083_v38 = vld [vmem:[#allocation2 + $0x111] sm:$0xff] }
 0x2a0   :  { %5422 = vmatmul.msk.bf16.gmra.mxu1 %vm1067_vm3, %v7058_v35  ;;  %2292 = vmatpush.bf16.msra.mxu0 %v2283_v13  ;;  %v7099_v13 = vpack.c.bf16 %v7087_v5, %v7085_v50 }
 0x2a1   :  { %1333 = vrot.lane.b32.xlu0 %v1332_v25, %s5704_s8  ;;  %5430 = vmatmul.msk.bf16.gmra.mxu2 %vm1067_vm3, %v7060_v34  ;;  %v2401_v25 = vsel %vm1512_vm2, %v5486_v11, 0  ;;  %v1782_v11 = vpack.c.bf16 %v7089_v30, %v1452_v15 }
 0x2a2   :  { %5439 = vmatmul.msk.bf16.gmra.mxu3 %vm1067_vm3, %v7067_v0  ;;  %5448 = vmatmul.msk.bf16.gmra.mxu0 %vm1067_vm3, %v1781_v62  ;;  %v7093_v62 = vpack.c.bf16 %v7083_v38, %v7081_v16 }
 0x2a3   :  { %2410 = vmatpush.bf16.msra.mxu1 %v2401_v25 }
 0x2b0   :  { %5423 = vmatmul.msk.bf16.gmra.mxu1 %vm1067_vm3, %v7093_v62 }
 0x2b1   :  { %5431 = vmatmul.msk.bf16.gmra.mxu2 %vm1067_vm3, %v7095_v45 }
 0x2b2   :  { %5440 = vmatmul.msk.bf16.gmra.mxu3 %vm1067_vm3, %v7099_v13  ;;  %5449 = vmatmul.msk.bf16.gmra.mxu0 %vm1067_vm3, %v1782_v11 }
 0x2bd   :  { %v1525_v25 = vpop.f32.mrf.mxu1 }
 0x2be   :  { %v1821_v33 = vpop.f32.mrf.mxu0 }
 0x2c0   :  { %5451 = vmatmul.msk.bf16.vlgmr.msrb.gmra.mxu1 %vm1067_vm3, %v1893_v32 }
 0x2c1   :  { %5460 = vmatmul.msk.bf16.vlgmr.msrb.gmra.mxu2 %vm1067_vm3, %v2011_v21 }
 0x2c2   :  { %5469 = vmatmul.msk.bf16.vlgmr.msrb.gmra.mxu3 %vm1067_vm3, %v6935_v48  ;;  %5478 = vmatmul.msk.bf16.vlgmr.msra.gmra.mxu0 %vm1067_vm3, %v6933_v61  ;;  %v1894_v48 = vpack.c.bf16 %v6948_v46, %v6925_v43  ;;  %v2012_v61 = vpack.c.bf16 %v6952_v57, %v6929_v63 }
 0x2c4   :  { %v1601_v15 = vpop.f32.mrf.mxu2 }
 0x2c5   :  { %v1602_v11 = vadd.f32 %v1601_v15, %v1525_v25  ;;  %v1703_v47 = vpop.f32.mrf.mxu3  ;;  %v1527_v23 = vpop.f32.mrf.mxu1 }
 0x2c6   :  { %v1823_v44 = vpop.f32.mrf.mxu0 }
 0x2c7   :  { %v1743_v19 = vadd.f32 %v1703_v47, %v1602_v11 }
 0x2c9   :  { %v7119_v52 = vadd.f32 %v1821_v33, %v1743_v19 }
 0x2cc   :  { %v1603_v12 = vpop.f32.mrf.mxu2 }
 0x2cd   :  { %v1604_v42 = vadd.f32 %v1603_v12, %v1527_v23  ;;  %v1705_v29 = vpop.f32.mrf.mxu3  ;;  %v1530_v32 = vpop.f32.mrf.mxu1 }
 0x2ce   :  { %v1826_v21 = vpop.f32.mrf.mxu0 }
 0x2cf   :  { %v1744_v40 = vadd.f32 %v1705_v29, %v1604_v42 }
 0x2d0   :  { %5452 = vmatmul.msk.bf16.gmra.mxu1 %vm1067_vm3, %v1894_v48 }
 0x2d1   :  { %5461 = vmatmul.msk.bf16.gmra.mxu2 %vm1067_vm3, %v2012_v61  ;;  %v7127_v47 = vadd.f32 %v1823_v44, %v1744_v40 }
 0x2d2   :  { %5470 = vmatmul.msk.bf16.gmra.mxu3 %vm1067_vm3, %v6960_v4  ;;  %5479 = vmatmul.msk.bf16.gmra.mxu0 %vm1067_vm3, %v6958_v56  ;;  %v1895_v4 = vpack.c.bf16 %v6973_v7, %v6950_v49  ;;  %v2013_v56 = vpack.c.bf16 %v6977_v37, %v6954_v36  ;;  %v1884_v37 = vld [vmem:[#allocation2 + $0x81] sm:$0xff] }
 0x2d4   :  { %v1606_v23 = vpop.f32.mrf.mxu2 }
 0x2d5   :  { %v1607_v19 = vadd.f32 %v1606_v23, %v1530_v32  ;;  %v1708_v25 = vpop.f32.mrf.mxu3  ;;  %v1532_v33 = vpop.f32.mrf.mxu1  ;;  %v7149_v23 = vld [vmem:[#allocation2 + $0x82] sm:$0xff] }
 0x2d6   :  { %v1828_v46 = vpop.f32.mrf.mxu0 }
 0x2d7   :  { %v1745_v43 = vadd.f32 %v1708_v25, %v1607_v19 }
 0x2d9   :  { %v7133_v15 = vadd.f32 %v1826_v21, %v1745_v43  ;;  %v2239_v43 = vld [vmem:[#allocation2 + $0x91] sm:$0xff] }
 0x2dc   :  { %v1608_v63 = vpop.f32.mrf.mxu2 }
 0x2dd   :  { %v1609_v57 = vadd.f32 %v1608_v63, %v1532_v33  ;;  %v1710_v11 = vpop.f32.mrf.mxu3  ;;  %v1535_v12 = vpop.f32.mrf.mxu1  ;;  %v2121_v33 = vld [vmem:[#allocation2 + $0x90] sm:$0xff] }
 0x2de   :  { %v1831_v40 = vpop.f32.mrf.mxu0 }
 0x2df   :  { %v1746_v44 = vadd.f32 %v1710_v11, %v1609_v57  ;;  %v2014_v57 = vpack.c.bf16 %v7149_v23, %v6979_v27  ;;  %v2133_v11 = vpack.c.bf16 %v2121_v33, %v6981_v26 }
 0x2e0   :  { %5453 = vmatmul.msk.bf16.gmra.mxu1 %vm1067_vm3, %v1895_v4 }
 0x2e1   :  { %5462 = vmatmul.msk.bf16.gmra.mxu2 %vm1067_vm3, %v2013_v56  ;;  %v7141_v42 = vadd.f32 %v1828_v46, %v1746_v44 }
 0x2e2   :  { %5471 = vmatmul.msk.bf16.gmra.mxu3 %vm1067_vm3, %v6987_v14  ;;  %5480 = vmatmul.msk.bf16.gmra.mxu0 %vm1067_vm3, %v6985_v51  ;;  %v1896_v51 = vpack.c.bf16 %v1884_v37, %v6975_v22 }
 0x2e4   :  { %v1611_v29 = vpop.f32.mrf.mxu2 }
 0x2e5   :  { %v1612_v32 = vadd.f32 %v1611_v29, %v1535_v12  ;;  %v1713_v21 = vpop.f32.mrf.mxu3  ;;  %v1537_v48 = vpop.f32.mrf.mxu1  ;;  %v2251_v12 = vpack.c.bf16 %v2239_v43, %v1884_v37 }
 0x2e6   :  { %v1833_v7 = vpop.f32.mrf.mxu0 }
 0x2e7   :  { %v1747_v49 = vadd.f32 %v1713_v21, %v1612_v32 }
 0x2e9   :  { %v7147_v61 = vadd.f32 %v1831_v40, %v1747_v49 }
 0x2ec   :  { %v1613_v36 = vpop.f32.mrf.mxu2 }
 0x2ed   :  { %v1614_v19 = vadd.f32 %v1613_v36, %v1537_v48  ;;  %v1715_v25 = vpop.f32.mrf.mxu3  ;;  %v1540_v14 = vpop.f32.mrf.mxu1 }
 0x2ee   :  { %v1836_v63 = vpop.f32.mrf.mxu0 }
 0x2ef   :  { %v1748_v46 = vadd.f32 %v1715_v25, %v1614_v19  ;;  %v2015_v19 = vpack.c.bf16 %v7015_v31, %v7003_v8 }
 0x2f0   :  { %5454 = vmatmul.msk.bf16.gmra.mxu1 %vm1067_vm3, %v1896_v51 }
 0x2f1   :  { %5463 = vmatmul.msk.bf16.gmra.mxu2 %vm1067_vm3, %v2014_v57  ;;  %v7157_v44 = vadd.f32 %v1833_v7, %v1748_v46  ;;  %v1897_v7 = vpack.c.bf16 %v7011_v20, %v7001_v41 }
 0x2f2   :  { %5472 = vmatmul.msk.bf16.gmra.mxu3 %vm1067_vm3, %v2133_v11  ;;  %5481 = vmatmul.msk.bf16.gmra.mxu0 %vm1067_vm3, %v2251_v12  ;;  %v1898_v11 = vpack.c.bf16 %v7048_v18, %v7013_v55  ;;  %v2016_v12 = vpack.c.bf16 %v7052_v53, %v7017_v2 }
 0x2f4   :  { %v1616_v40 = vpop.f32.mrf.mxu2 }
 0x2f5   :  { %v1617_v4 = vadd.f32 %v1616_v40, %v1540_v14  ;;  %v1718_v56 = vpop.f32.mrf.mxu3  ;;  %v1542_v22 = vpop.f32.mrf.mxu1 }
 0x2f6   :  { %v1838_v32 = vpop.f32.mrf.mxu0 }
 0x2f7   :  { %v1749_v29 = vadd.f32 %v1718_v56, %v1617_v4 }
 0x2f9   :  { %v7161_v27 = vadd.f32 %v1836_v63, %v1749_v29 }
 0x2fc   :  { %v1618_v26 = vpop.f32.mrf.mxu2 }
 0x2fd   :  { %v1619_v21 = vadd.f32 %v1618_v26, %v1542_v22  ;;  %v1720_v48 = vpop.f32.mrf.mxu3  ;;  %v1545_v49 = vpop.f32.mrf.mxu1 }
 0x2fe   :  { %v1841_v37 = vpop.f32.mrf.mxu0 }
 0x2ff   :  { %v1750_v36 = vadd.f32 %v1720_v48, %v1619_v21 }
 0x300   :  { %5455 = vmatmul.msk.bf16.gmra.mxu1 %vm1067_vm3, %v1897_v7 }
 0x301   :  { %5464 = vmatmul.msk.bf16.gmra.mxu2 %vm1067_vm3, %v2015_v19  ;;  %v7169_v25 = vadd.f32 %v1838_v32, %v1750_v36  ;;  %v2247_v19 = vld [vmem:[#allocation2 + $0x131] sm:$0xff] }
 0x302   :  { %5473 = vmatmul.msk.bf16.gmra.mxu3 %vm1067_vm3, %v7023_v24  ;;  %5482 = vmatmul.msk.bf16.gmra.mxu0 %vm1067_vm3, %v7021_v28 }
 0x304   :  { %v1621_v33 = vpop.f32.mrf.mxu2 }
 0x305   :  { %v1622_v43 = vadd.f32 %v1621_v33, %v1545_v49  ;;  %v1723_v14 = vpop.f32.mrf.mxu3  ;;  %v7175_v46 = vpop.f32.mrf.mxu1 }
 0x306   :  { %v7177_v20 = vpop.f32.mrf.mxu0 }
 0x307   :  { %v1751_v41 = vadd.f32 %v1723_v14, %v1622_v43 }
 0x309   :  { %v7179_v8 = vadd.f32 %v1841_v37, %v1751_v41  ;;  %v7228_v37 = vld [vmem:[#allocation2 + $0x122] sm:$0xff] }
 0x30a   :  { %v2018_v14 = vpack.c.bf16 %v7228_v37, %v7087_v5 }
 0x30c   :  { %v7181_v31 = vpop.f32.mrf.mxu2 }
 0x30d   :  { %v7183_v63 = vpop.f32.mrf.mxu3  ;;  %v1550_v24 = vpop.f32.mrf.mxu1 }
 0x30e   :  { %v1846_v57 = vpop.f32.mrf.mxu0 }
 0x310   :  { %5456 = vmatmul.msk.bf16.gmra.mxu1 %vm1067_vm3, %v1898_v11 }
 0x311   :  { %5465 = vmatmul.msk.bf16.gmra.mxu2 %vm1067_vm3, %v2016_v12 }
 0x312   :  { %5474 = vmatmul.msk.bf16.gmra.mxu3 %vm1067_vm3, %v7060_v34  ;;  %5483 = vmatmul.msk.bf16.gmra.mxu0 %vm1067_vm3, %v7058_v35  ;;  %v1899_v34 = vpack.c.bf16 %v7081_v16, %v7050_v39  ;;  %v2017_v35 = vpack.c.bf16 %v7085_v50, %v7054_v6  ;;  %v1892_v6 = vld [vmem:[#allocation2 + $0x121] sm:$0xff] }
 0x313   :  { %v7185_v51 = vpop.permute.xlu0 %1333  ;;  %v1900_v43 = vpack.c.bf16 %v1892_v6, %v7083_v38 }
 0x314   :  { %v1336_v28 = vmul.f32 %v7185_v51, %v6735_v60  ;;  %v1626_v60 = vpop.f32.mrf.mxu2 }
 0x315   :  { %v1627_v40 = vadd.f32 %v1626_v60, %v1550_v24  ;;  %v1728_v4 = vpop.f32.mrf.mxu3  ;;  %v7200_v56 = vpop.f32.mrf.mxu1  ;;  %v2255_v24 = vpack.c.bf16 %v2247_v19, %v1892_v6 }
 0x316   :  { %1338 = vrot.lane.b32.xlu1 %v1336_v28, %s5703_s24  ;;  %v7202_v18 = vpop.f32.mrf.mxu0 }
 0x317   :  { %v1753_v55 = vadd.f32 %v1728_v4, %v1627_v40 }
 0x319   :  { %v7204_v2 = vadd.f32 %v1846_v57, %v1753_v55 }
 0x31c   :  { %v7206_v53 = vpop.f32.mrf.mxu2 }
 0x31d   :  { %v7208_v22 = vpop.f32.mrf.mxu3  ;;  %v1555_v29 = vpop.f32.mrf.mxu1 }
 0x31f   :  { %v1851_v32 = vpop.f32.mrf.mxu0 }
 0x320   :  { %5457 = vmatmul.msk.bf16.gmra.mxu1 %vm1067_vm3, %v1899_v34 }
 0x321   :  { %5466 = vmatmul.msk.bf16.gmra.mxu2 %vm1067_vm3, %v2017_v35 }
 0x322   :  { %5475 = vmatmul.msk.bf16.gmra.mxu3 %vm1067_vm3, %v7095_v45  ;;  %5484 = vmatmul.msk.bf16.gmra.mxu0 %vm1067_vm3, %v7093_v62  ;;  %v2129_v45 = vld [vmem:[#allocation2 + $0x130] sm:$0xff] }
 0x323   :  { %v2137_v41 = vpack.c.bf16 %v2129_v45, %v7089_v30 }
 0x324   :  { %v1631_v26 = vpop.f32.mrf.mxu2 }
 0x325   :  { %v1632_v21 = vadd.f32 %v1631_v26, %v1555_v29  ;;  %v1733_v48 = vpop.f32.mrf.mxu3  ;;  %v7220_v49 = vpop.f32.mrf.mxu1 }
 0x327   :  { %v1755_v36 = vadd.f32 %v1733_v48, %v1632_v21  ;;  %v7222_v39 = vpop.f32.mrf.mxu0 }
 0x329   :  { %v7224_v16 = vadd.f32 %v1851_v32, %v1755_v36 }
 0x32c   :  { %v7226_v50 = vpop.f32.mrf.mxu2 }
 0x32d   :  { %v7230_v7 = vpop.f32.mrf.mxu3  ;;  %v1560_v62 = vpop.f32.mrf.mxu1 }
 0x32f   :  { %v1856_v33 = vpop.f32.mrf.mxu0 }
 0x330   :  { %5458 = vmatmul.msk.bf16.gmra.mxu1 %vm1067_vm3, %v1900_v43 }
 0x331   :  { %5467 = vmatmul.msk.bf16.gmra.mxu2 %vm1067_vm3, %v2018_v14 }
 0x332   :  { %5476 = vmatmul.msk.bf16.gmra.mxu3 %vm1067_vm3, %v2137_v41  ;;  %5485 = vmatmul.msk.bf16.gmra.mxu0 %vm1067_vm3, %v2255_v24 }
 0x334   :  { %v1636_v28 = vpop.f32.mrf.mxu2 }
 0x335   :  { %v1637_v57 = vadd.f32 %v1636_v28, %v1560_v62  ;;  %v1738_v11 = vpop.f32.mrf.mxu3  ;;  %v7240_v12 = vpop.f32.mrf.mxu1 }
 0x337   :  { %v1757_v38 = vadd.f32 %v1738_v11, %v1637_v57  ;;  %v7242_v60 = vpop.f32.mrf.mxu0 }
 0x339   :  { %v7244_v5 = vadd.f32 %v1856_v33, %v1757_v38 }
 0x33c   :  { %v7246_v30 = vpop.f32.mrf.mxu2 }
 0x33d   :  { %v7248_v40 = vpop.f32.mrf.mxu3  ;;  %v1939_v4 = vpop.f32.mrf.mxu1 }
 0x33e   :  { %v1979_v55 = vadd.f32 %v1939_v4, %v7119_v52 }
 0x33f   :  { %v2294_v29 = vpop.f32.mrf.mxu0 }
 0x340   :  { %5487 = vmatmul.msk.bf16.vlgmr.msra.gmra.mxu1 %vm1067_vm3, %v6939_v17 }
 0x344   :  { %v2057_v32 = vpop.f32.mrf.mxu2 }
 0x345   :  { %v2097_v34 = vadd.f32 %v2057_v32, %v1979_v55  ;;  %v2176_v35 = vpop.f32.mrf.mxu3  ;;  %v1941_v26 = vpop.f32.mrf.mxu1 }
 0x346   :  { %v7254_v48 = vadd.f32 %v1941_v26, %v7127_v47 }
 0x347   :  { %v2216_v21 = vadd.f32 %v2176_v35, %v2097_v34  ;;  %v7256_v6 = vpop.f32.mrf.mxu0 }
 0x349   :  { %v2334_v36 = vadd.f32 %v2294_v29, %v2216_v21  ;;  %v2357_v21 = vld [vmem:[#allocation2 + $0x92] sm:$0xff] }
 0x34c   :  { %v7258_v45 = vpop.f32.mrf.mxu2 }
 0x34d   :  { %v7260_v19 = vpop.f32.mrf.mxu3  ;;  %v1944_v52 = vpop.f32.mrf.mxu1 }
 0x34e   :  { %v1981_v62 = vadd.f32 %v1944_v52, %v7133_v15 }
 0x34f   :  { %v2299_v17 = vpop.f32.mrf.mxu0 }
 0x350   :  { %5488 = vmatmul.msk.bf16.gmra.mxu1 %vm1067_vm3, %v6964_v1 }
 0x354   :  { %v2062_v33 = vpop.f32.mrf.mxu2 }
 0x355   :  { %v2099_v43 = vadd.f32 %v2062_v33, %v1981_v62  ;;  %v2181_v14 = vpop.f32.mrf.mxu3  ;;  %v1946_v41 = vpop.f32.mrf.mxu1 }
 0x356   :  { %v7266_v24 = vadd.f32 %v1946_v41, %v7141_v42 }
 0x357   :  { %v2218_v47 = vadd.f32 %v2181_v14, %v2099_v43  ;;  %v7272_v38 = vpop.f32.mrf.mxu0 }
 0x359   :  { %v2336_v28 = vadd.f32 %v2299_v17, %v2218_v47 }
 0x35c   :  { %v7268_v57 = vpop.f32.mrf.mxu2 }
 0x35d   :  { %v7270_v11 = vpop.f32.mrf.mxu3  ;;  %v1949_v15 = vpop.f32.mrf.mxu1 }
 0x35e   :  { %v1983_v4 = vadd.f32 %v1949_v15, %v7147_v61  ;;  %v2369_v61 = vpack.c.bf16 %v2357_v21, %v7149_v23 }
 0x35f   :  { %v2304_v35 = vpop.f32.mrf.mxu0 }
 0x360   :  { %5489 = vmatmul.msk.bf16.gmra.mxu1 %vm1067_vm3, %v6991_v10 }
 0x364   :  { %v2067_v1 = vpop.f32.mrf.mxu2 }
 0x365   :  { %v2101_v55 = vadd.f32 %v2067_v1, %v1983_v4  ;;  %v2186_v29 = vpop.f32.mrf.mxu3  ;;  %v1951_v32 = vpop.f32.mrf.mxu1  ;;  %v2365_v1 = vld [vmem:[#allocation2 + $0x132] sm:$0xff] }
 0x366   :  { %v7278_v42 = vadd.f32 %v1951_v32, %v7157_v44  ;;  %v5414_v44 = vld [vmem:[%s8999_s6 + $0x1] sm:$0x1] }
 0x367   :  { %v2220_v34 = vadd.f32 %v2186_v29, %v2101_v55 }
 0x369   :  { %v2338_v26 = vadd.f32 %v2304_v35, %v2220_v34 }
 0x36d   :  { %v1954_v52 = vpop.f32.mrf.mxu1 }
 0x36e   :  { %v7281_v62 = vadd.f32 %v1954_v52, %v7161_v27 }
 0x370   :  { %5490 = vmatmul.msk.bf16.gmra.mxu1 %vm1067_vm3, %v2369_v61  ;;  %v7332_v61 = vpop.f32.mrf.mxu0 }
 0x375   :  { %v1956_v10 = vpop.f32.mrf.mxu1 }
 0x376   :  { %v7286_v17 = vadd.f32 %v1956_v10, %v7169_v25 }
 0x37d   :  { %v1959_v33 = vpop.f32.mrf.mxu1 }
 0x37e   :  { %v7289_v43 = vadd.f32 %v1959_v33, %v7179_v8 }
 0x380   :  { %5491 = vmatmul.msk.bf16.gmra.mxu1 %vm1067_vm3, %v7027_v9 }
 0x385   :  { %v7296_v41 = vpop.f32.mrf.mxu1 }
 0x388   :  { %v1339_v27 = vpop.permute.xlu1 %1338 }
 0x389   :  { %v1341_v14 = vsub.f32 %v5414_v44, %v1339_v27  ;;  %v5497_v44 = vld [vmem:[%s8996_s3 + $0x4] sm:$0xf] }
 0x38a   :  { %v2807_v27 = vsel %vm1512_vm2, %v5497_v44, 0 }
 0x38b   :  { %v1359_v23 = vperm.slane %v1341_v14, 0  ;;  %2816 = vmatpush.bf16.msra.mxu2 %v2807_v27 }
 0x38d   :  { %1360 = vrot.lane.b32.xlu1 %v1359_v23, %s5704_s8  ;;  %v1964_v25 = vpop.f32.mrf.mxu1 }
 0x38e   :  { %v7300_v47 = vadd.f32 %v1964_v25, %v7204_v2  ;;  %v2373_v2 = vpack.c.bf16 %v2365_v1, %v7228_v37 }
 0x390   :  { %5492 = vmatmul.msk.bf16.gmra.mxu1 %vm1067_vm3, %v7067_v0 }
 0x395   :  { %v7304_v8 = vpop.f32.mrf.mxu1 }
 0x39d   :  { %v1969_v15 = vpop.f32.mrf.mxu1 }
 0x39e   :  { %v7307_v4 = vadd.f32 %v1969_v15, %v7224_v16  ;;  %v7322_v16 = vpop.f32.mrf.mxu2 }
 0x3a0   :  { %9094 = vst [vmem:[#allocation11_spill] sm:$0xff] %v7307_v4  ;;  %5493 = vmatmul.msk.bf16.gmra.mxu1 %vm1067_vm3, %v7099_v13  ;;  %v7326_v13 = vpop.f32.mrf.mxu3 }
 0x3a5   :  { %v7311_v9 = vpop.f32.mrf.mxu1 }
 0x3a6   :  { %9095 = vst [vmem:[#allocation22_spill] sm:$0xff] %v7311_v9  ;;  %v7328_v52 = vpop.f32.mrf.mxu2  ;;  %v1342_v9 = vmul.f32 %v7185_v51, %v9074_v59  ;;  %v1348_v59 = vmul.f32 %v7185_v51, %v6606_v54 }
 0x3a8   :  { %v7334_v37 = vpop.f32.mrf.mxu3 }
 0x3ad   :  { %v1974_v55 = vpop.f32.mrf.mxu1 }
 0x3ae   :  { %v7314_v29 = vadd.f32 %v1974_v55, %v7244_v5  ;;  %v7338_v33 = vpop.f32.mrf.mxu2 }
 0x3b0   :  { %9096 = vst [vmem:[#allocation16_spill] sm:$0xff] %v7314_v29  ;;  %5494 = vmatmul.msk.bf16.gmra.mxu1 %vm1067_vm3, %v2373_v2  ;;  %v7348_v23 = vpop.f32.mrf.mxu3  ;;  %v1344_v29 = vmul.f32 %v7185_v51, %v9077_v58 }
 0x3b5   :  { %v7318_v0 = vpop.f32.mrf.mxu1 }
 0x3b6   :  { %9097 = vst [vmem:[#allocation18_spill] sm:$0xff] %v7318_v0  ;;  %v7350_v25 = vpop.f32.mrf.mxu2  ;;  %v1345_v0 = vmul.f32 %v7185_v51, %v6548_v3 }
 0x3b8   :  { %v7356_v55 = vpop.f32.mrf.mxu3 }
 0x3bd   :  { %v2412_v32 = vpop.f32.mrf.mxu1 }
 0x3be   :  { %v7320_v34 = vadd.f32 %v2412_v32, %v2334_v36  ;;  %v7340_v36 = vpop.f32.mrf.mxu0  ;;  %v7358_v2 = vpop.f32.mrf.mxu2 }
 0x3c0   :  { %v7364_v44 = vpop.f32.mrf.mxu3 }
 0x3c5   :  { %v7324_v35 = vpop.f32.mrf.mxu1 }
 0x3c6   :  { %v7352_v15 = vpop.f32.mrf.mxu0  ;;  %v7368_v27 = vpop.f32.mrf.mxu2 }
 0x3c7   :  { %9099 = vst [vmem:[#allocation21_spill] sm:$0xff] %v7352_v15 }
 0x3c8   :  { %v7386_v3 = vpop.f32.mrf.mxu3 }
 0x3cd   :  { %v2417_v21 = vpop.f32.mrf.mxu1 }
 0x3ce   :  { %v7330_v5 = vadd.f32 %v2417_v21, %v2336_v28  ;;  %v7360_v32 = vpop.f32.mrf.mxu0 }
 0x3cf   :  { %9101 = vst [vmem:[#allocation25_spill] sm:$0xff] %v7360_v32 }
 0x3d5   :  { %v7336_v10 = vpop.f32.mrf.mxu1 }
 0x3dd   :  { %v2422_v14 = vpop.f32.mrf.mxu1 }
 0x3de   :  { %v7346_v28 = vadd.f32 %v2422_v14, %v2338_v26  ;;  %v7370_v14 = vpop.f32.mrf.mxu0 }
 0x3df   :  { %9104 = vst [vmem:[#allocation28_spill] sm:$0xff] %v7370_v14  ;;  %v7394_v14 = vpop.f32.mrf.mxu2 }
 0x3e0   :  { %9098 = vst [vmem:[#allocation20_spill] sm:$0xff] %v7346_v28 }
 0x3e5   :  { %v7354_v1 = vpop.f32.mrf.mxu1 }
 0x3e6   :  { %9100 = vst [vmem:[#allocation24_spill] sm:$0xff] %v7354_v1  ;;  %v9106_v1 = vld [vmem:[#allocation6_spill] sm:$0xff] }
 0x3e7   :  { %v7422_v15 = vpop.f32.mrf.mxu2 }
 0x3ed   :  { %v7362_v21 = vpop.f32.mrf.mxu1 }
 0x3ee   :  { %9102 = vst [vmem:[#allocation26_spill] sm:$0xff] %v7362_v21 }
 0x3f5   :  { %v7366_v26 = vpop.f32.mrf.mxu1 }
 0x3f6   :  { %9103 = vst [vmem:[#allocation27_spill] sm:$0xff] %v7366_v26 }
 0x3fd   :  { %v7388_v58 = vpop.f32.mrf.mxu1 }
 0x3fe   :  { %9105 = vst [vmem:[#allocation29_spill] sm:$0xff] %v7388_v58  ;;  %v9110_v58 = vld [vmem:[#allocation12_spill] sm:$0xff] }
 0x3ff   :  { %v7378_v4 = vpop.permute.xlu1 %1360 }
 0x400   :  { %v1366_v21 = vadd.f32 %v7378_v4, %v1345_v0  ;;  %v1365_v28 = vadd.f32 %v7378_v4, %v1344_v29  ;;  %v1363_v26 = vadd.f32 %v7378_v4, %v1342_v9  ;;  %v1347_v0 = vmul.f32 %v7185_v51, %v9106_v1  ;;  %v9107_v29 = vld [vmem:[#allocation23_spill] sm:$0xff] }
 0x401   :  { %v1343_v9 = vmul.f32 %v7185_v51, %v9107_v29  ;;  %v1624_v1 = vadd.f32 %v7181_v31, %v7175_v46  ;;  %v7410_v29 = vpop.f32.mrf.mxu3 }
 0x402   :  { %2641 = vrot.lane.b32.xlu1 %v1366_v21, %s5703_s24  ;;  %2639 = vrot.lane.b32.xlu0 %v1365_v28, %s5703_s24  ;;  %v7398_v21 = vpop.f32.mrf.mxu0  ;;  %v1369_v28 = vadd.f32 %v7378_v4, %v1348_v59  ;;  %v1352_v59 = vmul.f32 %v7185_v51, %v9110_v58 }
 0x403   :  { %2635 = vrot.lane.b32.xlu2 %v1363_v26, %s5703_s24  ;;  %9108 = vst [vmem:[#allocation6_spill] sm:$0xff] %v7398_v21  ;;  %v1368_v26 = vadd.f32 %v7378_v4, %v1347_v0  ;;  %v1364_v32 = vadd.f32 %v7378_v4, %v1343_v9  ;;  %v9111_v21 = vld [vmem:[#allocation10_spill] sm:$0xff]  ;;  %v1752_v31 = vadd.f32 %v7183_v63, %v1624_v1 }
 0x404   :  { %v1351_v0 = vmul.f32 %v7185_v51, %v9111_v21  ;;  %v9112_v9 = vld [vmem:[#allocation14_spill] sm:$0xff]  ;;  %v1629_v21 = vadd.f32 %v7206_v53, %v7200_v56  ;;  %v2100_v1 = vadd.f32 %v7268_v57, %v7266_v24  ;;  %v9114_v53 = vld [vmem:[#allocation15_spill] sm:$0xff] }
 0x405   :  { %v7406_v54 = vpop.f32.mrf.mxu1 }
 0x406   :  { %9109 = vst [vmem:[#allocation23_spill] sm:$0xff] %v7406_v54  ;;  %v2098_v54 = vadd.f32 %v7258_v45, %v7254_v48  ;;  %v1634_v48 = vadd.f32 %v7226_v50, %v7220_v49  ;;  %v1754_v49 = vadd.f32 %v7208_v22, %v1629_v21  ;;  %v2102_v50 = vadd.f32 %v7322_v16, %v7278_v42 }
 0x407   :  { %v2219_v42 = vadd.f32 %v7270_v11, %v2100_v1 }
 0x408   :  { %v2217_v63 = vadd.f32 %v7260_v19, %v2098_v54  ;;  %v1756_v24 = vadd.f32 %v7230_v7, %v1634_v48  ;;  %v2105_v7 = vadd.f32 %v7350_v25, %v7289_v43  ;;  %v2107_v43 = vadd.f32 %v7368_v27, %v7300_v47  ;;  %v9119_v47 = vld [vmem:[#allocation17_spill] sm:$0xff] }
 0x409   :  { %v7456_v57 = vpop.f32.mrf.mxu3  ;;  %v1872_v25 = vadd.f32 %v7202_v18, %v1754_v49  ;;  %v1356_v18 = vmul.f32 %v7185_v51, %v9119_v47 }
 0x40a   :  { %2647 = vrot.lane.b32.xlu1 %v1369_v28, %s5703_s24  ;;  %2645 = vrot.lane.b32.xlu0 %v1368_v26, %s5703_s24  ;;  %v1346_v28 = vmul.f32 %v7185_v51, %v9112_v9  ;;  %v1373_v26 = vadd.f32 %v7378_v4, %v1352_v59  ;;  %v7426_v58 = vpop.f32.mrf.mxu0  ;;  %v1639_v59 = vadd.f32 %v7246_v30, %v7240_v12  ;;  %v9113_v9 = vld [vmem:[#allocation8_spill] sm:$0xff]  ;;  %v9115_v30 = vld [vmem:[#allocation9_spill] sm:$0xff] }
 0x40b   :  { %2637 = vrot.lane.b32.xlu2 %v1364_v32, %s5703_s24  ;;  %v1372_v32 = vadd.f32 %v7378_v4, %v1351_v0  ;;  %v1870_v0 = vadd.f32 %v7177_v20, %v1752_v31  ;;  %v1355_v56 = vmul.f32 %v7185_v51, %v9113_v9  ;;  %v2103_v12 = vadd.f32 %v7328_v52, %v7281_v62  ;;  %v9118_v31 = vld [vmem:[#allocation13_spill] sm:$0xff] }
 0x40c   :  { %v1367_v46 = vadd.f32 %v7378_v4, %v1346_v28  ;;  %v1354_v28 = vmul.f32 %v7185_v51, %v9114_v53  ;;  %v1350_v19 = vmul.f32 %v7185_v51, %v9115_v30  ;;  %v1758_v22 = vadd.f32 %v7248_v40, %v1639_v59 }
 0x40d   :  { %v7435_v45 = vpop.f32.mrf.mxu1  ;;  %v1988_v20 = vadd.f32 %v7296_v41, %v1870_v0  ;;  %v1376_v54 = vadd.f32 %v7378_v4, %v1355_v56  ;;  %v2335_v16 = vadd.f32 %v7256_v6, %v2217_v63  ;;  %v2104_v52 = vadd.f32 %v7338_v33, %v7286_v17  ;;  %v9116_v17 = vld [vmem:[#allocation19_spill] sm:$0xff] }
 0x40e   :  { %v1371_v62 = vadd.f32 %v7378_v4, %v1350_v19  ;;  %v2221_v40 = vadd.f32 %v7326_v13, %v2102_v50  ;;  %v2222_v11 = vadd.f32 %v7334_v37, %v2103_v12  ;;  %v1357_v33 = vmul.f32 %v7185_v51, %v9116_v17  ;;  %v9117_v13 = vld [vmem:[#allocation7_spill] sm:$0xff]  ;;  %v9122_v50 = vld [vmem:[#allocation28_spill] sm:$0xff] }
 0x40f   :  { %v2106_v41 = vadd.f32 %v7358_v2, %v1988_v20  ;;  %v7474_v6 = vadd.f32 %v7324_v35, %v2335_v16  ;;  %v1349_v37 = vmul.f32 %v7185_v51, %v9117_v13  ;;  %v1353_v35 = vmul.f32 %v7185_v51, %v9118_v31  ;;  %v9123_v20 = vld [vmem:[#allocation24_spill] sm:$0xff]  ;;  %v9128_v13 = vld [vmem:[#allocation22_spill] sm:$0xff] }
 0x410   :  { %v1874_v21 = vadd.f32 %v7222_v39, %v1756_v24  ;;  %v7492_v48 = vadd.f32 %v7242_v60, %v1758_v22  ;;  %v2337_v59 = vadd.f32 %v7272_v38, %v2219_v42  ;;  %v2223_v27 = vadd.f32 %v7348_v23, %v2104_v52  ;;  %v9124_v42 = vld [vmem:[#allocation20_spill] sm:$0xff] }
 0x411   :  { %v2224_v63 = vadd.f32 %v7356_v55, %v2105_v7  ;;  %v2225_v1 = vadd.f32 %v7364_v44, %v2106_v41  ;;  %v1990_v0 = vadd.f32 %v7304_v8, %v1872_v25  ;;  %v2510_v9 = vmul.f32 %v7474_v6, %v7474_v6  ;;  %v9127_v25 = vld [vmem:[#allocation11_spill] sm:$0xff] }
 0x412   :  { %2655 = vrot.lane.b32.xlu1 %v1373_v26, %s5703_s24  ;;  %2653 = vrot.lane.b32.xlu0 %v1372_v32, %s5703_s24  ;;  %v1375_v26 = vadd.f32 %v7378_v4, %v1354_v28  ;;  %v2089_v32 = vpop.f32.mrf.mxu2  ;;  %v7482_v2 = vpop.f32.mrf.mxu0  ;;  %v7504_v39 = vadd.f32 %v7336_v10, %v2337_v59  ;;  %v2339_v60 = vadd.f32 %v7332_v61, %v2221_v40  ;;  %v2473_v56 = vsel %vm1067_vm3, %v7474_v6, 0.0  ;;  %v9121_v28 = vld [vmem:[#allocation25_spill] sm:$0xff] }
 0x413   :  { %2643 = vrot.lane.b32.xlu2 %v1367_v46, %s5703_s24  ;;  %v2340_v38 = vadd.f32 %v7340_v36, %v2222_v11  ;;  %v2226_v51 = vadd.f32 %v7386_v3, %v2107_v43  ;;  %v2108_v23 = vadd.f32 %v7394_v14, %v1990_v0  ;;  %v1378_v55 = vadd.f32 %v7378_v4, %v1357_v33  ;;  %v2208_v36 = vpop.f32.mrf.mxu3  ;;  %v9120_v14 = vld [vmem:[#allocation21_spill] sm:$0xff]  ;;  %v9126_v33 = vld [vmem:[#allocation26_spill] sm:$0xff] }
 0x414   :  { %v1370_v44 = vadd.f32 %v7378_v4, %v1349_v37  ;;  %v2509_v8 = vmul.f32 %v7320_v34, %v7320_v34  ;;  %v2511_v10 = vmul.f32 %v7330_v5, %v7330_v5  ;;  %v1374_v61 = vadd.f32 %v7378_v4, %v1353_v35 }
 0x415   :  { %v7484_v46 = vpop.f32.mrf.mxu1  ;;  %v2472_v3 = vsel %vm1067_vm3, %v7320_v34, 0.0  ;;  %v2341_v53 = vadd.f32 %v9120_v14, %v2223_v27  ;;  %v2342_v49 = vadd.f32 %v9121_v28, %v2224_v63  ;;  %v2343_v12 = vadd.f32 %v9122_v50, %v2225_v1  ;;  %v9129_v1 = vld [vmem:[#allocation27_spill] sm:$0xff] }
 0x416   :  { %v2526_v30 = vsel %vm1067_vm3, %v2510_v9, 0.0  ;;  %v2475_v19 = vsel %vm1067_vm3, %v7330_v5, 0.0  ;;  %v2512_v24 = vmul.f32 %v7504_v39, %v7504_v39  ;;  %v2474_v22 = vadd.f32 %v2473_v56, %v2472_v3  ;;  %v9131_v56 = vld [vmem:[#allocation16_spill] sm:$0xff]  ;;  %v9132_v28 = vld [vmem:[#allocation23_spill] sm:$0xff] }
 0x417   :  { %v2513_v16 = vmul.f32 %v9124_v42, %v9124_v42  ;;  %v2525_v40 = vsel %vm1067_vm3, %v2509_v8, 0.0  ;;  %v2528_v11 = vsel %vm1067_vm3, %v2511_v10, 0.0  ;;  %v2477_v17 = vsel %vm1067_vm3, %v7504_v39, 0.0 }
 0x418   :  { %v7544_v43 = vadd.f32 %v9126_v33, %v2340_v38  ;;  %v1992_v37 = vadd.f32 %v9128_v13, %v1874_v21  ;;  %v2527_v35 = vadd.f32 %v2526_v30, %v2525_v40  ;;  %v2476_v59 = vadd.f32 %v2475_v19, %v2474_v22 }
 0x419   :  { %v2530_v47 = vsel %vm1067_vm3, %v2512_v24, 0.0  ;;  %v2479_v27 = vsel %vm1067_vm3, %v9124_v42, 0.0  ;;  %v7555_v0 = vadd.f32 %v9129_v1, %v2341_v53  ;;  %v7574_v50 = vadd.f32 %v9132_v28, %v2343_v12 }
 0x41a   :  { %2661 = vrot.lane.b32.xlu1 %v1376_v54, %s5703_s24  ;;  %2659 = vrot.lane.b32.xlu0 %v1375_v26, %s5703_s24  ;;  %v7532_v54 = vadd.f32 %v9123_v20, %v2339_v60  ;;  %v2227_v26 = vadd.f32 %v7410_v29, %v2108_v23  ;;  %v2092_v41 = vpop.f32.mrf.mxu2  ;;  %v2109_v29 = vadd.f32 %v7422_v15, %v9127_v25  ;;  %v2326_v31 = vpop.f32.mrf.mxu0  ;;  %v2532_v15 = vsel %vm1067_vm3, %v2513_v16, 0.0  ;;  %v9130_v23 = vld [vmem:[#allocation29_spill] sm:$0xff] }
 0x41b   :  { %2651 = vrot.lane.b32.xlu2 %v1371_v62, %s5703_s24  ;;  %v9125_v62 = vld [vmem:[#allocation6_spill] sm:$0xff]  ;;  %v2110_v9 = vadd.f32 %v2089_v32, %v1992_v37  ;;  %v2529_v60 = vadd.f32 %v2528_v11, %v2527_v35  ;;  %v2478_v38 = vadd.f32 %v2477_v17, %v2476_v59  ;;  %v2111_v10 = vadd.f32 %v2092_v41, %v9131_v56 }
 0x41c   :  { %v2344_v52 = vadd.f32 %v9125_v62, %v2226_v51  ;;  %v2514_v63 = vmul.f32 %v7532_v54, %v7532_v54  ;;  %v2481_v21 = vsel %vm1067_vm3, %v7532_v54, 0.0  ;;  %v2515_v51 = vmul.f32 %v7544_v43, %v7544_v43 }
 0x41d   :  { %v2442_v7 = vpop.f32.mrf.mxu1  ;;  %v2228_v8 = vadd.f32 %v7456_v57, %v2109_v29  ;;  %v2531_v32 = vadd.f32 %v2530_v47, %v2529_v60  ;;  %v2483_v14 = vsel %vm1067_vm3, %v7544_v43, 0.0  ;;  %v2516_v53 = vmul.f32 %v7555_v0, %v7555_v0 }
 0x41e   :  { %v2534_v3 = vsel %vm1067_vm3, %v2514_v63, 0.0  ;;  %v2345_v30 = vadd.f32 %v7426_v58, %v2227_v26  ;;  %v2536_v24 = vsel %vm1067_vm3, %v2515_v51, 0.0  ;;  %v2485_v20 = vsel %vm1067_vm3, %v7555_v0, 0.0 }
 0x41f   :  { %v2533_v57 = vadd.f32 %v2532_v15, %v2531_v32  ;;  %v7584_v12 = vadd.f32 %v7435_v45, %v2344_v52  ;;  %v2346_v41 = vadd.f32 %v7482_v2, %v2228_v8  ;;  %v2538_v58 = vsel %vm1067_vm3, %v2516_v53, 0.0  ;;  %v9133_v45 = vld [vmem:[#allocation18_spill] sm:$0xff] }
 0x420   :  { %v2518_v11 = vmul.f32 %v7574_v50, %v7574_v50  ;;  %v7593_v17 = vadd.f32 %v7484_v46, %v2345_v30  ;;  %v1994_v52 = vadd.f32 %v9133_v45, %v7492_v48  ;;  %v2489_v37 = vsel %vm1067_vm3, %v7574_v50, 0.0 }
 0x421   :  { %v2535_v62 = vadd.f32 %v2534_v3, %v2533_v57  ;;  %v2519_v35 = vmul.f32 %v7584_v12, %v7584_v12  ;;  %v7602_v59 = vadd.f32 %v2442_v7, %v2346_v41  ;;  %v2491_v48 = vsel %vm1067_vm3, %v7584_v12, 0.0 }
 0x422   :  { %2665 = vrot.lane.b32.xlu1 %v1378_v55, %s5703_s24  ;;  %2649 = vrot.lane.b32.xlu0 %v1370_v44, %s5703_s24  ;;  %v7563_v55 = vadd.f32 %v9130_v23, %v2342_v49  ;;  %v1377_v44 = vadd.f32 %v7378_v4, %v1356_v18  ;;  %v2229_v4 = vadd.f32 %v2208_v36, %v2110_v9  ;;  %v2211_v18 = vpop.f32.mrf.mxu3  ;;  %v2094_v40 = vpop.f32.mrf.mxu2  ;;  %v2542_v1 = vsel %vm1067_vm3, %v2518_v11, 0.0 }
 0x423   :  { %2657 = vrot.lane.b32.xlu2 %v1374_v61, %s5703_s24  ;;  %v2480_v61 = vadd.f32 %v2479_v27, %v2478_v38  ;;  %v2230_v16 = vadd.f32 %v2211_v18, %v2111_v10  ;;  %v2329_v33 = vpop.f32.mrf.mxu0  ;;  %v2537_v25 = vadd.f32 %v2536_v24, %v2535_v62  ;;  %v2112_v47 = vadd.f32 %v2094_v40, %v1994_v52 }
 0x424   :  { %v2517_v22 = vmul.f32 %v7563_v55, %v7563_v55  ;;  %v2487_v26 = vsel %vm1067_vm3, %v7563_v55, 0.0  ;;  %v2347_v13 = vadd.f32 %v2326_v31, %v2229_v4  ;;  %v2520_v31 = vmul.f32 %v7593_v17, %v7593_v17 }
 0x425   :  { %v2482_v49 = vadd.f32 %v2481_v21, %v2480_v61  ;;  %v2444_v19 = vpop.f32.mrf.mxu1  ;;  %v2539_v46 = vadd.f32 %v2538_v58, %v2537_v25  ;;  %v2348_v63 = vadd.f32 %v2329_v33, %v2230_v16  ;;  %v2544_v7 = vsel %vm1067_vm3, %v2519_v35, 0.0 }
 0x426   :  { %v2540_v2 = vsel %vm1067_vm3, %v2517_v22, 0.0  ;;  %v7609_v9 = vadd.f32 %v2444_v19, %v2347_v13  ;;  %v2493_v21 = vsel %vm1067_vm3, %v7593_v17, 0.0  ;;  %v2521_v51 = vmul.f32 %v7602_v59, %v7602_v59 }
 0x427   :  { %v2484_v36 = vadd.f32 %v2483_v14, %v2482_v49  ;;  %v2541_v60 = vadd.f32 %v2540_v2, %v2539_v46  ;;  %v2546_v32 = vsel %vm1067_vm3, %v2520_v31, 0.0  ;;  %v2495_v61 = vsel %vm1067_vm3, %v7602_v59, 0.0 }
 0x428   :  { %v2522_v3 = vmul.f32 %v7609_v9, %v7609_v9  ;;  %v2548_v28 = vsel %vm1067_vm3, %v2521_v51, 0.0  ;;  %v2497_v4 = vsel %vm1067_vm3, %v7609_v9, 0.0 }
 0x429   :  { %v2486_v29 = vadd.f32 %v2485_v20, %v2484_v36  ;;  %v2543_v8 = vadd.f32 %v2542_v1, %v2541_v60 }
 0x42a   :  { %v2550_v19 = vsel %vm1067_vm3, %v2522_v3, 0.0 }
 0x42b   :  { %2663 = vrot.lane.b32.xlu2 %v1377_v44, %s5703_s24  ;;  %v2488_v27 = vadd.f32 %v2487_v26, %v2486_v29  ;;  %v2213_v44 = vpop.f32.mrf.mxu3  ;;  %v2545_v14 = vadd.f32 %v2544_v7, %v2543_v8  ;;  %v2331_v57 = vpop.f32.mrf.mxu0  ;;  %v2755_v8 = vld [vmem:[%s8996_s3] sm:$0xf] }
 0x42c   :  { %v2231_v10 = vadd.f32 %v2213_v44, %v2112_v47 }
 0x42d   :  { %v2490_v38 = vadd.f32 %v2489_v37, %v2488_v27  ;;  %v2447_v15 = vpop.f32.mrf.mxu1  ;;  %v2547_v49 = vadd.f32 %v2546_v32, %v2545_v14 }
 0x42e   :  { %v7616_v23 = vadd.f32 %v2447_v15, %v2348_v63  ;;  %v2349_v20 = vadd.f32 %v2331_v57, %v2231_v10  ;;  %v5523_v10 = vld [vmem:[%s8996_s3 + $0xc] sm:$0xf] }
 0x42f   :  { %v2492_v56 = vadd.f32 %v2491_v48, %v2490_v38  ;;  %v2549_v22 = vadd.f32 %v2548_v28, %v2547_v49  ;;  %v3103_v14 = vsel %vm1512_vm2, %v5523_v10, 0 }
 0x430   :  { %v2523_v18 = vmul.f32 %v7616_v23, %v7616_v23  ;;  %v2499_v24 = vsel %vm1067_vm3, %v7616_v23, 0.0  ;;  %3112 = vmatpush.bf16.msrb.mxu1 %v3103_v14 }
 0x431   :  { %v2494_v53 = vadd.f32 %v2493_v21, %v2492_v56  ;;  %v2551_v40 = vadd.f32 %v2550_v19, %v2549_v22  ;;  %v5514_v56 = vld [vmem:[%s8996_s3 + $0x8] sm:$0xf]  ;;  %v5495_v19 = vld [vmem:[%s8998_s5 + $0x2] sm:$0x1] }
 0x432   :  { %v2552_v36 = vsel %vm1067_vm3, %v2523_v18, 0.0  ;;  %v2985_v3 = vsel %vm1512_vm2, %v5514_v56, 0  ;;  %v5532_v18 = vld [vmem:[%s8996_s3 + $0x10] sm:$0xf] }
 0x433   :  { %v2496_v30 = vadd.f32 %v2495_v61, %v2494_v53  ;;  %v2553_v33 = vadd.f32 %v2552_v36, %v2551_v40  ;;  %v2883_v61 = vsel %vm1512_vm2, %v2755_v8, 0  ;;  %2994 = vmatpush.bf16.msrb.mxu0 %v2985_v3  ;;  %v3221_v57 = vsel %vm1512_vm2, %v5532_v18, 0  ;;  %v2731_v18 = vld [vmem:[#allocation2] sm:$0xff] }
 0x434   :  { %2892 = vmatpush.bf16.msra.mxu3 %v2883_v61  ;;  %3230 = vmatpush.bf16.msrb.mxu2 %v3221_v57  ;;  %v2934_v57 = vld [vmem:[#allocation2 + $0x2] sm:$0xff] }
 0x435   :  { %v2498_v16 = vadd.f32 %v2497_v4, %v2496_v30  ;;  %v2449_v62 = vpop.f32.mrf.mxu1 }
 0x436   :  { %v7632_v41 = vadd.f32 %v2449_v62, %v2349_v20 }
 0x437   :  { %v2500_v58 = vadd.f32 %v2499_v24, %v2498_v16  ;;  %v5496_v16 = vld [vmem:[%s8999_s6 + $0x2] sm:$0x1] }
 0x438   :  { %v2501_v26 = vsel %vm1067_vm3, %v7632_v41, 0.0  ;;  %v2524_v11 = vmul.f32 %v7632_v41, %v7632_v41 }
 0x439   :  { %v2502_v45 = vadd.f32 %v2501_v26, %v2500_v58 }
 0x43a   :  { %v2554_v52 = vsel %vm1067_vm3, %v2524_v11, 0.0 }
 0x43b   :  { %v2503_v25 = vrot.slane %v2502_v45, 4  ;;  %v2555_v29 = vadd.f32 %v2554_v52, %v2553_v33 }
 0x43d   :  { %v2504_v13 = vadd.f32 %v2503_v25, %v2502_v45  ;;  %v2556_v2 = vrot.slane %v2555_v29, 4 }
 0x43f   :  { %v2505_v37 = vrot.slane %v2504_v13, 2  ;;  %v2557_v35 = vadd.f32 %v2556_v2, %v2555_v29 }
 0x441   :  { %v2506_v47 = vadd.f32 %v2505_v37, %v2504_v13  ;;  %v2558_v46 = vrot.slane %v2557_v35, 2 }
 0x443   :  { %v2507_v27 = vrot.slane %v2506_v47, 1  ;;  %v2559_v63 = vadd.f32 %v2558_v46, %v2557_v35 }
 0x445   :  { %v2508_v1 = vadd.f32 %v2507_v27, %v2506_v47  ;;  %v2560_v48 = vrot.slane %v2559_v63, 1 }
 0x447   :  { %v2561_v31 = vadd.f32 %v2560_v48, %v2559_v63  ;;  %v2562_v60 = vmul.f32 0.0078125, %v2508_v1 }
 0x449   :  { %v2563_v38 = vmul.f32 0.0078125, %v2561_v31  ;;  %v2564_v15 = vmul.f32 %v2562_v60, %v2562_v60 }
 0x44b   :  { %v2565_v7 = vsub.f32 %v2563_v38, %v2564_v15 }
 0x44d   :  { %v2566_v21 = vmax.f32 %v2565_v7, 0.0 }
 0x44f   :  { %v2567_v51 = vadd.f32 1e-05, %v2566_v21 }
 0x451   :  { %5670 = vrsqrt.f32 %v2567_v51  ;;  %vm2574_vm13 = vweird.f32 %v2567_v51 }
 0x457   :  { %v5671_v32 = vpop.eup %5670 }
 0x458   :  { %v2569_v53 = vmul.f32 %v5671_v32, %v2567_v51  ;;  %vm2575_vm12 = vweird.f32 %v5671_v32 }
 0x459   :  { %vm2576_vm14 = vmor %vm2574_vm13, %vm2575_vm12 }
 0x45a   :  { %v2570_v28 = vmul.f32 %v5671_v32, %v2569_v53 }
 0x45c   :  { %v2571_v4 = vmul.f32 0.5, %v2570_v28 }
 0x45d   :  { %v2636_v44 = vpop.permute.xlu2 %2635 }
 0x45e   :  { %v2572_v49 = vsub.f32 1.5, %v2571_v4  ;;  %v2756_v4 = vld [vmem:[#allocation2 + $0x1] sm:$0xff] }
 0x460   :  { %v2573_v24 = vmul.f32 %v5671_v32, %v2572_v49 }
 0x462   :  { %v2577_v20 = vsel %vm2576_vm14, %v5671_v32, %v2573_v24 }
 0x463   :  { %v2578_v22 = vmul.f32 %v5495_v19, %v2577_v20 }
 0x465   :  { %v2638_v30 = vpop.permute.xlu2 %2637  ;;  %v2579_v62 = vmul.f32 %v2578_v22, %v2562_v60  ;;  %v2582_v36 = vperm.slane %v2578_v22, 0 }
 0x467   :  { %v2580_v58 = vsub.f32 %v5496_v16, %v2579_v62  ;;  %v2584_v26 = vmul.f32 %v2582_v36, %v7320_v34  ;;  %v2585_v11 = vmul.f32 %v2582_v36, %v7474_v6  ;;  %v2588_v33 = vmul.f32 %v2582_v36, %v9124_v42 }
 0x468   :  { %v2587_v45 = vmul.f32 %v2582_v36, %v7504_v39  ;;  %v2586_v52 = vmul.f32 %v2582_v36, %v7330_v5  ;;  %v2592_v25 = vmul.f32 %v2582_v36, %v7563_v55  ;;  %v2590_v29 = vmul.f32 %v2582_v36, %v7544_v43 }
 0x469   :  { %v2601_v13 = vperm.slane %v2580_v58, 0  ;;  %v2589_v2 = vmul.f32 %v2582_v36, %v7532_v54  ;;  %v2595_v37 = vmul.f32 %v2582_v36, %v7593_v17  ;;  %v2594_v35 = vmul.f32 %v2582_v36, %v7584_v12 }
 0x46a   :  { %v2593_v34 = vmul.f32 %v2582_v36, %v7574_v50  ;;  %v2598_v6 = vmul.f32 %v2582_v36, %v7616_v23  ;;  %v2597_v42 = vmul.f32 %v2582_v36, %v7609_v9  ;;  %v2596_v39 = vmul.f32 %v2582_v36, %v7602_v59 }
 0x46b   :  { %v2603_v5 = vadd.f32 %v2601_v13, %v2584_v26  ;;  %v2604_v47 = vadd.f32 %v2601_v13, %v2585_v11  ;;  %v2607_v55 = vadd.f32 %v2601_v13, %v2588_v33  ;;  %v2606_v46 = vadd.f32 %v2601_v13, %v2587_v45 }
 0x46c   :  { %v2605_v43 = vadd.f32 %v2601_v13, %v2586_v52  ;;  %v2611_v27 = vadd.f32 %v2601_v13, %v2592_v25  ;;  %v2609_v63 = vadd.f32 %v2601_v13, %v2590_v29  ;;  %v2608_v54 = vadd.f32 %v2601_v13, %v2589_v2 }
 0x46d   :  { %v2644_v40 = vpop.permute.xlu2 %2643  ;;  %v7675_v1 = vadd.f32 %v2636_v44, %v2603_v5  ;;  %v7677_v17 = vadd.f32 %v2638_v30, %v2604_v47  ;;  %v2614_v48 = vadd.f32 %v2601_v13, %v2595_v37  ;;  %v2613_v60 = vadd.f32 %v2601_v13, %v2594_v35 }
 0x46e   :  { %v7679_v12 = vadd.f32 %v2644_v40, %v2607_v55  ;;  %v2612_v38 = vadd.f32 %v2601_v13, %v2593_v34  ;;  %v2617_v8 = vadd.f32 %v2601_v13, %v2598_v6  ;;  %v2616_v56 = vadd.f32 %v2601_v13, %v2597_v42 }
 0x46f   :  { %9134 = vst [vmem:[#allocation12_spill] sm:$0xff] %v7675_v1  ;;  %v9031_v15 = vmax.f32 %v7675_v1, 0.0  ;;  %v9030_v7 = vmax.f32 %v7677_v17, 0.0  ;;  %v2615_v32 = vadd.f32 %v2601_v13, %v2596_v39  ;;  %v2599_v61 = vmul.f32 %v2582_v36, %v7632_v41 }
 0x470   :  { %9135 = vst [vmem:[#allocation10_spill] sm:$0xff] %v7677_v17  ;;  %v9027_v21 = vmax.f32 %v7679_v12, 0.0  ;;  %v2591_v3 = vmul.f32 %v2582_v36, %v7555_v0 }
 0x471   :  { %9136 = vst [vmem:[#allocation14_spill] sm:$0xff] %v7679_v12  ;;  %v7704_v53 = vadd.f32 %v2601_v13, %v2599_v61 }
 0x472   :  { %2715 = vst.msk [vmem:[#allocation2 + $0x11] sm:$0xff] %vm1067_vm3, %v9031_v15  ;;  %v7706_v28 = vadd.f32 %v2601_v13, %v2591_v3 }
 0x473   :  { %2716 = vst.msk [vmem:[#allocation2 + $0x21] sm:$0xff] %vm1067_vm3, %v9030_v7 }
 0x474   :  { %v2642_v50 = vpop.permute.xlu1 %2641  ;;  %v2640_v23 = vpop.permute.xlu0 %2639  ;;  %2719 = vst.msk [vmem:[#allocation2 + $0x51] sm:$0xff] %vm1067_vm3, %v9027_v21 }
 0x475   :  { %v7681_v9 = vadd.f32 %v2642_v50, %v2606_v46  ;;  %v7683_v59 = vadd.f32 %v2640_v23, %v2605_v43  ;;  %v2652_v31 = vpop.permute.xlu2 %2651 }
 0x476   :  { %v7688_v51 = vadd.f32 %v2652_v31, %v2611_v27 }
 0x477   :  { %9137 = vst [vmem:[#allocation8_spill] sm:$0xff] %v7681_v9  ;;  %v9028_v44 = vmax.f32 %v7681_v9, 0.0  ;;  %v9029_v10 = vmax.f32 %v7683_v59, 0.0 }
 0x478   :  { %9138 = vst [vmem:[#allocation15_spill] sm:$0xff] %v7683_v59  ;;  %v9023_v14 = vmax.f32 %v7688_v51, 0.0 }
 0x479   :  { %9139 = vst [vmem:[#allocation9_spill] sm:$0xff] %v7688_v51  ;;  %v7723_v20 = vld [vmem:[#allocation2 + $0x11] sm:$0xff] }
 0x47a   :  { %2718 = vst.msk [vmem:[#allocation2 + $0x41] sm:$0xff] %vm1067_vm3, %v9028_v44  ;;  %v2732_v22 = vld [vmem:[#allocation2 + $0x10] sm:$0xff]  ;;  %v2772_v40 = vpack.c.bf16 %v7723_v20, %v2756_v4  ;;  %v3053_v11 = vld [vmem:[#allocation2 + $0x20] sm:$0xff] }
 0x47b   :  { %2717 = vst.msk [vmem:[#allocation2 + $0x31] sm:$0xff] %vm1067_vm3, %v9029_v10  ;;  %v7725_v16 = vld [vmem:[#allocation2 + $0x12] sm:$0xff]  ;;  %v2747_v58 = vpack.c.bf16 %v2732_v22, %v2731_v18  ;;  %v3068_v45 = vpack.c.bf16 %v3053_v11, %v2732_v22  ;;  %v7781_v31 = vld [vmem:[#allocation2 + $0x22] sm:$0xff] }
 0x47c   :  { %v2648_v0 = vpop.permute.xlu1 %2647  ;;  %v2646_v41 = vpop.permute.xlu0 %2645  ;;  %2723 = vst.msk [vmem:[#allocation2 + $0xb1] sm:$0xff] %vm1067_vm3, %v9023_v14  ;;  %v2950_v26 = vpack.c.bf16 %v7725_v16, %v2934_v57  ;;  %5498 = vmatmul.msk.bf16.vlgmr.msra.gmra.mxu2 %vm1067_vm3, %v2772_v40  ;;  %v7818_v18 = vld [vmem:[#allocation2 + $0x51] sm:$0xff] }
 0x47d   :  { %v7717_v49 = vadd.f32 %v2648_v0, %v2609_v63  ;;  %v7719_v30 = vadd.f32 %v2646_v41, %v2608_v54  ;;  %v2658_v19 = vpop.permute.xlu2 %2657  ;;  %5506 = vmatmul.msk.bf16.vlgmr.msra.gmra.mxu3 %vm1067_vm3, %v2747_v58  ;;  %5524 = vmatmul.msk.bf16.vlgmr.msrb.gmra.mxu1 %vm1067_vm3, %v3068_v45  ;;  %v7771_v63 = vld [vmem:[#allocation2 + $0x21] sm:$0xff]  ;;  %v7826_v22 = vld [vmem:[#allocation2 + $0x52] sm:$0xff] }
 0x47e   :  { %v7721_v24 = vadd.f32 %v2658_v19, %v2614_v48  ;;  %5515 = vmatmul.msk.bf16.vlgmr.msrb.gmra.mxu0 %vm1067_vm3, %v2950_v26 }
 0x47f   :  { %9140 = vst [vmem:[#allocation19_spill] sm:$0xff] %v7717_v49  ;;  %v9025_v62 = vmax.f32 %v7717_v49, 0.0  ;;  %v9026_v36 = vmax.f32 %v7719_v30, 0.0 }
 0x480   :  { %9141 = vst [vmem:[#allocation7_spill] sm:$0xff] %v7719_v30  ;;  %v9020_v33 = vmax.f32 %v7721_v24, 0.0 }
 0x481   :  { %9142 = vst [vmem:[#allocation13_spill] sm:$0xff] %v7721_v24  ;;  %v3055_v27 = vld [vmem:[#allocation2 + $0x40] sm:$0xff] }
 0x482   :  { %2721 = vst.msk [vmem:[#allocation2 + $0x71] sm:$0xff] %vm1067_vm3, %v9025_v62  ;;  %v7763_v5 = vld [vmem:[#allocation2 + $0x31] sm:$0xff]  ;;  %v7814_v41 = vld [vmem:[#allocation2 + $0x41] sm:$0xff] }
 0x483   :  { %2720 = vst.msk [vmem:[#allocation2 + $0x61] sm:$0xff] %vm1067_vm3, %v9026_v36  ;;  %v2734_v47 = vld [vmem:[#allocation2 + $0x30] sm:$0xff]  ;;  %v7777_v23 = vpack.c.bf16 %v7763_v5, %v7771_v63  ;;  %v7816_v4 = vld [vmem:[#allocation2 + $0x42] sm:$0xff]  ;;  %v7822_v57 = vpack.c.bf16 %v7818_v18, %v7814_v41 }
 0x484   :  { %2726 = vst.msk [vmem:[#allocation2 + $0xe1] sm:$0xff] %vm1067_vm3, %v9020_v33  ;;  %v2656_v52 = vpop.permute.xlu1 %2655  ;;  %v2654_v25 = vpop.permute.xlu0 %2653  ;;  %v7769_v43 = vld [vmem:[#allocation2 + $0x32] sm:$0xff]  ;;  %v7779_v48 = vpack.c.bf16 %v2734_v47, %v3053_v11  ;;  %v7830_v40 = vpack.c.bf16 %v7826_v22, %v7816_v4 }
 0x485   :  { %v7745_v29 = vadd.f32 %v2656_v52, %v2613_v60  ;;  %v7747_v13 = vadd.f32 %v2654_v25, %v2612_v38  ;;  %v2664_v2 = vpop.permute.xlu2 %2663  ;;  %v7785_v60 = vpack.c.bf16 %v7769_v43, %v7781_v31  ;;  %v3069_v38 = vpack.c.bf16 %v3055_v27, %v2734_v47 }
 0x486   :  { %v7749_v37 = vadd.f32 %v2664_v2, %v2617_v8 }
 0x487   :  { %9143 = vst [vmem:[#allocation17_spill] sm:$0xff] %v7745_v29  ;;  %v9021_v35 = vmax.f32 %v7745_v29, 0.0  ;;  %v9022_v34 = vmax.f32 %v7747_v13, 0.0  ;;  %v3186_v29 = vpack.c.bf16 %v7771_v63, %v7723_v20 }
 0x488   :  { %9144 = vst [vmem:[#allocation21_spill] sm:$0xff] %v7747_v13  ;;  %v9017_v6 = vmax.f32 %v7749_v37, 0.0  ;;  %v3304_v13 = vpack.c.bf16 %v7781_v31, %v7725_v16 }
 0x489   :  { %9145 = vst [vmem:[#allocation25_spill] sm:$0xff] %v7749_v37  ;;  %v7841_v11 = vld [vmem:[#allocation2 + $0x71] sm:$0xff] }
 0x48a   :  { %2725 = vst.msk [vmem:[#allocation2 + $0xd1] sm:$0xff] %vm1067_vm3, %v9021_v35  ;;  %v7839_v26 = vld [vmem:[#allocation2 + $0x61] sm:$0xff]  ;;  %v2738_v45 = vld [vmem:[#allocation2 + $0x70] sm:$0xff] }
 0x48b   :  { %2724 = vst.msk [vmem:[#allocation2 + $0xc1] sm:$0xff] %vm1067_vm3, %v9022_v34  ;;  %v7843_v52 = vld [vmem:[#allocation2 + $0x62] sm:$0xff]  ;;  %v7845_v25 = vld [vmem:[#allocation2 + $0x72] sm:$0xff] }
 0x48c   :  { %2729 = vst.msk [vmem:[#allocation2 + $0x111] sm:$0xff] %vm1067_vm3, %v9017_v6  ;;  %v2662_v42 = vpop.permute.xlu1 %2661  ;;  %v2660_v39 = vpop.permute.xlu0 %2659  ;;  %5499 = vmatmul.msk.bf16.gmra.mxu2 %vm1067_vm3, %v7777_v23  ;;  %v7857_v47 = vpack.c.bf16 %v7845_v25, %v7843_v52  ;;  %v7910_v36 = vld [vmem:[#allocation2 + $0xe1] sm:$0xff] }
 0x48d   :  { %v7765_v55 = vadd.f32 %v2662_v42, %v2616_v56  ;;  %v7767_v46 = vadd.f32 %v2660_v39, %v2615_v32  ;;  %5507 = vmatmul.msk.bf16.gmra.mxu3 %vm1067_vm3, %v7779_v48  ;;  %5525 = vmatmul.msk.bf16.gmra.mxu1 %vm1067_vm3, %v3069_v38  ;;  %v7851_v42 = vpack.c.bf16 %v7841_v11, %v7839_v26  ;;  %v2764_v38 = vld [vmem:[#allocation2 + $0xa1] sm:$0xff] }
 0x48e   :  { %5516 = vmatmul.msk.bf16.gmra.mxu0 %vm1067_vm3, %v7785_v60  ;;  %v7918_v44 = vld [vmem:[#allocation2 + $0xe2] sm:$0xff] }
 0x48f   :  { %9146 = vst [vmem:[#allocation28_spill] sm:$0xff] %v7765_v55  ;;  %v9018_v54 = vmax.f32 %v7765_v55, 0.0  ;;  %v9019_v50 = vmax.f32 %v7767_v46, 0.0 }
 0x490   :  { %9147 = vst [vmem:[#allocation24_spill] sm:$0xff] %v7767_v46 }
 0x491   :  { %2728 = vst.msk [vmem:[#allocation2 + $0x101] sm:$0xff] %vm1067_vm3, %v9018_v54  ;;  %v7879_v35 = vld [vmem:[#allocation2 + $0xd1] sm:$0xff] }
 0x492   :  { %2727 = vst.msk [vmem:[#allocation2 + $0xf1] sm:$0xff] %vm1067_vm3, %v9019_v50  ;;  %v2742_v34 = vld [vmem:[#allocation2 + $0xd0] sm:$0xff]  ;;  %v7881_v14 = vld [vmem:[#allocation2 + $0xc2] sm:$0xff] }
 0x493   :  { %v7949_v55 = vld [vmem:[#allocation2 + $0x111] sm:$0xff] }
 0x494   :  { %v2666_v8 = vpop.permute.xlu1 %2665  ;;  %v2650_v56 = vpop.permute.xlu0 %2649  ;;  %v2746_v46 = vld [vmem:[#allocation2 + $0x110] sm:$0xff] }
 0x495   :  { %v7801_v32 = vadd.f32 %v2666_v8, %v7704_v53  ;;  %v7804_v61 = vadd.f32 %v2650_v56, %v7706_v28  ;;  %v3057_v53 = vld [vmem:[#allocation2 + $0x60] sm:$0xff]  ;;  %v2736_v28 = vld [vmem:[#allocation2 + $0x50] sm:$0xff] }
 0x496   :  { %v7824_v19 = vpack.c.bf16 %v2736_v28, %v3055_v27  ;;  %v3070_v58 = vpack.c.bf16 %v3057_v53, %v2736_v28  ;;  %v7853_v39 = vpack.c.bf16 %v2738_v45, %v3057_v53  ;;  %v7867_v8 = vld [vmem:[#allocation2 + $0xb1] sm:$0xff]  ;;  %v2739_v56 = vld [vmem:[#allocation2 + $0xa0] sm:$0xff] }
 0x497   :  { %9148 = vst [vmem:[#allocation20_spill] sm:$0xff] %v7801_v32  ;;  %v9032_v3 = vmax.f32 %v7801_v32, 0.0  ;;  %v9024_v0 = vmax.f32 %v7804_v61, 0.0  ;;  %v2740_v53 = vld [vmem:[#allocation2 + $0xb0] sm:$0xff]  ;;  %v2942_v28 = vld [vmem:[#allocation2 + $0xa2] sm:$0xff]  ;;  %v2776_v6 = vpack.c.bf16 %v7867_v8, %v2764_v38 }
 0x498   :  { %9149 = vst [vmem:[#allocation6_spill] sm:$0xff] %v7804_v61  ;;  %v2751_v54 = vpack.c.bf16 %v2740_v53, %v2739_v56  ;;  %v7883_v38 = vld [vmem:[#allocation2 + $0xd2] sm:$0xff]  ;;  %v3065_v62 = vld [vmem:[#allocation2 + $0x100] sm:$0xff] }
 0x499   :  { %2730 = vst.msk [vmem:[#allocation2 + $0x121] sm:$0xff] %vm1067_vm3, %v9032_v3  ;;  %v5568_v3 = vld [vmem:[%s8996_s3 + $0x20] sm:$0xf]  ;;  %v7955_v24 = vpack.c.bf16 %v2746_v46, %v3065_v62 }
 0x49a   :  { %2722 = vst.msk [vmem:[#allocation2 + $0x81] sm:$0xff] %vm1067_vm3, %v9024_v0  ;;  %v7908_v0 = vld [vmem:[#allocation2 + $0xf2] sm:$0xff] }
 0x49b   :  { %v7928_v10 = vpack.c.bf16 %v7908_v0, %v7918_v44 }
 0x49c   :  { %5500 = vmatmul.msk.bf16.gmra.mxu2 %vm1067_vm3, %v7822_v57 }
 0x49d   :  { %5508 = vmatmul.msk.bf16.gmra.mxu3 %vm1067_vm3, %v7824_v19  ;;  %5526 = vmatmul.msk.bf16.gmra.mxu1 %vm1067_vm3, %v3070_v58  ;;  %v7869_v58 = vld [vmem:[#allocation2 + $0xb2] sm:$0xff] }
 0x49e   :  { %5517 = vmatmul.msk.bf16.gmra.mxu0 %vm1067_vm3, %v7830_v40  ;;  %v2954_v50 = vpack.c.bf16 %v7869_v58, %v2942_v28 }
 0x4a0   :  { %v7947_v37 = vld [vmem:[#allocation2 + $0x120] sm:$0xff] }
 0x4a1   :  { %v7847_v2 = vld [vmem:[#allocation2 + $0x80] sm:$0xff] }
 0x4a2   :  { %v3071_v27 = vpack.c.bf16 %v7847_v2, %v2738_v45  ;;  %v3061_v45 = vld [vmem:[#allocation2 + $0xc0] sm:$0xff] }
 0x4a3   :  { %v3072_v33 = vpack.c.bf16 %v3061_v45, %v2740_v53  ;;  %v5541_v53 = vld [vmem:[%s8996_s3 + $0x14] sm:$0xf] }
 0x4a4   :  { %v3339_v28 = vsel %vm1512_vm2, %v5541_v53, 0  ;;  %v5550_v53 = vld [vmem:[%s8996_s3 + $0x18] sm:$0xf] }
 0x4a5   :  { %3348 = vmatpush.bf16.msrb.mxu3 %v3339_v28  ;;  %v5559_v28 = vld [vmem:[%s8996_s3 + $0x1c] sm:$0xf]  ;;  %v3457_v15 = vsel %vm1512_vm2, %v5550_v53, 0  ;;  %v7943_v53 = vld [vmem:[#allocation2 + $0x101] sm:$0xff] }
 0x4a6   :  { %3466 = vmatpush.bf16.msra.mxu0 %v3457_v15  ;;  %v7957_v15 = vld [vmem:[#allocation2 + $0x112] sm:$0xff] }
 0x4ac   :  { %5501 = vmatmul.msk.bf16.gmra.mxu2 %vm1067_vm3, %v7851_v42 }
 0x4ad   :  { %5509 = vmatmul.msk.bf16.gmra.mxu3 %vm1067_vm3, %v7853_v39  ;;  %5527 = vmatmul.msk.bf16.gmra.mxu1 %vm1067_vm3, %v3071_v27  ;;  %v7877_v27 = vld [vmem:[#allocation2 + $0xc1] sm:$0xff] }
 0x4ae   :  { %5518 = vmatmul.msk.bf16.gmra.mxu0 %vm1067_vm3, %v7857_v47  ;;  %v7887_v56 = vpack.c.bf16 %v7879_v35, %v7877_v27 }
 0x4bc   :  { %5502 = vmatmul.msk.bf16.gmra.mxu2 %vm1067_vm3, %v2776_v6  ;;  %v7889_v6 = vpack.c.bf16 %v2742_v34, %v3061_v45  ;;  %v7906_v45 = vld [vmem:[#allocation2 + $0xf1] sm:$0xff] }
 0x4bd   :  { %5510 = vmatmul.msk.bf16.gmra.mxu3 %vm1067_vm3, %v2751_v54  ;;  %5528 = vmatmul.msk.bf16.gmra.mxu1 %vm1067_vm3, %v3072_v33  ;;  %v3063_v54 = vld [vmem:[#allocation2 + $0xe0] sm:$0xff]  ;;  %v7914_v21 = vpack.c.bf16 %v7906_v45, %v7910_v36 }
 0x4be   :  { %5519 = vmatmul.msk.bf16.gmra.mxu0 %vm1067_vm3, %v2954_v50  ;;  %v7893_v50 = vpack.c.bf16 %v7883_v38, %v7881_v14  ;;  %v3073_v33 = vpack.c.bf16 %v3063_v54, %v2742_v34  ;;  %v2744_v34 = vld [vmem:[#allocation2 + $0xf0] sm:$0xff] }
 0x4bf   :  { %v3074_v7 = vpack.c.bf16 %v3065_v62, %v2744_v34 }
 0x4cc   :  { %5503 = vmatmul.msk.bf16.gmra.mxu2 %vm1067_vm3, %v7887_v56 }
 0x4cd   :  { %5511 = vmatmul.msk.bf16.gmra.mxu3 %vm1067_vm3, %v7889_v6  ;;  %5529 = vmatmul.msk.bf16.gmra.mxu1 %vm1067_vm3, %v3073_v33  ;;  %v7916_v33 = vpack.c.bf16 %v2744_v34, %v3063_v54  ;;  %v3575_v54 = vsel %vm1512_vm2, %v5559_v28, 0  ;;  %v3693_v34 = vsel %vm1512_vm2, %v5568_v3, 0  ;;  %v7945_v28 = vld [vmem:[#allocation2 + $0x102] sm:$0xff] }
 0x4ce   :  { %5520 = vmatmul.msk.bf16.gmra.mxu0 %vm1067_vm3, %v7893_v50  ;;  %3584 = vmatpush.bf16.msra.mxu1 %v3575_v54  ;;  %v7961_v3 = vpack.c.bf16 %v7957_v15, %v7945_v28  ;;  %v3075_v54 = vpack.c.bf16 %v7947_v37, %v2746_v46 }
 0x4cf   :  { %3702 = vmatpush.bf16.msra.mxu2 %v3693_v34 }
 0x4dc   :  { %5504 = vmatmul.msk.bf16.gmra.mxu2 %vm1067_vm3, %v7914_v21 }
 0x4dd   :  { %5512 = vmatmul.msk.bf16.gmra.mxu3 %vm1067_vm3, %v7916_v33  ;;  %5530 = vmatmul.msk.bf16.gmra.mxu1 %vm1067_vm3, %v3074_v7  ;;  %v7953_v7 = vpack.c.bf16 %v7949_v55, %v7943_v53 }
 0x4de   :  { %5521 = vmatmul.msk.bf16.gmra.mxu0 %vm1067_vm3, %v7928_v10 }
 0x4ec   :  { %5505 = vmatmul.msk.bf16.gmra.mxu2 %vm1067_vm3, %v7953_v7 }
 0x4ed   :  { %5513 = vmatmul.msk.bf16.gmra.mxu3 %vm1067_vm3, %v7955_v24  ;;  %5531 = vmatmul.msk.bf16.gmra.mxu1 %vm1067_vm3, %v3075_v54 }
 0x4ee   :  { %5522 = vmatmul.msk.bf16.gmra.mxu0 %vm1067_vm3, %v7961_v3 }
 0x4fa   :  { %v3114_v34 = vpop.f32.mrf.mxu1 }
 0x4fb   :  { %v2996_v62 = vpop.f32.mrf.mxu0 }
 0x4fc   :  { %5533 = vmatmul.msk.bf16.vlgmr.msrb.gmra.mxu2 %vm1067_vm3, %v3186_v29 }
 0x4fd   :  { %5542 = vmatmul.msk.bf16.vlgmr.msrb.gmra.mxu3 %vm1067_vm3, %v3304_v13  ;;  %5560 = vmatmul.msk.bf16.vlgmr.msra.gmra.mxu1 %vm1067_vm3, %v7777_v23  ;;  %v3305_v23 = vpack.c.bf16 %v7816_v4, %v7769_v43 }
 0x4fe   :  { %5551 = vmatmul.msk.bf16.vlgmr.msra.gmra.mxu0 %vm1067_vm3, %v7779_v48  ;;  %v3187_v48 = vpack.c.bf16 %v7814_v41, %v7763_v5 }
 0x4ff   :  { %v2818_v46 = vpop.f32.mrf.mxu2 }
 0x500   :  { %v2894_v54 = vpop.f32.mrf.mxu3 }
 0x501   :  { %v2895_v51 = vadd.f32 %v2894_v54, %v2818_v46 }
 0x502   :  { %v3116_v30 = vpop.f32.mrf.mxu1 }
 0x503   :  { %v3036_v61 = vadd.f32 %v2996_v62, %v2895_v51  ;;  %v2998_v49 = vpop.f32.mrf.mxu0 }
 0x505   :  { %v7981_v20 = vadd.f32 %v3114_v34, %v3036_v61 }
 0x507   :  { %v2820_v63 = vpop.f32.mrf.mxu2 }
 0x508   :  { %v2896_v16 = vpop.f32.mrf.mxu3 }
 0x509   :  { %v2897_v31 = vadd.f32 %v2896_v16, %v2820_v63 }
 0x50a   :  { %v3119_v13 = vpop.f32.mrf.mxu1 }
 0x50b   :  { %v3037_v29 = vadd.f32 %v2998_v49, %v2897_v31  ;;  %v3001_v12 = vpop.f32.mrf.mxu0 }
 0x50c   :  { %5534 = vmatmul.msk.bf16.gmra.mxu2 %vm1067_vm3, %v3187_v48 }
 0x50d   :  { %5543 = vmatmul.msk.bf16.gmra.mxu3 %vm1067_vm3, %v3305_v23  ;;  %v7989_v51 = vadd.f32 %v3116_v30, %v3037_v29  ;;  %5561 = vmatmul.msk.bf16.gmra.mxu1 %vm1067_vm3, %v7822_v57  ;;  %v3306_v57 = vpack.c.bf16 %v7843_v52, %v7826_v22 }
 0x50e   :  { %5552 = vmatmul.msk.bf16.gmra.mxu0 %vm1067_vm3, %v7824_v19  ;;  %v3188_v19 = vpack.c.bf16 %v7839_v26, %v7818_v18 }
 0x50f   :  { %v2823_v49 = vpop.f32.mrf.mxu2 }
 0x510   :  { %v2899_v61 = vpop.f32.mrf.mxu3 }
 0x511   :  { %v2900_v62 = vadd.f32 %v2899_v61, %v2823_v49  ;;  %v3177_v49 = vld [vmem:[#allocation2 + $0x81] sm:$0xff] }
 0x512   :  { %v3121_v41 = vpop.f32.mrf.mxu1  ;;  %v8011_v61 = vld [vmem:[#allocation2 + $0x82] sm:$0xff] }
 0x513   :  { %v3038_v34 = vadd.f32 %v3001_v12, %v2900_v62  ;;  %v3003_v5 = vpop.f32.mrf.mxu0 }
 0x515   :  { %v7995_v46 = vadd.f32 %v3119_v13, %v3038_v34  ;;  %v3413_v34 = vld [vmem:[#allocation2 + $0x90] sm:$0xff] }
 0x517   :  { %v2825_v43 = vpop.f32.mrf.mxu2 }
 0x518   :  { %v2901_v4 = vpop.f32.mrf.mxu3 }
 0x519   :  { %v2902_v54 = vadd.f32 %v2901_v4, %v2825_v43  ;;  %v3307_v4 = vpack.c.bf16 %v8011_v61, %v7845_v25 }
 0x51a   :  { %v3124_v16 = vpop.f32.mrf.mxu1 }
 0x51b   :  { %v3039_v63 = vadd.f32 %v3003_v5, %v2902_v54  ;;  %v3006_v30 = vpop.f32.mrf.mxu0  ;;  %v3531_v5 = vld [vmem:[#allocation2 + $0x91] sm:$0xff]  ;;  %v3425_v54 = vpack.c.bf16 %v3413_v34, %v7847_v2 }
 0x51c   :  { %5535 = vmatmul.msk.bf16.gmra.mxu2 %vm1067_vm3, %v3188_v19 }
 0x51d   :  { %5544 = vmatmul.msk.bf16.gmra.mxu3 %vm1067_vm3, %v3306_v57  ;;  %v8003_v12 = vadd.f32 %v3121_v41, %v3039_v63  ;;  %5562 = vmatmul.msk.bf16.gmra.mxu1 %vm1067_vm3, %v7851_v42  ;;  %v3189_v42 = vpack.c.bf16 %v3177_v49, %v7841_v11  ;;  %v3543_v63 = vpack.c.bf16 %v3531_v5, %v3177_v49 }
 0x51e   :  { %5553 = vmatmul.msk.bf16.gmra.mxu0 %vm1067_vm3, %v7853_v39  ;;  %v3308_v49 = vpack.c.bf16 %v7881_v14, %v7869_v58 }
 0x51f   :  { %v2828_v31 = vpop.f32.mrf.mxu2 }
 0x520   :  { %v2904_v29 = vpop.f32.mrf.mxu3 }
 0x521   :  { %v2905_v13 = vadd.f32 %v2904_v29, %v2828_v31 }
 0x522   :  { %v3126_v26 = vpop.f32.mrf.mxu1 }
 0x523   :  { %v3040_v48 = vadd.f32 %v3006_v30, %v2905_v13  ;;  %v3008_v18 = vpop.f32.mrf.mxu0 }
 0x525   :  { %v8009_v23 = vadd.f32 %v3124_v16, %v3040_v48 }
 0x527   :  { %v2830_v22 = vpop.f32.mrf.mxu2 }
 0x528   :  { %v2906_v52 = vpop.f32.mrf.mxu3 }
 0x529   :  { %v2907_v62 = vadd.f32 %v2906_v52, %v2830_v22 }
 0x52a   :  { %v3129_v43 = vpop.f32.mrf.mxu1 }
 0x52b   :  { %v3041_v39 = vadd.f32 %v3008_v18, %v2907_v62  ;;  %v3011_v41 = vpop.f32.mrf.mxu0 }
 0x52c   :  { %5536 = vmatmul.msk.bf16.gmra.mxu2 %vm1067_vm3, %v3189_v42 }
 0x52d   :  { %5545 = vmatmul.msk.bf16.gmra.mxu3 %vm1067_vm3, %v3307_v4  ;;  %v8019_v30 = vadd.f32 %v3126_v26, %v3041_v39  ;;  %5563 = vmatmul.msk.bf16.gmra.mxu1 %vm1067_vm3, %v3543_v63  ;;  %v3190_v26 = vpack.c.bf16 %v7877_v27, %v7867_v8 }
 0x52e   :  { %5554 = vmatmul.msk.bf16.gmra.mxu0 %vm1067_vm3, %v3425_v54 }
 0x52f   :  { %v2833_v16 = vpop.f32.mrf.mxu2 }
 0x530   :  { %v2909_v19 = vpop.f32.mrf.mxu3 }
 0x531   :  { %v2910_v57 = vadd.f32 %v2909_v19, %v2833_v16 }
 0x532   :  { %v3131_v29 = vpop.f32.mrf.mxu1 }
 0x533   :  { %v3042_v11 = vadd.f32 %v3011_v41, %v2910_v57  ;;  %v3013_v31 = vpop.f32.mrf.mxu0 }
 0x535   :  { %v8023_v25 = vadd.f32 %v3129_v43, %v3042_v11 }
 0x537   :  { %v2835_v2 = vpop.f32.mrf.mxu2 }
 0x538   :  { %v2911_v13 = vpop.f32.mrf.mxu3 }
 0x539   :  { %v2912_v48 = vadd.f32 %v2911_v13, %v2835_v2 }
 0x53a   :  { %v3134_v52 = vpop.f32.mrf.mxu1 }
 0x53b   :  { %v3043_v18 = vadd.f32 %v3013_v31, %v2912_v48  ;;  %v3016_v22 = vpop.f32.mrf.mxu0 }
 0x53c   :  { %5537 = vmatmul.msk.bf16.gmra.mxu2 %vm1067_vm3, %v3190_v26  ;;  %v3539_v26 = vld [vmem:[#allocation2 + $0x131] sm:$0xff] }
 0x53d   :  { %5546 = vmatmul.msk.bf16.gmra.mxu3 %vm1067_vm3, %v3308_v49  ;;  %v8031_v62 = vadd.f32 %v3131_v29, %v3043_v18  ;;  %5564 = vmatmul.msk.bf16.gmra.mxu1 %vm1067_vm3, %v7887_v56  ;;  %v3309_v56 = vpack.c.bf16 %v7918_v44, %v7883_v38 }
 0x53e   :  { %5555 = vmatmul.msk.bf16.gmra.mxu0 %vm1067_vm3, %v7889_v6  ;;  %v3191_v6 = vpack.c.bf16 %v7910_v36, %v7879_v35 }
 0x53f   :  { %v2838_v34 = vpop.f32.mrf.mxu2 }
 0x540   :  { %v2914_v5 = vpop.f32.mrf.mxu3 }
 0x541   :  { %v2915_v39 = vadd.f32 %v2914_v5, %v2838_v34 }
 0x542   :  { %v8039_v27 = vpop.f32.mrf.mxu1 }
 0x543   :  { %v3044_v41 = vadd.f32 %v3016_v22, %v2915_v39  ;;  %v8037_v8 = vpop.f32.mrf.mxu0  ;;  %v3185_v22 = vld [vmem:[#allocation2 + $0x121] sm:$0xff] }
 0x544   :  { %v3193_v34 = vpack.c.bf16 %v3185_v22, %v7949_v55 }
 0x545   :  { %v8041_v14 = vadd.f32 %v3134_v52, %v3044_v41  ;;  %v8087_v52 = vld [vmem:[#allocation2 + $0x122] sm:$0xff]  ;;  %v3547_v41 = vpack.c.bf16 %v3539_v26, %v3185_v22 }
 0x546   :  { %v3311_v5 = vpack.c.bf16 %v8087_v52, %v7957_v15 }
 0x547   :  { %v8043_v58 = vpop.f32.mrf.mxu2 }
 0x548   :  { %v8045_v43 = vpop.f32.mrf.mxu3 }
 0x54a   :  { %v3139_v4 = vpop.f32.mrf.mxu1 }
 0x54b   :  { %v3021_v42 = vpop.f32.mrf.mxu0 }
 0x54c   :  { %5538 = vmatmul.msk.bf16.gmra.mxu2 %vm1067_vm3, %v3191_v6 }
 0x54d   :  { %5547 = vmatmul.msk.bf16.gmra.mxu3 %vm1067_vm3, %v3309_v56  ;;  %5565 = vmatmul.msk.bf16.gmra.mxu1 %vm1067_vm3, %v7914_v21  ;;  %v3310_v21 = vpack.c.bf16 %v7945_v28, %v7908_v0 }
 0x54e   :  { %5556 = vmatmul.msk.bf16.gmra.mxu0 %vm1067_vm3, %v7916_v33  ;;  %v3192_v33 = vpack.c.bf16 %v7943_v53, %v7906_v45 }
 0x54f   :  { %v2843_v54 = vpop.f32.mrf.mxu2 }
 0x550   :  { %v2919_v63 = vpop.f32.mrf.mxu3 }
 0x551   :  { %v2920_v16 = vadd.f32 %v2919_v63, %v2843_v54 }
 0x552   :  { %v8059_v36 = vpop.f32.mrf.mxu1 }
 0x553   :  { %v3046_v19 = vadd.f32 %v3021_v42, %v2920_v16  ;;  %v8057_v57 = vpop.f32.mrf.mxu0 }
 0x555   :  { %v8061_v35 = vadd.f32 %v3139_v4, %v3046_v19 }
 0x557   :  { %v8063_v44 = vpop.f32.mrf.mxu2 }
 0x558   :  { %v8065_v38 = vpop.f32.mrf.mxu3 }
 0x55a   :  { %v3144_v31 = vpop.f32.mrf.mxu1 }
 0x55b   :  { %v3026_v11 = vpop.f32.mrf.mxu0 }
 0x55c   :  { %5539 = vmatmul.msk.bf16.gmra.mxu2 %vm1067_vm3, %v3192_v33 }
 0x55d   :  { %5548 = vmatmul.msk.bf16.gmra.mxu3 %vm1067_vm3, %v3310_v21  ;;  %5566 = vmatmul.msk.bf16.gmra.mxu1 %vm1067_vm3, %v7953_v7 }
 0x55e   :  { %5557 = vmatmul.msk.bf16.gmra.mxu0 %vm1067_vm3, %v7955_v24  ;;  %v3421_v24 = vld [vmem:[#allocation2 + $0x130] sm:$0xff] }
 0x55f   :  { %v2848_v29 = vpop.f32.mrf.mxu2  ;;  %v3429_v39 = vpack.c.bf16 %v3421_v24, %v7947_v37 }
 0x560   :  { %v2924_v2 = vpop.f32.mrf.mxu3 }
 0x561   :  { %v2925_v13 = vadd.f32 %v2924_v2, %v2848_v29 }
 0x562   :  { %v8079_v45 = vpop.f32.mrf.mxu1 }
 0x563   :  { %v3048_v48 = vadd.f32 %v3026_v11, %v2925_v13  ;;  %v8077_v18 = vpop.f32.mrf.mxu0 }
 0x565   :  { %v8081_v53 = vadd.f32 %v3144_v31, %v3048_v48 }
 0x567   :  { %v8083_v0 = vpop.f32.mrf.mxu2 }
 0x568   :  { %v8085_v28 = vpop.f32.mrf.mxu3 }
 0x56a   :  { %v3149_v49 = vpop.f32.mrf.mxu1 }
 0x56b   :  { %v3031_v7 = vpop.f32.mrf.mxu0 }
 0x56c   :  { %5540 = vmatmul.msk.bf16.gmra.mxu2 %vm1067_vm3, %v3193_v34 }
 0x56d   :  { %5549 = vmatmul.msk.bf16.gmra.mxu3 %vm1067_vm3, %v3311_v5  ;;  %5567 = vmatmul.msk.bf16.gmra.mxu1 %vm1067_vm3, %v3547_v41 }
 0x56e   :  { %5558 = vmatmul.msk.bf16.gmra.mxu0 %vm1067_vm3, %v3429_v39 }
 0x56f   :  { %v2853_v42 = vpop.f32.mrf.mxu2 }
 0x570   :  { %v2929_v4 = vpop.f32.mrf.mxu3 }
 0x571   :  { %v2930_v6 = vadd.f32 %v2929_v4, %v2853_v42 }
 0x572   :  { %v8099_v55 = vpop.f32.mrf.mxu1 }
 0x573   :  { %v3050_v56 = vadd.f32 %v3031_v7, %v2930_v6  ;;  %v8097_v54 = vpop.f32.mrf.mxu0  ;;  %9151 = vst [vmem:[#allocation11_spill] sm:$0xff] %v8099_v55 }
 0x574   :  { %9150 = vst [vmem:[#allocation26_spill] sm:$0xff] %v8097_v54  ;;  %v2922_v54 = vadd.f32 %v8065_v38, %v8063_v44 }
 0x575   :  { %v8101_v15 = vadd.f32 %v3149_v49, %v3050_v56 }
 0x577   :  { %v8103_v37 = vpop.f32.mrf.mxu2 }
 0x578   :  { %9152 = vst [vmem:[#allocation22_spill] sm:$0xff] %v8103_v37  ;;  %v8105_v63 = vpop.f32.mrf.mxu3 }
 0x579   :  { %9153 = vst [vmem:[#allocation27_spill] sm:$0xff] %v8105_v63 }
 0x57a   :  { %v3586_v19 = vpop.f32.mrf.mxu1 }
 0x57b   :  { %v3468_v16 = vpop.f32.mrf.mxu0 }
 0x57c   :  { %5569 = vmatmul.msk.bf16.vlgmr.msra.gmra.mxu2 %vm1067_vm3, %v7785_v60 }
 0x57f   :  { %v3232_v11 = vpop.f32.mrf.mxu2 }
 0x580   :  { %v3350_v31 = vpop.f32.mrf.mxu3  ;;  %v3272_v33 = vadd.f32 %v3232_v11, %v7981_v20 }
 0x582   :  { %v3390_v21 = vadd.f32 %v3350_v31, %v3272_v33  ;;  %v8112_v13 = vpop.f32.mrf.mxu1 }
 0x583   :  { %v8110_v2 = vpop.f32.mrf.mxu0 }
 0x584   :  { %v3508_v29 = vadd.f32 %v3468_v16, %v3390_v21 }
 0x586   :  { %v3626_v48 = vadd.f32 %v3586_v19, %v3508_v29 }
 0x587   :  { %v3234_v22 = vpop.f32.mrf.mxu2 }
 0x588   :  { %v8114_v24 = vpop.f32.mrf.mxu3  ;;  %v8117_v26 = vadd.f32 %v3234_v22, %v7989_v51  ;;  %v3649_v22 = vld [vmem:[#allocation2 + $0x92] sm:$0xff] }
 0x58a   :  { %v3591_v34 = vpop.f32.mrf.mxu1 }
 0x58b   :  { %v3473_v60 = vpop.f32.mrf.mxu0 }
 0x58c   :  { %5570 = vmatmul.msk.bf16.gmra.mxu2 %vm1067_vm3, %v7830_v40 }
 0x58f   :  { %v3237_v7 = vpop.f32.mrf.mxu2 }
 0x590   :  { %v3355_v49 = vpop.f32.mrf.mxu3  ;;  %v3274_v20 = vadd.f32 %v3237_v7, %v7995_v46 }
 0x592   :  { %v3392_v5 = vadd.f32 %v3355_v49, %v3274_v20  ;;  %v8129_v56 = vpop.f32.mrf.mxu1 }
 0x593   :  { %v8127_v51 = vpop.f32.mrf.mxu0 }
 0x594   :  { %v3510_v39 = vadd.f32 %v3473_v60, %v3392_v5  ;;  %v3661_v60 = vpack.c.bf16 %v3649_v22, %v8011_v61 }
 0x596   :  { %v3628_v41 = vadd.f32 %v3591_v34, %v3510_v39  ;;  %v3657_v39 = vld [vmem:[#allocation2 + $0x132] sm:$0xff] }
 0x597   :  { %v3239_v42 = vpop.f32.mrf.mxu2 }
 0x598   :  { %v8122_v4 = vpop.f32.mrf.mxu3  ;;  %v8125_v6 = vadd.f32 %v3239_v42, %v8003_v12  ;;  %v3665_v42 = vpack.c.bf16 %v3657_v39, %v8087_v52 }
 0x59a   :  { %v3596_v33 = vpop.f32.mrf.mxu1 }
 0x59b   :  { %v3478_v11 = vpop.f32.mrf.mxu0 }
 0x59c   :  { %5571 = vmatmul.msk.bf16.gmra.mxu2 %vm1067_vm3, %v7857_v47 }
 0x59f   :  { %v3242_v40 = vpop.f32.mrf.mxu2 }
 0x5a0   :  { %v3276_v46 = vadd.f32 %v3242_v40, %v8009_v23  ;;  %v3360_v16 = vpop.f32.mrf.mxu3 }
 0x5a2   :  { %v3394_v19 = vadd.f32 %v3360_v16, %v3276_v46 }
 0x5a4   :  { %v3512_v31 = vadd.f32 %v3478_v11, %v3394_v19 }
 0x5a6   :  { %v3630_v21 = vadd.f32 %v3596_v33, %v3512_v31  ;;  %v8177_v33 = vpop.f32.mrf.mxu1 }
 0x5a7   :  { %v3244_v29 = vpop.f32.mrf.mxu2 }
 0x5a8   :  { %v8135_v12 = vadd.f32 %v3244_v29, %v8019_v30  ;;  %v3362_v19 = vpop.f32.mrf.mxu3 }
 0x5ac   :  { %5572 = vmatmul.msk.bf16.gmra.mxu2 %vm1067_vm3, %v3661_v60 }
 0x5ae   :  { %v3601_v60 = vpop.f32.mrf.mxu1 }
 0x5af   :  { %v3247_v7 = vpop.f32.mrf.mxu2 }
 0x5b0   :  { %v8140_v47 = vadd.f32 %v3247_v7, %v8023_v25  ;;  %v3365_v52 = vpop.f32.mrf.mxu3 }
 0x5b7   :  { %v3249_v23 = vpop.f32.mrf.mxu2 }
 0x5b8   :  { %v8143_v49 = vadd.f32 %v3249_v23, %v8031_v62  ;;  %v3367_v7 = vpop.f32.mrf.mxu3 }
 0x5ba   :  { %v3397_v44 = vadd.f32 %v3367_v7, %v8143_v49 }
 0x5bc   :  { %5573 = vmatmul.msk.bf16.gmra.mxu2 %vm1067_vm3, %v7893_v50 }
 0x5bf   :  { %v3252_v20 = vpop.f32.mrf.mxu2 }
 0x5c0   :  { %v8148_v34 = vadd.f32 %v3252_v20, %v8041_v14 }
 0x5c7   :  { %v8150_v30 = vpop.f32.mrf.mxu2 }
 0x5cc   :  { %5574 = vmatmul.msk.bf16.gmra.mxu2 %vm1067_vm3, %v7928_v10 }
 0x5cf   :  { %v3257_v61 = vpop.f32.mrf.mxu2 }
 0x5d0   :  { %v8155_v25 = vadd.f32 %v3257_v61, %v8061_v35 }
 0x5d7   :  { %v8157_v5 = vpop.f32.mrf.mxu2 }
 0x5dc   :  { %5575 = vmatmul.msk.bf16.gmra.mxu2 %vm1067_vm3, %v7961_v3 }
 0x5df   :  { %v3262_v62 = vpop.f32.mrf.mxu2 }
 0x5e0   :  { %v8162_v50 = vadd.f32 %v3262_v62, %v8081_v53  ;;  %v3480_v53 = vpop.f32.mrf.mxu0  ;;  %v3370_v62 = vpop.f32.mrf.mxu3 }
 0x5e1   :  { %v3398_v38 = vadd.f32 %v3370_v62, %v8148_v34 }
 0x5e7   :  { %v8164_v14 = vpop.f32.mrf.mxu2 }
 0x5e8   :  { %v3483_v29 = vpop.f32.mrf.mxu0 }
 0x5ec   :  { %5576 = vmatmul.msk.bf16.gmra.mxu2 %vm1067_vm3, %v3665_v42 }
 0x5ef   :  { %v3267_v10 = vpop.f32.mrf.mxu2 }
 0x5f0   :  { %v8169_v35 = vadd.f32 %v3267_v10, %v8101_v15  ;;  %v5579_v15 = vld [vmem:[%s8997_s4 + $0x4] sm:$0xf]  ;;  %v3485_v61 = vpop.f32.mrf.mxu0 }
 0x5f2   :  { %9154 = vst [vmem:[#allocation29_spill] sm:$0xff] %v8169_v35  ;;  %v3393_v35 = vadd.f32 %v8122_v4, %v8125_v6  ;;  %v3047_v4 = vadd.f32 %v8057_v57, %v2922_v54 }
 0x5f4   :  { %v3165_v57 = vadd.f32 %v8059_v36, %v3047_v4 }
 0x5f7   :  { %v8171_v40 = vpop.f32.mrf.mxu2 }
 0x5f8   :  { %9155 = vst [vmem:[#allocation16_spill] sm:$0xff] %v8171_v40  ;;  %v3488_v42 = vpop.f32.mrf.mxu0 }
 0x5ff   :  { %v3704_v46 = vpop.f32.mrf.mxu2 }
 0x600   :  { %v8173_v16 = vadd.f32 %v3704_v46, %v3626_v48  ;;  %v4019_v48 = vsel %vm1512_vm2, %v5579_v15, 0  ;;  %v3490_v9 = vpop.f32.mrf.mxu0  ;;  %v2917_v15 = vadd.f32 %v8045_v43, %v8043_v58  ;;  %v2927_v58 = vadd.f32 %v8085_v28, %v8083_v0 }
 0x601   :  { %4028 = vmatpush.bf16.msra.mxu3 %v4019_v48 }
 0x602   :  { %v3045_v32 = vadd.f32 %v8037_v8, %v2917_v15  ;;  %v3511_v8 = vadd.f32 %v8127_v51, %v3393_v35  ;;  %v3516_v35 = vadd.f32 %v3488_v42, %v3398_v38 }
 0x604   :  { %v3163_v43 = vadd.f32 %v8039_v27, %v3045_v32  ;;  %v3049_v27 = vadd.f32 %v8077_v18, %v2927_v58 }
 0x606   :  { %v3281_v0 = vadd.f32 %v8150_v30, %v3163_v43  ;;  %v3283_v30 = vadd.f32 %v8157_v5, %v3165_v57 }
 0x607   :  { %v3706_v3 = vpop.f32.mrf.mxu2 }
 0x60f   :  { %v3709_v11 = vpop.f32.mrf.mxu2 }
 0x610   :  { %v8175_v31 = vadd.f32 %v3709_v11, %v3628_v41  ;;  %v3603_v41 = vpop.f32.mrf.mxu1  ;;  %v3372_v11 = vpop.f32.mrf.mxu3 }
 0x612   :  { %v3803_v36 = vmul.f32 %v8175_v31, %v8175_v31  ;;  %v3767_v7 = vsel %vm1067_vm3, %v8175_v31, 0.0 }
 0x614   :  { %v3820_v15 = vsel %vm1067_vm3, %v3803_v36, 0.0 }
 0x617   :  { %v3711_v22 = vpop.f32.mrf.mxu2 }
 0x618   :  { %v3606_v10 = vpop.f32.mrf.mxu1  ;;  %v3375_v1 = vpop.f32.mrf.mxu3 }
 0x619   :  { %v3400_v34 = vadd.f32 %v3375_v1, %v8155_v25  ;;  %v3764_v1 = vsel %vm1067_vm3, %v8173_v16, 0.0  ;;  %v3634_v5 = vadd.f32 %v3606_v10, %v3516_v35 }
 0x61f   :  { %v3714_v23 = vpop.f32.mrf.mxu2 }
 0x620   :  { %v8183_v20 = vadd.f32 %v3714_v23, %v3630_v21  ;;  %v8189_v17 = vpop.f32.mrf.mxu1  ;;  %v3493_v21 = vpop.f32.mrf.mxu0  ;;  %v3391_v23 = vadd.f32 %v8114_v24, %v8117_v26  ;;  %v3395_v24 = vadd.f32 %v3362_v19, %v8135_v12  ;;  %v3629_v12 = vadd.f32 %v8129_v56, %v3511_v8 }
 0x621   :  { %v3377_v63 = vpop.f32.mrf.mxu3  ;;  %v3801_v56 = vmul.f32 %v8173_v16, %v8173_v16  ;;  %v3518_v42 = vadd.f32 %v3493_v21, %v3400_v34 }
 0x622   :  { %v3509_v55 = vadd.f32 %v8110_v2, %v3391_v23  ;;  %v3396_v2 = vadd.f32 %v3365_v52, %v8140_v47  ;;  %v3513_v6 = vadd.f32 %v3480_v53, %v3395_v24  ;;  %v3515_v47 = vadd.f32 %v3485_v61, %v3397_v44 }
 0x623   :  { %v8225_v49 = vadd.f32 %v3711_v22, %v3629_v12  ;;  %v3805_v10 = vmul.f32 %v8183_v20, %v8183_v20  ;;  %v3771_v8 = vsel %vm1067_vm3, %v8183_v20, 0.0 }
 0x624   :  { %v3627_v26 = vadd.f32 %v8112_v13, %v3509_v55  ;;  %v3514_v51 = vadd.f32 %v3483_v29, %v3396_v2  ;;  %v3399_v55 = vadd.f32 %v3372_v11, %v3281_v0  ;;  %v3631_v52 = vadd.f32 %v8177_v33, %v3513_v6 }
 0x625   :  { %v3633_v25 = vadd.f32 %v3603_v41, %v3515_v47  ;;  %v3804_v61 = vmul.f32 %v8225_v49, %v8225_v49  ;;  %v3401_v11 = vadd.f32 %v3377_v63, %v3283_v30  ;;  %v3769_v41 = vsel %vm1067_vm3, %v8225_v49, 0.0 }
 0x626   :  { %v8218_v32 = vadd.f32 %v3706_v3, %v3627_v26  ;;  %v3167_v3 = vadd.f32 %v8079_v45, %v3049_v27  ;;  %v3632_v29 = vadd.f32 %v3601_v60, %v3514_v51  ;;  %v3517_v22 = vadd.f32 %v3490_v9, %v3399_v55 }
 0x627   :  { %v3716_v39 = vpop.f32.mrf.mxu2  ;;  %v3817_v9 = vsel %vm1067_vm3, %v3801_v56, 0.0  ;;  %v3822_v43 = vsel %vm1067_vm3, %v3804_v61, 0.0 }
 0x628   :  { %v8198_v40 = vpop.f32.mrf.mxu1  ;;  %v3495_v28 = vpop.f32.mrf.mxu0  ;;  %v3802_v54 = vmul.f32 %v8218_v32, %v8218_v32  ;;  %v3765_v53 = vsel %vm1067_vm3, %v8218_v32, 0.0  ;;  %v8244_v62 = vadd.f32 %v3716_v39, %v3631_v52  ;;  %v3635_v63 = vadd.f32 %v8189_v17, %v3517_v22 }
 0x629   :  { %v3380_v18 = vpop.f32.mrf.mxu3  ;;  %v3766_v60 = vadd.f32 %v3765_v53, %v3764_v1  ;;  %v3519_v26 = vadd.f32 %v3495_v28, %v3401_v11  ;;  %v3824_v17 = vsel %vm1067_vm3, %v3805_v10, 0.0  ;;  %v3285_v28 = vadd.f32 %v8164_v14, %v3167_v3 }
 0x62a   :  { %v3818_v45 = vsel %vm1067_vm3, %v3802_v54, 0.0  ;;  %v3402_v39 = vadd.f32 %v3380_v18, %v8162_v50  ;;  %v3806_v24 = vmul.f32 %v8244_v62, %v8244_v62  ;;  %v3636_v50 = vadd.f32 %v8198_v40, %v3518_v42 }
 0x62b   :  { %v3819_v58 = vadd.f32 %v3818_v45, %v3817_v9  ;;  %v3768_v21 = vadd.f32 %v3767_v7, %v3766_v60  ;;  %v3773_v0 = vsel %vm1067_vm3, %v8244_v62, 0.0 }
 0x62c   :  { %v3826_v40 = vsel %vm1067_vm3, %v3806_v24, 0.0  ;;  %v9158_v24 = vld [vmem:[#allocation26_spill] sm:$0xff] }
 0x62d   :  { %v3821_v4 = vadd.f32 %v3820_v15, %v3819_v58  ;;  %v3770_v44 = vadd.f32 %v3769_v41, %v3768_v21 }
 0x62f   :  { %v8185_v46 = vpop.f32.mrf.mxu2  ;;  %v3823_v12 = vadd.f32 %v3822_v43, %v3821_v4  ;;  %v3772_v47 = vadd.f32 %v3771_v8, %v3770_v44 }
 0x630   :  { %v3613_v13 = vpop.f32.mrf.mxu1  ;;  %v3498_v33 = vpop.f32.mrf.mxu0  ;;  %v8253_v23 = vadd.f32 %v8185_v46, %v3632_v29 }
 0x631   :  { %v3382_v51 = vpop.f32.mrf.mxu3  ;;  %v3825_v54 = vadd.f32 %v3824_v17, %v3823_v12  ;;  %v3637_v34 = vadd.f32 %v3613_v13, %v3519_v26  ;;  %v9159_v17 = vld [vmem:[#allocation29_spill] sm:$0xff] }
 0x632   :  { %v3807_v27 = vmul.f32 %v8253_v23, %v8253_v23  ;;  %v3775_v35 = vsel %vm1067_vm3, %v8253_v23, 0.0  ;;  %v3403_v53 = vadd.f32 %v3382_v51, %v3285_v28 }
 0x633   :  { %v3827_v36 = vadd.f32 %v3826_v40, %v3825_v54 }
 0x634   :  { %v3828_v30 = vsel %vm1067_vm3, %v3807_v27, 0.0 }
 0x637   :  { %v8187_v59 = vpop.f32.mrf.mxu2 }
 0x638   :  { %v8263_v2 = vadd.f32 %v8187_v59, %v3633_v25  ;;  %v3616_v46 = vpop.f32.mrf.mxu1  ;;  %v3520_v59 = vadd.f32 %v3498_v33, %v3402_v39  ;;  %v3500_v56 = vpop.f32.mrf.mxu0  ;;  %v9156_v25 = vld [vmem:[#allocation22_spill] sm:$0xff] }
 0x639   :  { %v3521_v10 = vadd.f32 %v3500_v56, %v3403_v53 }
 0x63a   :  { %v3808_v55 = vmul.f32 %v8263_v2, %v8263_v2  ;;  %v3777_v14 = vsel %vm1067_vm3, %v8263_v2, 0.0  ;;  %v3638_v29 = vadd.f32 %v3616_v46, %v3520_v59 }
 0x63f   :  { %v8193_v48 = vpop.f32.mrf.mxu2 }
 0x640   :  { %v8272_v6 = vadd.f32 %v8193_v48, %v3634_v5  ;;  %v3774_v48 = vadd.f32 %v3773_v0, %v3772_v47  ;;  %v9157_v5 = vld [vmem:[#allocation27_spill] sm:$0xff]  ;;  %v3618_v60 = vpop.f32.mrf.mxu1  ;;  %v3503_v51 = vpop.f32.mrf.mxu0 }
 0x641   :  { %v2932_v45 = vadd.f32 %v9157_v5, %v9156_v25  ;;  %v3639_v28 = vadd.f32 %v3618_v60, %v3521_v10 }
 0x642   :  { %v3809_v18 = vmul.f32 %v8272_v6, %v8272_v6  ;;  %v3776_v52 = vadd.f32 %v3775_v35, %v3774_v48  ;;  %v3779_v13 = vsel %vm1067_vm3, %v8272_v6, 0.0  ;;  %v9160_v35 = vld [vmem:[#allocation11_spill] sm:$0xff] }
 0x643   :  { %v3051_v26 = vadd.f32 %v9158_v24, %v2932_v45 }
 0x644   :  { %v3778_v7 = vadd.f32 %v3777_v14, %v3776_v52  ;;  %v3832_v42 = vsel %vm1067_vm3, %v3809_v18, 0.0  ;;  %v9161_v18 = vld [vmem:[#allocation16_spill] sm:$0xff] }
 0x646   :  { %v3780_v41 = vadd.f32 %v3779_v13, %v3778_v7 }
 0x647   :  { %v8208_v37 = vpop.f32.mrf.mxu2 }
 0x648   :  { %v8281_v57 = vadd.f32 %v8208_v37, %v3635_v63  ;;  %v3830_v37 = vsel %vm1067_vm3, %v3808_v55, 0.0  ;;  %v3385_v63 = vpop.f32.mrf.mxu3  ;;  %v3169_v55 = vadd.f32 %v9160_v35, %v3051_v26  ;;  %v3621_v52 = vpop.f32.mrf.mxu1 }
 0x649   :  { %v3404_v0 = vadd.f32 %v3385_v63, %v9159_v17 }
 0x64a   :  { %v3810_v22 = vmul.f32 %v8281_v57, %v8281_v57  ;;  %v3781_v11 = vsel %vm1067_vm3, %v8281_v57, 0.0  ;;  %v3287_v56 = vadd.f32 %v9161_v18, %v3169_v55 }
 0x64b   :  { %v3782_v8 = vadd.f32 %v3781_v11, %v3780_v41  ;;  %v3522_v14 = vadd.f32 %v3503_v51, %v3404_v0 }
 0x64c   :  { %v3834_v39 = vsel %vm1067_vm3, %v3810_v22, 0.0 }
 0x64d   :  { %v3640_v45 = vadd.f32 %v3621_v52, %v3522_v14  ;;  %v5605_v52 = vld [vmem:[%s8997_s4 + $0xc] sm:$0xf] }
 0x64f   :  { %v3729_v19 = vpop.f32.mrf.mxu2 }
 0x650   :  { %v8288_v3 = vadd.f32 %v3729_v19, %v3636_v50  ;;  %v3829_v19 = vadd.f32 %v3828_v30, %v3827_v36  ;;  %v3387_v22 = vpop.f32.mrf.mxu3  ;;  %v3623_v41 = vpop.f32.mrf.mxu1 }
 0x651   :  { %v3405_v5 = vadd.f32 %v3387_v22, %v3287_v56  ;;  %v4315_v22 = vsel %vm1512_vm2, %v5605_v52, 0 }
 0x652   :  { %v3811_v33 = vmul.f32 %v8288_v3, %v8288_v3  ;;  %v3831_v15 = vadd.f32 %v3830_v37, %v3829_v19  ;;  %v3783_v58 = vsel %vm1067_vm3, %v8288_v3, 0.0  ;;  %4324 = vmatpush.bf16.msrb.mxu2 %v4315_v22 }
 0x654   :  { %v3833_v43 = vadd.f32 %v3832_v42, %v3831_v15  ;;  %v3836_v46 = vsel %vm1067_vm3, %v3811_v33, 0.0 }
 0x656   :  { %v3835_v50 = vadd.f32 %v3834_v39, %v3833_v43 }
 0x657   :  { %v3731_v38 = vpop.f32.mrf.mxu2 }
 0x658   :  { %v8295_v1 = vadd.f32 %v3731_v38, %v3637_v34  ;;  %v3784_v38 = vadd.f32 %v3783_v58, %v3782_v8  ;;  %v3837_v12 = vadd.f32 %v3836_v46, %v3835_v50 }
 0x65a   :  { %v3812_v21 = vmul.f32 %v8295_v1, %v8295_v1  ;;  %v3785_v4 = vsel %vm1067_vm3, %v8295_v1, 0.0 }
 0x65b   :  { %v3786_v47 = vadd.f32 %v3785_v4, %v3784_v38 }
 0x65c   :  { %v3838_v27 = vsel %vm1067_vm3, %v3812_v21, 0.0 }
 0x65d   :  { %v3839_v34 = vadd.f32 %v3838_v27, %v3837_v12 }
 0x65f   :  { %v3734_v61 = vpop.f32.mrf.mxu2 }
 0x660   :  { %v8304_v9 = vadd.f32 %v3734_v61, %v3638_v29  ;;  %v3505_v61 = vpop.f32.mrf.mxu0 }
 0x661   :  { %v3523_v42 = vadd.f32 %v3505_v61, %v3405_v5  ;;  %v5578_v61 = vld [vmem:[%s8999_s6 + $0x3] sm:$0x1] }
 0x662   :  { %v3813_v44 = vmul.f32 %v8304_v9, %v8304_v9  ;;  %v3787_v59 = vsel %vm1067_vm3, %v8304_v9, 0.0 }
 0x663   :  { %v3788_v30 = vadd.f32 %v3787_v59, %v3786_v47  ;;  %v3641_v39 = vadd.f32 %v3623_v41, %v3523_v42 }
 0x664   :  { %v3840_v54 = vsel %vm1067_vm3, %v3813_v44, 0.0 }
 0x665   :  { %v3841_v29 = vadd.f32 %v3840_v54, %v3839_v34 }
 0x667   :  { %v3736_v40 = vpop.f32.mrf.mxu2 }
 0x668   :  { %v8323_v48 = vadd.f32 %v3736_v40, %v3639_v28 }
 0x66a   :  { %v3789_v53 = vsel %vm1067_vm3, %v8323_v48, 0.0  ;;  %v3814_v36 = vmul.f32 %v8323_v48, %v8323_v48 }
 0x66b   :  { %v3790_v37 = vadd.f32 %v3789_v53, %v3788_v30  ;;  %v3967_v53 = vld [vmem:[%s8997_s4] sm:$0xf] }
 0x66c   :  { %v3842_v13 = vsel %vm1067_vm3, %v3814_v36, 0.0  ;;  %v5596_v36 = vld [vmem:[%s8997_s4 + $0x8] sm:$0xf] }
 0x66d   :  { %v3843_v25 = vadd.f32 %v3842_v13, %v3841_v29  ;;  %v4197_v13 = vsel %vm1512_vm2, %v5596_v36, 0 }
 0x66e   :  { %4206 = vmatpush.bf16.msrb.mxu1 %v4197_v13 }
 0x66f   :  { %v3739_v19 = vpop.f32.mrf.mxu2 }
 0x670   :  { %v8331_v7 = vadd.f32 %v3739_v19, %v3640_v45 }
 0x672   :  { %v3791_v11 = vsel %vm1067_vm3, %v8331_v7, 0.0  ;;  %v3815_v33 = vmul.f32 %v8331_v7, %v8331_v7 }
 0x673   :  { %v3792_v60 = vadd.f32 %v3791_v11, %v3790_v37  ;;  %v4095_v37 = vsel %vm1512_vm2, %v3967_v53, 0 }
 0x674   :  { %v3844_v15 = vsel %vm1067_vm3, %v3815_v33, 0.0  ;;  %4104 = vmatpush.bf16.msrb.mxu0 %v4095_v37 }
 0x675   :  { %v3845_v10 = vadd.f32 %v3844_v15, %v3843_v25  ;;  %v5577_v25 = vld [vmem:[%s8998_s5 + $0x3] sm:$0x1] }
 0x677   :  { %v3741_v58 = vpop.f32.mrf.mxu2 }
 0x678   :  { %v3759_v21 = vadd.f32 %v3741_v58, %v3641_v39 }
 0x67a   :  { %v3793_v63 = vsel %vm1067_vm3, %v3759_v21, 0.0  ;;  %v3816_v43 = vmul.f32 %v3759_v21, %v3759_v21 }
 0x67b   :  { %v3794_v8 = vadd.f32 %v3793_v63, %v3792_v60 }
 0x67c   :  { %v3846_v24 = vsel %vm1067_vm3, %v3816_v43, 0.0  ;;  %v5614_v43 = vld [vmem:[%s8997_s4 + $0x10] sm:$0xf] }
 0x67d   :  { %v3795_v26 = vrot.slane %v3794_v8, 4  ;;  %v3847_v46 = vadd.f32 %v3846_v24, %v3845_v10 }
 0x67f   :  { %v3796_v4 = vadd.f32 %v3795_v26, %v3794_v8  ;;  %v3848_v44 = vrot.slane %v3847_v46, 4 }
 0x681   :  { %v3797_v50 = vrot.slane %v3796_v4, 2  ;;  %v3849_v38 = vadd.f32 %v3848_v44, %v3847_v46 }
 0x683   :  { %v3798_v17 = vadd.f32 %v3797_v50, %v3796_v4  ;;  %v3850_v0 = vrot.slane %v3849_v38, 2 }
 0x685   :  { %v3799_v27 = vrot.slane %v3798_v17, 1  ;;  %v3851_v59 = vadd.f32 %v3850_v0, %v3849_v38 }
 0x687   :  { %v3800_v28 = vadd.f32 %v3799_v27, %v3798_v17  ;;  %v3852_v51 = vrot.slane %v3851_v59, 1 }
 0x689   :  { %v3853_v12 = vadd.f32 %v3852_v51, %v3851_v59  ;;  %v3854_v47 = vmul.f32 0.0078125, %v3800_v28 }
 0x68b   :  { %v3855_v40 = vmul.f32 0.0078125, %v3853_v12  ;;  %v3856_v35 = vmul.f32 %v3854_v47, %v3854_v47 }
 0x68d   :  { %v3857_v55 = vsub.f32 %v3855_v40, %v3856_v35 }
 0x68f   :  { %v3858_v54 = vmax.f32 %v3857_v55, 0.0 }
 0x691   :  { %v3859_v34 = vadd.f32 1e-05, %v3858_v54 }
 0x693   :  { %5672 = vrsqrt.f32 %v3859_v34  ;;  %vm3866_vm0 = vweird.f32 %v3859_v34 }
 0x699   :  { %v5673_v30 = vpop.eup %5672 }
 0x69a   :  { %v3861_v14 = vmul.f32 %v5673_v30, %v3859_v34  ;;  %vm3867_vm15 = vweird.f32 %v5673_v30 }
 0x69b   :  { %vm3868_vm1 = vmor %vm3866_vm0, %vm3867_vm15 }
 0x69c   :  { %v3862_v18 = vmul.f32 %v5673_v30, %v3861_v14 }
 0x69e   :  { %v3863_v56 = vmul.f32 0.5, %v3862_v18 }
 0x6a0   :  { %v3864_v29 = vsub.f32 1.5, %v3863_v56 }
 0x6a2   :  { %v3865_v5 = vmul.f32 %v5673_v30, %v3864_v29 }
 0x6a4   :  { %v3869_v45 = vsel %vm3868_vm1, %v5673_v30, %v3865_v5 }
 0x6a5   :  { %v3870_v19 = vmul.f32 %v5577_v25, %v3869_v45 }
 0x6a7   :  { %v3871_v42 = vmul.f32 %v3870_v19, %v3854_v47  ;;  %v3874_v11 = vperm.slane %v3870_v19, 0 }
 0x6a9   :  { %v3872_v33 = vsub.f32 %v5578_v61, %v3871_v42  ;;  %v3877_v60 = vmul.f32 %v3874_v11, %v8218_v32  ;;  %v3878_v15 = vmul.f32 %v3874_v11, %v8175_v31  ;;  %v3879_v41 = vmul.f32 %v3874_v11, %v8225_v49 }
 0x6aa   :  { %v3880_v10 = vmul.f32 %v3874_v11, %v8183_v20  ;;  %v3881_v39 = vmul.f32 %v3874_v11, %v8244_v62  ;;  %v3888_v58 = vmul.f32 %v3874_v11, %v8304_v9  ;;  %v3889_v63 = vmul.f32 %v3874_v11, %v8323_v48 }
 0x6ab   :  { %v3882_v8 = vmul.f32 %v3874_v11, %v8253_v23  ;;  %v3890_v32 = vmul.f32 %v3874_v11, %v8331_v7  ;;  %v3891_v24 = vmul.f32 %v3874_v11, %v3759_v21  ;;  %v3893_v31 = vperm.slane %v3872_v33, 0 }
 0x6ac   :  { %v3885_v49 = vmul.f32 %v3874_v11, %v8281_v57  ;;  %v3886_v20 = vmul.f32 %v3874_v11, %v8288_v3  ;;  %v3887_v62 = vmul.f32 %v3874_v11, %v8295_v1  ;;  %v4433_v9 = vsel %vm1512_vm2, %v5614_v43, 0  ;;  %v3968_v43 = vld [vmem:[#allocation2 + $0x1] sm:$0xff] }
 0x6ad   :  { %v3896_v26 = vadd.f32 %v3893_v31, %v3877_v60  ;;  %v3897_v48 = vadd.f32 %v3893_v31, %v3878_v15  ;;  %v3898_v46 = vadd.f32 %v3893_v31, %v3879_v41  ;;  %v3899_v4 = vadd.f32 %v3893_v31, %v3880_v10  ;;  %4442 = vmatpush.bf16.msrb.mxu3 %v4433_v9 }
 0x6ae   :  { %v3900_v44 = vadd.f32 %v3893_v31, %v3881_v39  ;;  %v3901_v50 = vadd.f32 %v3893_v31, %v3882_v8  ;;  %v3904_v23 = vadd.f32 %v3893_v31, %v3885_v49  ;;  %v3905_v38 = vadd.f32 %v3893_v31, %v3886_v20 }
 0x6af   :  { %v3906_v7 = vadd.f32 %v3893_v31, %v3887_v62  ;;  %v3907_v21 = vadd.f32 %v3893_v31, %v3888_v58  ;;  %v3908_v17 = vadd.f32 %v3893_v31, %v3889_v63  ;;  %v3909_v0 = vadd.f32 %v3893_v31, %v3890_v32 }
 0x6b0   :  { %v3910_v57 = vadd.f32 %v3893_v31, %v3891_v24  ;;  %v3912_v27 = vmax.f32 %v3896_v26, 0.0  ;;  %v3913_v3 = vmax.f32 %v3897_v48, 0.0  ;;  %v3914_v59 = vmax.f32 %v3898_v46, 0.0  ;;  %v3943_v24 = vld [vmem:[#allocation2] sm:$0xff] }
 0x6b1   :  { %v3915_v1 = vmax.f32 %v3899_v4, 0.0  ;;  %v3876_v28 = vmul.f32 %v3874_v11, %v8173_v16  ;;  %v3883_v51 = vmul.f32 %v3874_v11, %v8263_v2  ;;  %v3916_v12 = vmax.f32 %v3900_v44, 0.0 }
 0x6b2   :  { %3928 = vst.msk [vmem:[#allocation2 + $0x21] sm:$0xff] %vm1067_vm3, %v3912_v27  ;;  %v3884_v47 = vmul.f32 %v3874_v11, %v8272_v6  ;;  %v3917_v40 = vmax.f32 %v3901_v50, 0.0  ;;  %v3920_v54 = vmax.f32 %v3904_v23, 0.0  ;;  %v3921_v30 = vmax.f32 %v3905_v38, 0.0 }
 0x6b3   :  { %3929 = vst.msk [vmem:[#allocation2 + $0x31] sm:$0xff] %vm1067_vm3, %v3913_v3  ;;  %v3895_v35 = vadd.f32 %v3893_v31, %v3876_v28  ;;  %v3902_v55 = vadd.f32 %v3893_v31, %v3883_v51  ;;  %v3922_v16 = vmax.f32 %v3906_v7, 0.0  ;;  %v3923_v2 = vmax.f32 %v3907_v21, 0.0 }
 0x6b4   :  { %3930 = vst.msk [vmem:[#allocation2 + $0x41] sm:$0xff] %vm1067_vm3, %v3914_v59  ;;  %v3903_v34 = vadd.f32 %v3893_v31, %v3884_v47  ;;  %v3924_v14 = vmax.f32 %v3908_v17, 0.0  ;;  %v3925_v6 = vmax.f32 %v3909_v0, 0.0  ;;  %v3926_v18 = vmax.f32 %v3910_v57, 0.0  ;;  %v4146_v31 = vld [vmem:[#allocation2 + $0x2] sm:$0xff] }
 0x6b5   :  { %3931 = vst.msk [vmem:[#allocation2 + $0x51] sm:$0xff] %vm1067_vm3, %v3915_v1  ;;  %v3911_v36 = vmax.f32 %v3895_v35, 0.0  ;;  %v3918_v22 = vmax.f32 %v3902_v55, 0.0 }
 0x6b6   :  { %3932 = vst.msk [vmem:[#allocation2 + $0x61] sm:$0xff] %vm1067_vm3, %v3916_v12  ;;  %v3919_v61 = vmax.f32 %v3903_v34, 0.0 }
 0x6b7   :  { %3933 = vst.msk [vmem:[#allocation2 + $0x71] sm:$0xff] %vm1067_vm3, %v3917_v40 }
 0x6b8   :  { %3936 = vst.msk [vmem:[#allocation2 + $0xc1] sm:$0xff] %vm1067_vm3, %v3920_v54 }
 0x6b9   :  { %3937 = vst.msk [vmem:[#allocation2 + $0xd1] sm:$0xff] %vm1067_vm3, %v3921_v30  ;;  %v4265_v49 = vld [vmem:[#allocation2 + $0x20] sm:$0xff] }
 0x6ba   :  { %3938 = vst.msk [vmem:[#allocation2 + $0xe1] sm:$0xff] %vm1067_vm3, %v3922_v16  ;;  %v8386_v56 = vld [vmem:[#allocation2 + $0x31] sm:$0xff]  ;;  %v8441_v9 = vld [vmem:[#allocation2 + $0x21] sm:$0xff] }
 0x6bb   :  { %v8388_v53 = vld [vmem:[#allocation2 + $0x32] sm:$0xff]  ;;  %3939 = vst.msk [vmem:[#allocation2 + $0xf1] sm:$0xff] %vm1067_vm3, %v3923_v2  ;;  %v8391_v52 = vld [vmem:[#allocation2 + $0x41] sm:$0xff]  ;;  %v8473_v51 = vpack.c.bf16 %v8386_v56, %v8441_v9 }
 0x6bc   :  { %v8393_v29 = vld [vmem:[#allocation2 + $0x42] sm:$0xff]  ;;  %3940 = vst.msk [vmem:[#allocation2 + $0x101] sm:$0xff] %vm1067_vm3, %v3924_v14  ;;  %v8396_v37 = vld [vmem:[#allocation2 + $0x51] sm:$0xff]  ;;  %v4399_v25 = vpack.c.bf16 %v8391_v52, %v8386_v56 }
 0x6bd   :  { %v8398_v13 = vld [vmem:[#allocation2 + $0x52] sm:$0xff]  ;;  %v4517_v5 = vpack.c.bf16 %v8393_v29, %v8388_v53  ;;  %3941 = vst.msk [vmem:[#allocation2 + $0x111] sm:$0xff] %vm1067_vm3, %v3925_v6  ;;  %v8405_v45 = vld [vmem:[#allocation2 + $0x61] sm:$0xff]  ;;  %v8490_v54 = vpack.c.bf16 %v8396_v37, %v8391_v52 }
 0x6be   :  { %v8407_v19 = vld [vmem:[#allocation2 + $0x62] sm:$0xff]  ;;  %3942 = vst.msk [vmem:[#allocation2 + $0x121] sm:$0xff] %vm1067_vm3, %v3926_v18  ;;  %v4400_v42 = vpack.c.bf16 %v8405_v45, %v8396_v37  ;;  %v3946_v1 = vld [vmem:[#allocation2 + $0x30] sm:$0xff]  ;;  %v8496_v30 = vpack.c.bf16 %v8398_v13, %v8393_v29 }
 0x6bf   :  { %v4518_v11 = vpack.c.bf16 %v8407_v19, %v8398_v13  ;;  %3927 = vst.msk [vmem:[#allocation2 + $0x11] sm:$0xff] %vm1067_vm3, %v3911_v36  ;;  %v8443_v26 = vld [vmem:[#allocation2 + $0x22] sm:$0xff]  ;;  %v8475_v12 = vpack.c.bf16 %v3946_v1, %v4265_v49  ;;  %v3948_v35 = vld [vmem:[#allocation2 + $0x50] sm:$0xff] }
 0x6c0   :  { %3934 = vst.msk [vmem:[#allocation2 + $0x81] sm:$0xff] %vm1067_vm3, %v3918_v22  ;;  %v8416_v33 = vld [vmem:[#allocation2 + $0xd1] sm:$0xff]  ;;  %v8451_v7 = vld [vmem:[#allocation2 + $0xc1] sm:$0xff]  ;;  %v8479_v47 = vpack.c.bf16 %v8388_v53, %v8443_v26 }
 0x6c1   :  { %v8418_v60 = vld [vmem:[#allocation2 + $0xd2] sm:$0xff]  ;;  %3935 = vst.msk [vmem:[#allocation2 + $0xb1] sm:$0xff] %vm1067_vm3, %v3919_v61  ;;  %v8421_v15 = vld [vmem:[#allocation2 + $0xe1] sm:$0xff] }
 0x6c2   :  { %v8423_v41 = vld [vmem:[#allocation2 + $0xe2] sm:$0xff]  ;;  %v8425_v10 = vld [vmem:[#allocation2 + $0xf1] sm:$0xff] }
 0x6c3   :  { %v8427_v39 = vld [vmem:[#allocation2 + $0xf2] sm:$0xff]  ;;  %v8433_v8 = vld [vmem:[#allocation2 + $0x101] sm:$0xff] }
 0x6c4   :  { %v8435_v32 = vld [vmem:[#allocation2 + $0x102] sm:$0xff]  ;;  %v8505_v2 = vld [vmem:[#allocation2 + $0x71] sm:$0xff] }
 0x6c5   :  { %v8457_v0 = vld [vmem:[#allocation2 + $0xc2] sm:$0xff]  ;;  %v3950_v14 = vld [vmem:[#allocation2 + $0x70] sm:$0xff]  ;;  %v8513_v36 = vpack.c.bf16 %v8505_v2, %v8405_v45 }
 0x6c6   :  { %v8445_v48 = vld [vmem:[#allocation2 + $0x11] sm:$0xff]  ;;  %v4267_v28 = vld [vmem:[#allocation2 + $0x40] sm:$0xff] }
 0x6c7   :  { %v3944_v46 = vld [vmem:[#allocation2 + $0x10] sm:$0xff]  ;;  %v3984_v44 = vpack.c.bf16 %v8445_v48, %v3968_v43  ;;  %v4398_v57 = vpack.c.bf16 %v8441_v9, %v8445_v48  ;;  %v4281_v40 = vpack.c.bf16 %v4267_v28, %v3946_v1  ;;  %v4269_v55 = vld [vmem:[#allocation2 + $0x60] sm:$0xff]  ;;  %v8492_v34 = vpack.c.bf16 %v3948_v35, %v4267_v28 }
 0x6c8   :  { %v8447_v4 = vld [vmem:[#allocation2 + $0x12] sm:$0xff]  ;;  %v3959_v50 = vpack.c.bf16 %v3944_v46, %v3943_v24  ;;  %v4280_v38 = vpack.c.bf16 %v4265_v49, %v3944_v46  ;;  %v4282_v16 = vpack.c.bf16 %v4269_v55, %v3948_v35  ;;  %v8509_v18 = vld [vmem:[#allocation2 + $0x80] sm:$0xff]  ;;  %v8515_v22 = vpack.c.bf16 %v3950_v14, %v4269_v55 }
 0x6c9   :  { %v4162_v23 = vpack.c.bf16 %v8447_v4, %v4146_v31  ;;  %v8453_v21 = vld [vmem:[#allocation2 + $0xb1] sm:$0xff]  ;;  %v4516_v27 = vpack.c.bf16 %v8443_v26, %v8447_v4  ;;  %5580 = vmatmul.msk.bf16.vlgmr.msra.gmra.mxu3 %vm1067_vm3, %v3984_v44  ;;  %v4283_v43 = vpack.c.bf16 %v8509_v18, %v3950_v14  ;;  %v3976_v24 = vld [vmem:[#allocation2 + $0xa1] sm:$0xff]  ;;  %v8537_v35 = vpack.c.bf16 %v8416_v33, %v8451_v7 }
 0x6ca   :  { %v8455_v17 = vld [vmem:[#allocation2 + $0xb2] sm:$0xff]  ;;  %5588 = vmatmul.msk.bf16.vlgmr.msrb.gmra.mxu0 %vm1067_vm3, %v3959_v50  ;;  %5606 = vmatmul.msk.bf16.vlgmr.msrb.gmra.mxu2 %vm1067_vm3, %v4280_v38  ;;  %v3951_v31 = vld [vmem:[#allocation2 + $0xa0] sm:$0xff]  ;;  %v3988_v50 = vpack.c.bf16 %v8453_v21, %v3976_v24 }
 0x6cb   :  { %5597 = vmatmul.msk.bf16.vlgmr.msrb.gmra.mxu1 %vm1067_vm3, %v4162_v23  ;;  %v8507_v6 = vld [vmem:[#allocation2 + $0x72] sm:$0xff]  ;;  %v4154_v46 = vld [vmem:[#allocation2 + $0xa2] sm:$0xff] }
 0x6cc   :  { %v8519_v61 = vpack.c.bf16 %v8507_v6, %v8407_v19  ;;  %v3952_v49 = vld [vmem:[#allocation2 + $0xb0] sm:$0xff]  ;;  %v4273_v44 = vld [vmem:[#allocation2 + $0xc0] sm:$0xff]  ;;  %v4166_v38 = vpack.c.bf16 %v8455_v17, %v4154_v46 }
 0x6cd   :  { %v3963_v23 = vpack.c.bf16 %v3952_v49, %v3951_v31  ;;  %v4284_v1 = vpack.c.bf16 %v4273_v44, %v3952_v49  ;;  %v3954_v28 = vld [vmem:[#allocation2 + $0xd0] sm:$0xff]  ;;  %v4277_v24 = vld [vmem:[#allocation2 + $0x100] sm:$0xff]  ;;  %v8554_v31 = vpack.c.bf16 %v8425_v10, %v8421_v15 }
 0x6ce   :  { %v8539_v55 = vpack.c.bf16 %v3954_v28, %v4273_v44  ;;  %v5623_v46 = vld [vmem:[%s8997_s4 + $0x14] sm:$0xf]  ;;  %v5632_v44 = vld [vmem:[%s8997_s4 + $0x18] sm:$0xf] }
 0x6cf   :  { %v8587_v62 = vld [vmem:[#allocation2 + $0x112] sm:$0xff] }
 0x6d9   :  { %5581 = vmatmul.msk.bf16.gmra.mxu3 %vm1067_vm3, %v8473_v51 }
 0x6da   :  { %5589 = vmatmul.msk.bf16.gmra.mxu0 %vm1067_vm3, %v8475_v12  ;;  %5607 = vmatmul.msk.bf16.gmra.mxu2 %vm1067_vm3, %v4281_v40  ;;  %v4275_v40 = vld [vmem:[#allocation2 + $0xe0] sm:$0xff] }
 0x6db   :  { %5598 = vmatmul.msk.bf16.gmra.mxu1 %vm1067_vm3, %v8479_v47  ;;  %v4285_v14 = vpack.c.bf16 %v4275_v40, %v3954_v28  ;;  %v4669_v28 = vsel %vm1512_vm2, %v5632_v44, 0  ;;  %v3958_v44 = vld [vmem:[#allocation2 + $0x110] sm:$0xff] }
 0x6dc   :  { %4678 = vmatpush.bf16.msra.mxu1 %v4669_v28  ;;  %v8595_v20 = vpack.c.bf16 %v3958_v44, %v4277_v24 }
 0x6e9   :  { %5582 = vmatmul.msk.bf16.gmra.mxu3 %vm1067_vm3, %v8490_v54 }
 0x6ea   :  { %5590 = vmatmul.msk.bf16.gmra.mxu0 %vm1067_vm3, %v8492_v34  ;;  %5608 = vmatmul.msk.bf16.gmra.mxu2 %vm1067_vm3, %v4282_v16  ;;  %v8543_v16 = vpack.c.bf16 %v8418_v60, %v8457_v0 }
 0x6eb   :  { %5599 = vmatmul.msk.bf16.gmra.mxu1 %vm1067_vm3, %v8496_v30 }
 0x6f9   :  { %5583 = vmatmul.msk.bf16.gmra.mxu3 %vm1067_vm3, %v8513_v36 }
 0x6fa   :  { %5591 = vmatmul.msk.bf16.gmra.mxu0 %vm1067_vm3, %v8515_v22  ;;  %5609 = vmatmul.msk.bf16.gmra.mxu2 %vm1067_vm3, %v4283_v43  ;;  %v3956_v43 = vld [vmem:[#allocation2 + $0xf0] sm:$0xff] }
 0x6fb   :  { %5600 = vmatmul.msk.bf16.gmra.mxu1 %vm1067_vm3, %v8519_v61  ;;  %v8556_v49 = vpack.c.bf16 %v3956_v43, %v4275_v40 }
 0x709   :  { %5584 = vmatmul.msk.bf16.gmra.mxu3 %vm1067_vm3, %v3988_v50  ;;  %v5641_v50 = vld [vmem:[%s8997_s4 + $0x1c] sm:$0xf] }
 0x70a   :  { %5592 = vmatmul.msk.bf16.gmra.mxu0 %vm1067_vm3, %v3963_v23  ;;  %5610 = vmatmul.msk.bf16.gmra.mxu2 %vm1067_vm3, %v4284_v1  ;;  %v8569_v23 = vpack.c.bf16 %v8427_v39, %v8423_v41  ;;  %v4551_v1 = vsel %vm1512_vm2, %v5623_v46, 0  ;;  %v4787_v40 = vsel %vm1512_vm2, %v5641_v50, 0  ;;  %v8585_v46 = vld [vmem:[#allocation2 + $0x111] sm:$0xff]  ;;  %v8589_v50 = vld [vmem:[#allocation2 + $0x120] sm:$0xff] }
 0x70b   :  { %5601 = vmatmul.msk.bf16.gmra.mxu1 %vm1067_vm3, %v4166_v38  ;;  %v4286_v38 = vpack.c.bf16 %v4277_v24, %v3956_v43  ;;  %4560 = vmatpush.bf16.msra.mxu0 %v4551_v1  ;;  %v8599_v1 = vpack.c.bf16 %v8587_v62, %v8435_v32  ;;  %v4287_v28 = vpack.c.bf16 %v8589_v50, %v3958_v44 }
 0x70c   :  { %4796 = vmatpush.bf16.msra.mxu2 %v4787_v40 }
 0x719   :  { %5585 = vmatmul.msk.bf16.gmra.mxu3 %vm1067_vm3, %v8537_v35 }
 0x71a   :  { %5593 = vmatmul.msk.bf16.gmra.mxu0 %vm1067_vm3, %v8539_v55  ;;  %5611 = vmatmul.msk.bf16.gmra.mxu2 %vm1067_vm3, %v4285_v14  ;;  %v5650_v14 = vld [vmem:[%s8997_s4 + $0x20] sm:$0xf] }
 0x71b   :  { %5602 = vmatmul.msk.bf16.gmra.mxu1 %vm1067_vm3, %v8543_v16  ;;  %v4905_v43 = vsel %vm1512_vm2, %v5650_v14, 0 }
 0x71c   :  { %4914 = vmatpush.bf16.msra.mxu3 %v4905_v43 }
 0x729   :  { %5586 = vmatmul.msk.bf16.gmra.mxu3 %vm1067_vm3, %v8554_v31 }
 0x72a   :  { %5594 = vmatmul.msk.bf16.gmra.mxu0 %vm1067_vm3, %v8556_v49  ;;  %5612 = vmatmul.msk.bf16.gmra.mxu2 %vm1067_vm3, %v4286_v38  ;;  %v8593_v38 = vpack.c.bf16 %v8585_v46, %v8433_v8 }
 0x72b   :  { %5603 = vmatmul.msk.bf16.gmra.mxu1 %vm1067_vm3, %v8569_v23 }
 0x739   :  { %5587 = vmatmul.msk.bf16.gmra.mxu3 %vm1067_vm3, %v8593_v38 }
 0x73a   :  { %5595 = vmatmul.msk.bf16.gmra.mxu0 %vm1067_vm3, %v8595_v20  ;;  %5613 = vmatmul.msk.bf16.gmra.mxu2 %vm1067_vm3, %v4287_v28 }
 0x73b   :  { %5604 = vmatmul.msk.bf16.gmra.mxu1 %vm1067_vm3, %v8599_v1 }
 0x747   :  { %v4106_v40 = vpop.f32.mrf.mxu0 }
 0x748   :  { %v4208_v24 = vpop.f32.mrf.mxu1 }
 0x749   :  { %5615 = vmatmul.msk.bf16.vlgmr.msrb.gmra.mxu3 %vm1067_vm3, %v4398_v57 }
 0x74a   :  { %5624 = vmatmul.msk.bf16.vlgmr.msra.gmra.mxu0 %vm1067_vm3, %v4516_v27  ;;  %5642 = vmatmul.msk.bf16.vlgmr.msra.gmra.mxu2 %vm1067_vm3, %v8473_v51 }
 0x74b   :  { %5633 = vmatmul.msk.bf16.vlgmr.msra.gmra.mxu1 %vm1067_vm3, %v8475_v12 }
 0x74c   :  { %v4030_v14 = vpop.f32.mrf.mxu3 }
 0x74d   :  { %v4107_v43 = vadd.f32 %v4106_v40, %v4030_v14  ;;  %v4326_v44 = vpop.f32.mrf.mxu2 }
 0x74f   :  { %v4108_v28 = vpop.f32.mrf.mxu0  ;;  %v4248_v63 = vadd.f32 %v4208_v24, %v4107_v43 }
 0x750   :  { %v4210_v58 = vpop.f32.mrf.mxu1 }
 0x751   :  { %v8621_v9 = vadd.f32 %v4326_v44, %v4248_v63 }
 0x754   :  { %v4032_v48 = vpop.f32.mrf.mxu3 }
 0x755   :  { %v4109_v57 = vadd.f32 %v4108_v28, %v4032_v48  ;;  %v4328_v59 = vpop.f32.mrf.mxu2 }
 0x757   :  { %v4111_v26 = vpop.f32.mrf.mxu0  ;;  %v4249_v4 = vadd.f32 %v4210_v58, %v4109_v57  ;;  %v8655_v57 = vld [vmem:[#allocation2 + $0x82] sm:$0xff] }
 0x758   :  { %v4213_v27 = vpop.f32.mrf.mxu1 }
 0x759   :  { %v8623_v3 = vadd.f32 %v4328_v59, %v4249_v4  ;;  %5616 = vmatmul.msk.bf16.gmra.mxu3 %vm1067_vm3, %v4399_v25 }
 0x75a   :  { %5625 = vmatmul.msk.bf16.gmra.mxu0 %vm1067_vm3, %v4517_v5  ;;  %5643 = vmatmul.msk.bf16.gmra.mxu2 %vm1067_vm3, %v8490_v54 }
 0x75b   :  { %5634 = vmatmul.msk.bf16.gmra.mxu1 %vm1067_vm3, %v8492_v34 }
 0x75c   :  { %v4035_v58 = vpop.f32.mrf.mxu3 }
 0x75d   :  { %v4112_v63 = vadd.f32 %v4111_v26, %v4035_v58  ;;  %v4331_v59 = vpop.f32.mrf.mxu2  ;;  %v4743_v26 = vld [vmem:[#allocation2 + $0x91] sm:$0xff]  ;;  %v4519_v58 = vpack.c.bf16 %v8655_v57, %v8507_v6 }
 0x75f   :  { %v4113_v51 = vpop.f32.mrf.mxu0  ;;  %v4250_v12 = vadd.f32 %v4213_v27, %v4112_v63 }
 0x760   :  { %v4215_v40 = vpop.f32.mrf.mxu1 }
 0x761   :  { %v8637_v56 = vadd.f32 %v4331_v59, %v4250_v12 }
 0x764   :  { %v4037_v52 = vpop.f32.mrf.mxu3 }
 0x765   :  { %v4114_v25 = vadd.f32 %v4113_v51, %v4037_v52  ;;  %v4333_v24 = vpop.f32.mrf.mxu2 }
 0x767   :  { %v4116_v53 = vpop.f32.mrf.mxu0  ;;  %v4251_v29 = vadd.f32 %v4215_v40, %v4114_v25 }
 0x768   :  { %v4218_v5 = vpop.f32.mrf.mxu1 }
 0x769   :  { %v8639_v14 = vadd.f32 %v4333_v24, %v4251_v29  ;;  %5617 = vmatmul.msk.bf16.gmra.mxu3 %vm1067_vm3, %v4400_v42  ;;  %v4389_v42 = vld [vmem:[#allocation2 + $0x81] sm:$0xff] }
 0x76a   :  { %5626 = vmatmul.msk.bf16.gmra.mxu0 %vm1067_vm3, %v4518_v11  ;;  %5644 = vmatmul.msk.bf16.gmra.mxu2 %vm1067_vm3, %v8513_v36  ;;  %v4625_v11 = vld [vmem:[#allocation2 + $0x90] sm:$0xff]  ;;  %v4401_v36 = vpack.c.bf16 %v4389_v42, %v8505_v2  ;;  %v4755_v59 = vpack.c.bf16 %v4743_v26, %v4389_v42 }
 0x76b   :  { %5635 = vmatmul.msk.bf16.gmra.mxu1 %vm1067_vm3, %v8515_v22  ;;  %v4637_v63 = vpack.c.bf16 %v4625_v11, %v8509_v18 }
 0x76c   :  { %v4040_v54 = vpop.f32.mrf.mxu3 }
 0x76d   :  { %v4117_v34 = vadd.f32 %v4116_v53, %v4040_v54  ;;  %v4336_v43 = vpop.f32.mrf.mxu2 }
 0x76f   :  { %v4118_v44 = vpop.f32.mrf.mxu0  ;;  %v4252_v28 = vadd.f32 %v4218_v5, %v4117_v34 }
 0x770   :  { %v4220_v48 = vpop.f32.mrf.mxu1 }
 0x771   :  { %v8653_v37 = vadd.f32 %v4336_v43, %v4252_v28  ;;  %v9163_v28 = vpack.c.bf16 %v8457_v0, %v8455_v17 }
 0x774   :  { %v4042_v45 = vpop.f32.mrf.mxu3 }
 0x775   :  { %v4119_v13 = vadd.f32 %v4118_v44, %v4042_v45  ;;  %v4338_v19 = vpop.f32.mrf.mxu2  ;;  %v9162_v44 = vpack.c.bf16 %v8451_v7, %v8453_v21 }
 0x777   :  { %v4121_v22 = vpop.f32.mrf.mxu0  ;;  %v4253_v4 = vadd.f32 %v4220_v48, %v4119_v13 }
 0x778   :  { %v4223_v27 = vpop.f32.mrf.mxu1 }
 0x779   :  { %v8661_v51 = vadd.f32 %v4338_v19, %v4253_v4  ;;  %5618 = vmatmul.msk.bf16.gmra.mxu3 %vm1067_vm3, %v4401_v36 }
 0x77a   :  { %5627 = vmatmul.msk.bf16.gmra.mxu0 %vm1067_vm3, %v4519_v58  ;;  %5645 = vmatmul.msk.bf16.gmra.mxu2 %vm1067_vm3, %v4755_v59 }
 0x77b   :  { %5636 = vmatmul.msk.bf16.gmra.mxu1 %vm1067_vm3, %v4637_v63 }
 0x77c   :  { %v4045_v12 = vpop.f32.mrf.mxu3 }
 0x77d   :  { %v4122_v40 = vadd.f32 %v4121_v22, %v4045_v12  ;;  %v4341_v52 = vpop.f32.mrf.mxu2 }
 0x77f   :  { %v4123_v2 = vpop.f32.mrf.mxu0  ;;  %v4254_v25 = vadd.f32 %v4223_v27, %v4122_v40 }
 0x780   :  { %v4225_v24 = vpop.f32.mrf.mxu1 }
 0x781   :  { %v8667_v6 = vadd.f32 %v4341_v52, %v4254_v25 }
 0x784   :  { %v4047_v18 = vpop.f32.mrf.mxu3 }
 0x785   :  { %v4124_v53 = vadd.f32 %v4123_v2, %v4047_v18  ;;  %v4343_v29 = vpop.f32.mrf.mxu2 }
 0x787   :  { %v4126_v5 = vpop.f32.mrf.mxu0  ;;  %v4255_v54 = vadd.f32 %v4225_v24, %v4124_v53 }
 0x788   :  { %v4228_v34 = vpop.f32.mrf.mxu1 }
 0x789   :  { %v8669_v43 = vadd.f32 %v4343_v29, %v4255_v54  ;;  %5619 = vmatmul.msk.bf16.gmra.mxu3 %vm1067_vm3, %v9162_v44  ;;  %v4397_v44 = vld [vmem:[#allocation2 + $0x121] sm:$0xff] }
 0x78a   :  { %5628 = vmatmul.msk.bf16.gmra.mxu0 %vm1067_vm3, %v9163_v28  ;;  %5646 = vmatmul.msk.bf16.gmra.mxu2 %vm1067_vm3, %v8537_v35  ;;  %v9165_v35 = vpack.c.bf16 %v8423_v41, %v8418_v60  ;;  %v8717_v28 = vld [vmem:[#allocation2 + $0x122] sm:$0xff] }
 0x78b   :  { %5637 = vmatmul.msk.bf16.gmra.mxu1 %vm1067_vm3, %v8539_v55  ;;  %v9164_v55 = vpack.c.bf16 %v8421_v15, %v8416_v33 }
 0x78c   :  { %v4050_v48 = vpop.f32.mrf.mxu3 }
 0x78d   :  { %v4127_v45 = vadd.f32 %v4126_v5, %v4050_v48  ;;  %v4346_v42 = vpop.f32.mrf.mxu2  ;;  %v4633_v48 = vld [vmem:[#allocation2 + $0x130] sm:$0xff] }
 0x78f   :  { %v4128_v13 = vpop.f32.mrf.mxu0  ;;  %v4256_v19 = vadd.f32 %v4228_v34, %v4127_v45  ;;  %v4751_v45 = vld [vmem:[#allocation2 + $0x131] sm:$0xff] }
 0x790   :  { %v4230_v11 = vpop.f32.mrf.mxu1 }
 0x791   :  { %v8683_v7 = vadd.f32 %v4346_v42, %v4256_v19  ;;  %v4523_v19 = vpack.c.bf16 %v8717_v28, %v8587_v62 }
 0x794   :  { %v4052_v21 = vpop.f32.mrf.mxu3 }
 0x795   :  { %v4129_v26 = vadd.f32 %v4128_v13, %v4052_v21  ;;  %v4348_v22 = vpop.f32.mrf.mxu2  ;;  %v4759_v21 = vpack.c.bf16 %v4751_v45, %v4397_v44 }
 0x797   :  { %v4131_v17 = vpop.f32.mrf.mxu0  ;;  %v4257_v0 = vadd.f32 %v4230_v11, %v4129_v26  ;;  %v4641_v11 = vpack.c.bf16 %v4633_v48, %v8589_v50 }
 0x798   :  { %v4233_v4 = vpop.f32.mrf.mxu1 }
 0x799   :  { %v8685_v27 = vadd.f32 %v4348_v22, %v4257_v0  ;;  %5620 = vmatmul.msk.bf16.gmra.mxu3 %vm1067_vm3, %v9164_v55 }
 0x79a   :  { %5629 = vmatmul.msk.bf16.gmra.mxu0 %vm1067_vm3, %v9165_v35  ;;  %5647 = vmatmul.msk.bf16.gmra.mxu2 %vm1067_vm3, %v8554_v31  ;;  %v9167_v31 = vpack.c.bf16 %v8435_v32, %v8427_v39 }
 0x79b   :  { %5638 = vmatmul.msk.bf16.gmra.mxu1 %vm1067_vm3, %v8556_v49  ;;  %v9166_v49 = vpack.c.bf16 %v8433_v8, %v8425_v10 }
 0x79c   :  { %v4055_v36 = vpop.f32.mrf.mxu3 }
 0x79d   :  { %v4132_v58 = vadd.f32 %v4131_v17, %v4055_v36  ;;  %v4351_v63 = vpop.f32.mrf.mxu2 }
 0x79f   :  { %v4133_v59 = vpop.f32.mrf.mxu0  ;;  %v4258_v12 = vadd.f32 %v4233_v4, %v4132_v58 }
 0x7a0   :  { %v4235_v40 = vpop.f32.mrf.mxu1 }
 0x7a1   :  { %v8699_v33 = vadd.f32 %v4351_v63, %v4258_v12 }
 0x7a4   :  { %v4057_v15 = vpop.f32.mrf.mxu3 }
 0x7a5   :  { %v4134_v52 = vadd.f32 %v4133_v59, %v4057_v15  ;;  %v4353_v2 = vpop.f32.mrf.mxu2 }
 0x7a7   :  { %v4136_v60 = vpop.f32.mrf.mxu0  ;;  %v4259_v41 = vadd.f32 %v4235_v40, %v4134_v52 }
 0x7a8   :  { %v4238_v25 = vpop.f32.mrf.mxu1 }
 0x7a9   :  { %v8701_v24 = vadd.f32 %v4353_v2, %v4259_v41  ;;  %5621 = vmatmul.msk.bf16.gmra.mxu3 %vm1067_vm3, %v9166_v49 }
 0x7aa   :  { %5630 = vmatmul.msk.bf16.gmra.mxu0 %vm1067_vm3, %v9167_v31  ;;  %5648 = vmatmul.msk.bf16.gmra.mxu2 %vm1067_vm3, %v8593_v38  ;;  %v4405_v38 = vpack.c.bf16 %v4397_v44, %v8585_v46 }
 0x7ab   :  { %5639 = vmatmul.msk.bf16.gmra.mxu1 %vm1067_vm3, %v8595_v20 }
 0x7ac   :  { %v4060_v18 = vpop.f32.mrf.mxu3 }
 0x7ad   :  { %v4137_v53 = vadd.f32 %v4136_v60, %v4060_v18  ;;  %v4356_v29 = vpop.f32.mrf.mxu2 }
 0x7af   :  { %v4138_v5 = vpop.f32.mrf.mxu0  ;;  %v4260_v54 = vadd.f32 %v4238_v25, %v4137_v53 }
 0x7b0   :  { %v4240_v34 = vpop.f32.mrf.mxu1 }
 0x7b1   :  { %v8715_v10 = vadd.f32 %v4356_v29, %v4260_v54 }
 0x7b4   :  { %v4062_v8 = vpop.f32.mrf.mxu3 }
 0x7b5   :  { %v4139_v39 = vadd.f32 %v4138_v5, %v4062_v8  ;;  %v4358_v32 = vpop.f32.mrf.mxu2 }
 0x7b7   :  { %v4141_v20 = vpop.f32.mrf.mxu0  ;;  %v4261_v42 = vadd.f32 %v4240_v34, %v4139_v39 }
 0x7b8   :  { %v4243_v13 = vpop.f32.mrf.mxu1 }
 0x7b9   :  { %v8723_v26 = vadd.f32 %v4358_v32, %v4261_v42  ;;  %5622 = vmatmul.msk.bf16.gmra.mxu3 %vm1067_vm3, %v4405_v38 }
 0x7ba   :  { %5631 = vmatmul.msk.bf16.gmra.mxu0 %vm1067_vm3, %v4523_v19  ;;  %5649 = vmatmul.msk.bf16.gmra.mxu2 %vm1067_vm3, %v4759_v21 }
 0x7bb   :  { %5640 = vmatmul.msk.bf16.gmra.mxu1 %vm1067_vm3, %v4641_v11 }
 0x7bc   :  { %v4065_v22 = vpop.f32.mrf.mxu3 }
 0x7bd   :  { %v4142_v17 = vadd.f32 %v4141_v20, %v4065_v22  ;;  %v4361_v0 = vpop.f32.mrf.mxu2 }
 0x7bf   :  { %v4143_v46 = vpop.f32.mrf.mxu0  ;;  %v4262_v4 = vadd.f32 %v4243_v13, %v4142_v17 }
 0x7c0   :  { %v4245_v55 = vpop.f32.mrf.mxu1 }
 0x7c1   :  { %v8729_v62 = vadd.f32 %v4361_v0, %v4262_v4 }
 0x7c4   :  { %v4067_v50 = vpop.f32.mrf.mxu3 }
 0x7c5   :  { %v4144_v35 = vadd.f32 %v4143_v46, %v4067_v50  ;;  %v4363_v36 = vpop.f32.mrf.mxu2  ;;  %v4861_v50 = vld [vmem:[#allocation2 + $0x92] sm:$0xff] }
 0x7c7   :  { %v4562_v58 = vpop.f32.mrf.mxu0  ;;  %v4263_v63 = vadd.f32 %v4245_v55, %v4144_v35  ;;  %v4873_v35 = vpack.c.bf16 %v4861_v50, %v8655_v57 }
 0x7c8   :  { %v4680_v59 = vpop.f32.mrf.mxu1 }
 0x7c9   :  { %v8731_v12 = vadd.f32 %v4363_v36, %v4263_v63  ;;  %5651 = vmatmul.msk.bf16.vlgmr.msra.gmra.mxu3 %vm1067_vm3, %v8479_v47 }
 0x7cc   :  { %v4444_v40 = vpop.f32.mrf.mxu3 }
 0x7cd   :  { %v4484_v15 = vadd.f32 %v4444_v40, %v8621_v9  ;;  %v4798_v52 = vpop.f32.mrf.mxu2 }
 0x7cf   :  { %v4602_v2 = vadd.f32 %v4562_v58, %v4484_v15  ;;  %v4564_v60 = vpop.f32.mrf.mxu0 }
 0x7d0   :  { %v4682_v25 = vpop.f32.mrf.mxu1 }
 0x7d1   :  { %v4720_v41 = vadd.f32 %v4680_v59, %v4602_v2 }
 0x7d3   :  { %v8736_v49 = vadd.f32 %v4798_v52, %v4720_v41 }
 0x7d4   :  { %v4446_v31 = vpop.f32.mrf.mxu3 }
 0x7d5   :  { %v4485_v18 = vadd.f32 %v4446_v31, %v8623_v3  ;;  %v4800_v53 = vpop.f32.mrf.mxu2 }
 0x7d7   :  { %v4603_v29 = vadd.f32 %v4564_v60, %v4485_v18  ;;  %v4567_v47 = vpop.f32.mrf.mxu0 }
 0x7d8   :  { %v4685_v34 = vpop.f32.mrf.mxu1 }
 0x7d9   :  { %v4721_v5 = vadd.f32 %v4682_v25, %v4603_v29  ;;  %5652 = vmatmul.msk.bf16.gmra.mxu3 %vm1067_vm3, %v8496_v30 }
 0x7db   :  { %v4839_v54 = vadd.f32 %v4800_v53, %v4721_v5 }
 0x7dc   :  { %v4449_v9 = vpop.f32.mrf.mxu3 }
 0x7dd   :  { %v4486_v8 = vadd.f32 %v4449_v9, %v8637_v56  ;;  %v4803_v44 = vpop.f32.mrf.mxu2 }
 0x7df   :  { %v4604_v39 = vadd.f32 %v4567_v47, %v4486_v8  ;;  %v4569_v45 = vpop.f32.mrf.mxu0 }
 0x7e0   :  { %v4687_v42 = vpop.f32.mrf.mxu1 }
 0x7e1   :  { %v4722_v32 = vadd.f32 %v4685_v34, %v4604_v39 }
 0x7e3   :  { %v4840_v48 = vadd.f32 %v4803_v44, %v4722_v32 }
 0x7e4   :  { %v4451_v20 = vpop.f32.mrf.mxu3 }
 0x7e5   :  { %v4487_v3 = vadd.f32 %v4451_v20, %v8639_v14  ;;  %v4805_v38 = vpop.f32.mrf.mxu2 }
 0x7e7   :  { %v4605_v13 = vadd.f32 %v4569_v45, %v4487_v3  ;;  %v4572_v56 = vpop.f32.mrf.mxu0 }
 0x7e8   :  { %v4690_v17 = vpop.f32.mrf.mxu1 }
 0x7e9   :  { %v4723_v19 = vadd.f32 %v4687_v42, %v4605_v13  ;;  %5653 = vmatmul.msk.bf16.gmra.mxu3 %vm1067_vm3, %v8519_v61 }
 0x7eb   :  { %v4841_v30 = vadd.f32 %v4805_v38, %v4723_v19 }
 0x7ec   :  { %v4454_v11 = vpop.f32.mrf.mxu3 }
 0x7ed   :  { %v4488_v21 = vadd.f32 %v4454_v11, %v8653_v37  ;;  %v4808_v46 = vpop.f32.mrf.mxu2 }
 0x7ef   :  { %v4606_v22 = vadd.f32 %v4572_v56, %v4488_v21  ;;  %v4574_v31 = vpop.f32.mrf.mxu0 }
 0x7f0   :  { %v4692_v18 = vpop.f32.mrf.mxu1 }
 0x7f1   :  { %v4724_v0 = vadd.f32 %v4690_v17, %v4606_v22 }
 0x7f3   :  { %v4842_v4 = vadd.f32 %v4808_v46, %v4724_v0 }
 0x7f4   :  { %v4456_v55 = vpop.f32.mrf.mxu3 }
 0x7f5   :  { %v8747_v14 = vadd.f32 %v4456_v55, %v8661_v51  ;;  %v4810_v29 = vpop.f32.mrf.mxu2 }
 0x7f7   :  { %v4577_v5 = vpop.f32.mrf.mxu0  ;;  %v4607_v50 = vadd.f32 %v4574_v31, %v8747_v14 }
 0x7f9   :  { %5654 = vmatmul.msk.bf16.gmra.mxu3 %vm1067_vm3, %v4873_v35 }
 0x7fc   :  { %v4459_v61 = vpop.f32.mrf.mxu3 }
 0x7fd   :  { %v8752_v36 = vadd.f32 %v4459_v61, %v8667_v6 }
 0x7ff   :  { %v4579_v9 = vpop.f32.mrf.mxu0  ;;  %v4608_v35 = vadd.f32 %v4577_v5, %v8752_v36 }
 0x804   :  { %v4461_v37 = vpop.f32.mrf.mxu3 }
 0x805   :  { %v8755_v58 = vadd.f32 %v4461_v37, %v8669_v43 }
 0x807   :  { %v4582_v32 = vpop.f32.mrf.mxu0  ;;  %v4609_v61 = vadd.f32 %v4579_v9, %v8755_v58 }
 0x809   :  { %5655 = vmatmul.msk.bf16.gmra.mxu3 %vm1067_vm3, %v8543_v16 }
 0x80c   :  { %v4464_v63 = vpop.f32.mrf.mxu3 }
 0x80d   :  { %v4492_v59 = vadd.f32 %v4464_v63, %v8683_v7 }
 0x80f   :  { %v4610_v37 = vadd.f32 %v4582_v32, %v4492_v59 }
 0x814   :  { %v4466_v51 = vpop.f32.mrf.mxu3 }
 0x815   :  { %v4493_v40 = vadd.f32 %v4466_v51, %v8685_v27  ;;  %v4869_v27 = vld [vmem:[#allocation2 + $0x132] sm:$0xff] }
 0x819   :  { %5656 = vmatmul.msk.bf16.gmra.mxu3 %vm1067_vm3, %v8569_v23  ;;  %v4877_v23 = vpack.c.bf16 %v4869_v27, %v8717_v28 }
 0x81c   :  { %v4469_v57 = vpop.f32.mrf.mxu3 }
 0x81d   :  { %v8764_v6 = vadd.f32 %v4469_v57, %v8699_v33 }
 0x824   :  { %v4471_v15 = vpop.f32.mrf.mxu3 }
 0x825   :  { %v8767_v43 = vadd.f32 %v4471_v15, %v8701_v24  ;;  %v4725_v15 = vadd.f32 %v4692_v18, %v4607_v50 }
 0x827   :  { %v4843_v58 = vadd.f32 %v4810_v29, %v4725_v15 }
 0x829   :  { %5657 = vmatmul.msk.bf16.gmra.mxu3 %vm1067_vm3, %v8599_v1 }
 0x82c   :  { %v4474_v16 = vpop.f32.mrf.mxu3 }
 0x82d   :  { %v8772_v7 = vadd.f32 %v4474_v16, %v8715_v10 }
 0x834   :  { %v4476_v52 = vpop.f32.mrf.mxu3 }
 0x835   :  { %v8775_v2 = vadd.f32 %v4476_v52, %v8723_v26 }
 0x839   :  { %5658 = vmatmul.msk.bf16.gmra.mxu3 %vm1067_vm3, %v4877_v23 }
 0x83c   :  { %v4479_v33 = vpop.f32.mrf.mxu3 }
 0x83d   :  { %v8780_v24 = vadd.f32 %v4479_v33, %v8729_v62  ;;  %v4695_v62 = vpop.f32.mrf.mxu1 }
 0x83e   :  { %v4726_v16 = vadd.f32 %v4695_v62, %v4608_v35 }
 0x844   :  { %v4481_v60 = vpop.f32.mrf.mxu3 }
 0x845   :  { %v8783_v1 = vadd.f32 %v4481_v60, %v8731_v12  ;;  %v4813_v12 = vpop.f32.mrf.mxu2 }
 0x846   :  { %v4844_v59 = vadd.f32 %v4813_v12, %v4726_v16 }
 0x84c   :  { %v4916_v41 = vpop.f32.mrf.mxu3 }
 0x84d   :  { %v8786_v10 = vadd.f32 %v4916_v41, %v8736_v49  ;;  %v4697_v49 = vpop.f32.mrf.mxu1  ;;  %v4815_v39 = vpop.f32.mrf.mxu2 }
 0x84e   :  { %v4727_v27 = vadd.f32 %v4697_v49, %v4609_v61 }
 0x84f   :  { %v5013_v36 = vmul.f32 %v8786_v10, %v8786_v10 }
 0x854   :  { %v4918_v25 = vpop.f32.mrf.mxu3 }
 0x855   :  { %v8788_v26 = vadd.f32 %v4918_v25, %v4839_v54  ;;  %v4700_v45 = vpop.f32.mrf.mxu1  ;;  %v4818_v20 = vpop.f32.mrf.mxu2  ;;  %v4845_v25 = vadd.f32 %v4815_v39, %v4727_v27 }
 0x856   :  { %v4728_v23 = vadd.f32 %v4700_v45, %v4610_v37 }
 0x857   :  { %v5014_v14 = vmul.f32 %v8788_v26, %v8788_v26 }
 0x858   :  { %v4846_v31 = vadd.f32 %v4818_v20, %v4728_v23 }
 0x859   :  { %v5030_v5 = vsel %vm1067_vm3, %v5014_v14, 0.0 }
 0x85c   :  { %v4921_v28 = vpop.f32.mrf.mxu3 }
 0x85d   :  { %v8790_v53 = vadd.f32 %v4921_v28, %v4840_v48  ;;  %v4584_v48 = vpop.f32.mrf.mxu0  ;;  %v4702_v42 = vpop.f32.mrf.mxu1 }
 0x85e   :  { %v4820_v38 = vpop.f32.mrf.mxu2  ;;  %v4611_v63 = vadd.f32 %v4584_v48, %v4493_v40  ;;  %v4977_v40 = vsel %vm1067_vm3, %v8788_v26, 0.0 }
 0x85f   :  { %v5015_v41 = vmul.f32 %v8790_v53, %v8790_v53  ;;  %v4979_v62 = vsel %vm1067_vm3, %v8790_v53, 0.0 }
 0x860   :  { %v4729_v60 = vadd.f32 %v4702_v42, %v4611_v63 }
 0x861   :  { %v5032_v32 = vsel %vm1067_vm3, %v5015_v41, 0.0 }
 0x862   :  { %v4847_v12 = vadd.f32 %v4820_v38, %v4729_v60 }
 0x864   :  { %v4923_v47 = vpop.f32.mrf.mxu3 }
 0x865   :  { %v8792_v34 = vadd.f32 %v4923_v47, %v4841_v30  ;;  %v4587_v19 = vpop.f32.mrf.mxu0  ;;  %v4705_v11 = vpop.f32.mrf.mxu1 }
 0x866   :  { %v4823_v21 = vpop.f32.mrf.mxu2  ;;  %v4612_v33 = vadd.f32 %v4587_v19, %v8764_v6  ;;  %v4976_v6 = vsel %vm1067_vm3, %v8786_v10, 0.0 }
 0x867   :  { %v5016_v29 = vmul.f32 %v8792_v34, %v8792_v34  ;;  %v4978_v49 = vadd.f32 %v4977_v40, %v4976_v6  ;;  %v4981_v45 = vsel %vm1067_vm3, %v8792_v34, 0.0 }
 0x868   :  { %v4730_v18 = vadd.f32 %v4705_v11, %v4612_v33 }
 0x86a   :  { %v4848_v42 = vadd.f32 %v4823_v21, %v4730_v18 }
 0x86c   :  { %v4926_v8 = vpop.f32.mrf.mxu3 }
 0x86d   :  { %v8794_v44 = vadd.f32 %v4926_v8, %v4842_v4  ;;  %v4589_v56 = vpop.f32.mrf.mxu0  ;;  %v4707_v17 = vpop.f32.mrf.mxu1  ;;  %v5029_v8 = vsel %vm1067_vm3, %v5013_v36, 0.0 }
 0x86e   :  { %v8800_v0 = vpop.f32.mrf.mxu2  ;;  %v4613_v9 = vadd.f32 %v4589_v56, %v8767_v43  ;;  %v5031_v19 = vadd.f32 %v5030_v5, %v5029_v8  ;;  %v4980_v43 = vadd.f32 %v4979_v62, %v4978_v49  ;;  %v5034_v56 = vsel %vm1067_vm3, %v5016_v29, 0.0 }
 0x86f   :  { %v5017_v20 = vmul.f32 %v8794_v44, %v8794_v44  ;;  %v4983_v50 = vsel %vm1067_vm3, %v8794_v44, 0.0 }
 0x870   :  { %v4731_v37 = vadd.f32 %v4707_v17, %v4613_v9  ;;  %v5033_v21 = vadd.f32 %v5032_v32, %v5031_v19  ;;  %v4982_v63 = vadd.f32 %v4981_v45, %v4980_v43 }
 0x872   :  { %v5035_v23 = vadd.f32 %v5034_v56, %v5033_v21  ;;  %v4984_v17 = vadd.f32 %v4983_v50, %v4982_v63  ;;  %v4849_v60 = vadd.f32 %v8800_v0, %v4731_v37 }
 0x874   :  { %v4928_v54 = vpop.f32.mrf.mxu3 }
 0x875   :  { %v4592_v46 = vpop.f32.mrf.mxu0  ;;  %v4710_v55 = vpop.f32.mrf.mxu1  ;;  %v8827_v47 = vadd.f32 %v4928_v54, %v4843_v58 }
 0x876   :  { %v8807_v51 = vpop.f32.mrf.mxu2  ;;  %v4614_v54 = vadd.f32 %v4592_v46, %v8772_v7  ;;  %v5036_v7 = vsel %vm1067_vm3, %v5017_v20, 0.0 }
 0x877   :  { %v5018_v35 = vmul.f32 %v8827_v47, %v8827_v47  ;;  %v4985_v46 = vsel %vm1067_vm3, %v8827_v47, 0.0 }
 0x878   :  { %v4732_v27 = vadd.f32 %v4710_v55, %v4614_v54  ;;  %v5037_v55 = vadd.f32 %v5036_v7, %v5035_v23  ;;  %v4986_v58 = vadd.f32 %v4985_v46, %v4984_v17 }
 0x87c   :  { %v4931_v3 = vpop.f32.mrf.mxu3 }
 0x87d   :  { %v4594_v52 = vpop.f32.mrf.mxu0  ;;  %v4712_v28 = vpop.f32.mrf.mxu1  ;;  %v8836_v48 = vadd.f32 %v4931_v3, %v4844_v59 }
 0x87e   :  { %v4830_v38 = vpop.f32.mrf.mxu2  ;;  %v4615_v3 = vadd.f32 %v4594_v52, %v8775_v2  ;;  %v5038_v2 = vsel %vm1067_vm3, %v5018_v35, 0.0 }
 0x87f   :  { %v5019_v15 = vmul.f32 %v8836_v48, %v8836_v48  ;;  %v4987_v52 = vsel %vm1067_vm3, %v8836_v48, 0.0  ;;  %v5039_v0 = vadd.f32 %v5038_v2, %v5037_v55 }
 0x880   :  { %v4988_v18 = vadd.f32 %v4987_v52, %v4986_v58 }
 0x881   :  { %v5040_v59 = vsel %vm1067_vm3, %v5019_v15, 0.0 }
 0x884   :  { %v4933_v13 = vpop.f32.mrf.mxu3 }
 0x885   :  { %v4597_v11 = vpop.f32.mrf.mxu0  ;;  %v8844_v61 = vadd.f32 %v4933_v13, %v4845_v25  ;;  %v4715_v36 = vpop.f32.mrf.mxu1 }
 0x886   :  { %v4616_v13 = vadd.f32 %v4597_v11, %v8780_v24 }
 0x887   :  { %v5020_v33 = vmul.f32 %v8844_v61, %v8844_v61  ;;  %v4989_v40 = vsel %vm1067_vm3, %v8844_v61, 0.0 }
 0x888   :  { %v4990_v9 = vadd.f32 %v4989_v40, %v4988_v18 }
 0x88c   :  { %v8796_v30 = vpop.f32.mrf.mxu3 }
 0x88d   :  { %v8853_v16 = vadd.f32 %v8796_v30, %v4846_v31  ;;  %v4733_v30 = vadd.f32 %v4712_v28, %v4615_v3  ;;  %v4734_v31 = vadd.f32 %v4715_v36, %v4616_v13  ;;  %v5042_v28 = vsel %vm1067_vm3, %v5020_v33, 0.0  ;;  %v4599_v8 = vpop.f32.mrf.mxu0  ;;  %v4717_v21 = vpop.f32.mrf.mxu1 }
 0x88f   :  { %v5021_v41 = vmul.f32 %v8853_v16, %v8853_v16  ;;  %v4991_v6 = vsel %vm1067_vm3, %v8853_v16, 0.0  ;;  %v4851_v29 = vadd.f32 %v4830_v38, %v4733_v30 }
 0x890   :  { %v4992_v54 = vadd.f32 %v4991_v6, %v4990_v9 }
 0x894   :  { %v8798_v22 = vpop.f32.mrf.mxu3 }
 0x895   :  { %v8862_v14 = vadd.f32 %v8798_v22, %v4847_v12  ;;  %v4850_v22 = vadd.f32 %v8807_v51, %v4732_v27  ;;  %v4833_v12 = vpop.f32.mrf.mxu2  ;;  %v5044_v51 = vsel %vm1067_vm3, %v5021_v41, 0.0 }
 0x896   :  { %v4852_v20 = vadd.f32 %v4833_v12, %v4734_v31 }
 0x897   :  { %v5022_v5 = vmul.f32 %v8862_v14, %v8862_v14  ;;  %v4993_v49 = vsel %vm1067_vm3, %v8862_v14, 0.0 }
 0x898   :  { %v4994_v50 = vadd.f32 %v4993_v49, %v4992_v54 }
 0x899   :  { %v5046_v38 = vsel %vm1067_vm3, %v5022_v5, 0.0 }
 0x89c   :  { %v8802_v4 = vpop.f32.mrf.mxu3 }
 0x89d   :  { %v8871_v25 = vadd.f32 %v8802_v4, %v4848_v42  ;;  %v5041_v4 = vadd.f32 %v5040_v59, %v5039_v0  ;;  %v4617_v42 = vadd.f32 %v4599_v8, %v8783_v1 }
 0x89f   :  { %v5023_v32 = vmul.f32 %v8871_v25, %v8871_v25  ;;  %v4995_v19 = vsel %vm1067_vm3, %v8871_v25, 0.0  ;;  %v4735_v46 = vadd.f32 %v4717_v21, %v4617_v42 }
 0x8a0   :  { %v4996_v7 = vadd.f32 %v4995_v19, %v4994_v50 }
 0x8a4   :  { %v8809_v57 = vpop.f32.mrf.mxu3 }
 0x8a5   :  { %v8880_v62 = vadd.f32 %v8809_v57, %v4849_v60  ;;  %v5043_v57 = vadd.f32 %v5042_v28, %v5041_v4  ;;  %v4835_v60 = vpop.f32.mrf.mxu2 }
 0x8a6   :  { %v4853_v55 = vadd.f32 %v4835_v60, %v4735_v46 }
 0x8a7   :  { %v5024_v43 = vmul.f32 %v8880_v62, %v8880_v62  ;;  %v5045_v56 = vadd.f32 %v5044_v51, %v5043_v57  ;;  %v4997_v1 = vsel %vm1067_vm3, %v8880_v62, 0.0 }
 0x8a8   :  { %v4998_v17 = vadd.f32 %v4997_v1, %v4996_v7 }
 0x8a9   :  { %v5047_v63 = vadd.f32 %v5046_v38, %v5045_v56  ;;  %v5050_v15 = vsel %vm1067_vm3, %v5024_v43, 0.0 }
 0x8ac   :  { %v4946_v39 = vpop.f32.mrf.mxu3 }
 0x8ad   :  { %v8887_v45 = vadd.f32 %v4946_v39, %v4850_v22  ;;  %v5048_v39 = vsel %vm1067_vm3, %v5023_v32, 0.0 }
 0x8ae   :  { %v5049_v23 = vadd.f32 %v5048_v39, %v5047_v63 }
 0x8af   :  { %v5025_v37 = vmul.f32 %v8887_v45, %v8887_v45  ;;  %v4999_v27 = vsel %vm1067_vm3, %v8887_v45, 0.0 }
 0x8b0   :  { %v5051_v30 = vadd.f32 %v5050_v15, %v5049_v23  ;;  %v5000_v36 = vadd.f32 %v4999_v27, %v4998_v17  ;;  %v5659_v27 = vld [vmem:[%s8998_s5 + $0x4] sm:$0x1]  ;;  %s5705_s5 = smov [#allocation3]  }
 0x8b1   :  { %v5052_v2 = vsel %vm1067_vm3, %v5025_v37, 0.0 }
 0x8b2   :  { %v5053_v59 = vadd.f32 %v5052_v2, %v5051_v30  ;;  %v5660_v2 = vld [vmem:[%s8999_s6 + $0x4] sm:$0x1]  ;;  %s5175_s6 = sshll.u32 %s5705_s5, 4  ;;  %s5176_s6 = int_to_ptr.vmem [resolvable:$true] %s5175_s6 }
 0x8b4   :  { %v4948_v24 = vpop.f32.mrf.mxu3 }
 0x8b5   :  { %v8895_v11 = vadd.f32 %v4948_v24, %v4851_v29 }
 0x8b7   :  { %v5026_v13 = vmul.f32 %v8895_v11, %v8895_v11  ;;  %v5001_v52 = vsel %vm1067_vm3, %v8895_v11, 0.0 }
 0x8b8   :  { %v5002_v40 = vadd.f32 %v5001_v52, %v5000_v36 }
 0x8b9   :  { %v5054_v58 = vsel %vm1067_vm3, %v5026_v13, 0.0 }
 0x8ba   :  { %v5055_v0 = vadd.f32 %v5054_v58, %v5053_v59 }
 0x8bc   :  { %v4951_v35 = vpop.f32.mrf.mxu3 }
 0x8bd   :  { %v8902_v3 = vadd.f32 %v4951_v35, %v4852_v20 }
 0x8bf   :  { %v5027_v33 = vmul.f32 %v8902_v3, %v8902_v3  ;;  %v5003_v24 = vsel %vm1067_vm3, %v8902_v3, 0.0 }
 0x8c0   :  { %v5004_v18 = vadd.f32 %v5003_v24, %v5002_v40 }
 0x8c1   :  { %v5056_v22 = vsel %vm1067_vm3, %v5027_v33, 0.0 }
 0x8c2   :  { %v5057_v5 = vadd.f32 %v5056_v22, %v5055_v0 }
 0x8c4   :  { %v4953_v41 = vpop.f32.mrf.mxu3 }
 0x8c5   :  { %v4971_v31 = vadd.f32 %v4953_v41, %v4853_v55 }
 0x8c7   :  { %v5005_v28 = vsel %vm1067_vm3, %v4971_v31, 0.0  ;;  %v5028_v6 = vmul.f32 %v4971_v31, %v4971_v31 }
 0x8c8   :  { %v5006_v29 = vadd.f32 %v5005_v28, %v5004_v18 }
 0x8c9   :  { %v5058_v12 = vsel %vm1067_vm3, %v5028_v6, 0.0 }
 0x8ca   :  { %v5007_v4 = vrot.slane %v5006_v29, 4  ;;  %v5059_v9 = vadd.f32 %v5058_v12, %v5057_v5 }
 0x8cc   :  { %v5008_v8 = vadd.f32 %v5007_v4, %v5006_v29  ;;  %v5060_v51 = vrot.slane %v5059_v9, 4  ;;  %v9168_v29 = vld [vmem:[#allocation20_spill] sm:$0xff] }
 0x8ce   :  { %v5009_v49 = vrot.slane %v5008_v8, 2  ;;  %v5061_v32 = vadd.f32 %v5060_v51, %v5059_v9 }
 0x8d0   :  { %v5010_v20 = vadd.f32 %v5009_v49, %v5008_v8  ;;  %v5062_v42 = vrot.slane %v5061_v32, 2 }
 0x8d2   :  { %v5011_v57 = vrot.slane %v5010_v20, 1  ;;  %v5063_v54 = vadd.f32 %v5062_v42, %v5061_v32 }
 0x8d4   :  { %v5012_v38 = vadd.f32 %v5011_v57, %v5010_v20  ;;  %v5064_v19 = vrot.slane %v5063_v54, 1  ;;  %v9172_v57 = vld [vmem:[#allocation10_spill] sm:$0xff] }
 0x8d6   :  { %v5065_v43 = vadd.f32 %v5064_v19, %v5063_v54  ;;  %v5066_v56 = vmul.f32 0.0078125, %v5012_v38  ;;  %v9173_v54 = vmax.f32 %v9172_v57, 0.0  ;;  %v9174_v19 = vld [vmem:[#allocation15_spill] sm:$0xff] }
 0x8d8   :  { %v5067_v50 = vmul.f32 0.0078125, %v5065_v43  ;;  %v5068_v35 = vmul.f32 %v5066_v56, %v5066_v56  ;;  %v9175_v43 = vmax.f32 %v9174_v19, 0.0 }
 0x8da   :  { %v5069_v39 = vsub.f32 %v5067_v50, %v5068_v35  ;;  %v9176_v50 = vld [vmem:[#allocation8_spill] sm:$0xff] }
 0x8db   :  { %v9177_v35 = vmax.f32 %v9176_v50, 0.0 }
 0x8dc   :  { %v5070_v1 = vmax.f32 %v5069_v39, 0.0 }
 0x8de   :  { %v5071_v37 = vadd.f32 1e-05, %v5070_v1  ;;  %v9178_v1 = vld [vmem:[#allocation14_spill] sm:$0xff] }
 0x8e0   :  { %5674 = vrsqrt.f32 %v5071_v37  ;;  %vm5078_vm4 = vweird.f32 %v5071_v37 }
 0x8e6   :  { %v5675_v21 = vpop.eup %5674 }
 0x8e7   :  { %v5073_v63 = vmul.f32 %v5675_v21, %v5071_v37  ;;  %vm5079_vm2 = vweird.f32 %v5675_v21  ;;  %v9179_v37 = vmax.f32 %v9178_v1, 0.0 }
 0x8e8   :  { %vm5080_vm5 = vmor %vm5078_vm4, %vm5079_vm2 }
 0x8e9   :  { %v5074_v7 = vmul.f32 %v5675_v21, %v5073_v63  ;;  %v9180_v63 = vld [vmem:[#allocation7_spill] sm:$0xff] }
 0x8eb   :  { %v5075_v46 = vmul.f32 0.5, %v5074_v7  ;;  %v9181_v7 = vmax.f32 %v9180_v63, 0.0 }
 0x8ed   :  { %v5076_v15 = vsub.f32 1.5, %v5075_v46 }
 0x8ef   :  { %v5077_v13 = vmul.f32 %v5675_v21, %v5076_v15  ;;  %v9182_v15 = vld [vmem:[#allocation19_spill] sm:$0xff] }
 0x8f1   :  { %v5081_v23 = vsel %vm5080_vm5, %v5675_v21, %v5077_v13 }
 0x8f2   :  { %v5082_v17 = vmul.f32 %v5659_v27, %v5081_v23  ;;  %v9183_v27 = vmax.f32 %v9182_v15, 0.0 }
 0x8f4   :  { %v5083_v52 = vmul.f32 %v5082_v17, %v5066_v56  ;;  %v5086_v33 = vperm.slane %v5082_v17, 0  ;;  %v9184_v17 = vld [vmem:[#allocation6_spill] sm:$0xff] }
 0x8f6   :  { %v5084_v60 = vsub.f32 %v5660_v2, %v5083_v52  ;;  %v5103_v30 = vmul.f32 %v5086_v33, %v4971_v31  ;;  %v5088_v36 = vmul.f32 %v5086_v33, %v8786_v10  ;;  %v5089_v55 = vmul.f32 %v5086_v33, %v8788_v26 }
 0x8f7   :  { %v5090_v58 = vmul.f32 %v5086_v33, %v8790_v53  ;;  %v5091_v24 = vmul.f32 %v5086_v33, %v8792_v34  ;;  %v5092_v59 = vmul.f32 %v5086_v33, %v8794_v44  ;;  %v5093_v40 = vmul.f32 %v5086_v33, %v8827_v47 }
 0x8f8   :  { %v5105_v41 = vperm.slane %v5084_v60, 0  ;;  %v5094_v22 = vmul.f32 %v5086_v33, %v8836_v48  ;;  %v5095_v0 = vmul.f32 %v5086_v33, %v8844_v61  ;;  %v5096_v18 = vmul.f32 %v5086_v33, %v8853_v16 }
 0x8f9   :  { %v5097_v31 = vmul.f32 %v5086_v33, %v8862_v14  ;;  %v5098_v10 = vmul.f32 %v5086_v33, %v8871_v25  ;;  %v5099_v26 = vmul.f32 %v5086_v33, %v8880_v62  ;;  %v5100_v53 = vmul.f32 %v5086_v33, %v8887_v45 }
 0x8fa   :  { %v5122_v34 = vadd.f32 %v5105_v41, %v5103_v30  ;;  %v5101_v44 = vmul.f32 %v5086_v33, %v8895_v11  ;;  %v5102_v47 = vmul.f32 %v5086_v33, %v8902_v3  ;;  %v5107_v28 = vadd.f32 %v5105_v41, %v5088_v36  ;;  %v9170_v3 = vld [vmem:[#allocation12_spill] sm:$0xff]  ;;  %v9186_v36 = vld [vmem:[#allocation9_spill] sm:$0xff] }
 0x8fb   :  { %v5108_v6 = vadd.f32 %v5105_v41, %v5089_v55  ;;  %v5109_v48 = vadd.f32 %v5105_v41, %v5090_v58  ;;  %v5110_v5 = vadd.f32 %v5105_v41, %v5091_v24  ;;  %v5111_v61 = vadd.f32 %v5105_v41, %v5092_v59  ;;  %v9188_v59 = vld [vmem:[#allocation21_spill] sm:$0xff] }
 0x8fc   :  { %v9169_v16 = vmax.f32 %v9168_v29, 0.0  ;;  %v5112_v14 = vadd.f32 %v5105_v41, %v5093_v40  ;;  %v5113_v4 = vadd.f32 %v5105_v41, %v5094_v22  ;;  %v5114_v25 = vadd.f32 %v5105_v41, %v5095_v0  ;;  %v9190_v0 = vld [vmem:[#allocation17_spill] sm:$0xff] }
 0x8fd   :  { %v5115_v9 = vadd.f32 %v5105_v41, %v5096_v18  ;;  %v5116_v62 = vadd.f32 %v5105_v41, %v5097_v31  ;;  %v5117_v8 = vadd.f32 %v5105_v41, %v5098_v10  ;;  %v5118_v45 = vadd.f32 %v5105_v41, %v5099_v26  ;;  %v9192_v26 = vld [vmem:[#allocation13_spill] sm:$0xff] }
 0x8fe   :  { %v5138_v12 = vadd.f32 %v5122_v34, %v9169_v16  ;;  %v5119_v49 = vadd.f32 %v5105_v41, %v5100_v53  ;;  %v5120_v11 = vadd.f32 %v5105_v41, %v5101_v44  ;;  %v5121_v32 = vadd.f32 %v5105_v41, %v5102_v47  ;;  %v9194_v47 = vld [vmem:[#allocation24_spill] sm:$0xff] }
 0x8ff   :  { %v9171_v20 = vmax.f32 %v9170_v3, 0.0  ;;  %v5124_v38 = vadd.f32 %v5108_v6, %v9173_v54  ;;  %v5125_v56 = vadd.f32 %v5109_v48, %v9175_v43  ;;  %v5126_v39 = vadd.f32 %v5110_v5, %v9177_v35  ;;  %v9196_v5 = vld [vmem:[#allocation28_spill] sm:$0xff] }
 0x900   :  { %v5154_v51 = vmax.f32 %v5138_v12, 0.0  ;;  %v5127_v21 = vadd.f32 %v5111_v61, %v9179_v37  ;;  %v5128_v46 = vadd.f32 %v5112_v14, %v9181_v7  ;;  %v5129_v13 = vadd.f32 %v5113_v4, %v9183_v27  ;;  %v9198_v12 = vld [vmem:[#allocation25_spill] sm:$0xff] }
 0x901   :  { %v5123_v42 = vadd.f32 %v5107_v28, %v9171_v20  ;;  %v9185_v2 = vmax.f32 %v9184_v17, 0.0  ;;  %v5140_v33 = vmax.f32 %v5124_v38, 0.0  ;;  %v5141_v60 = vmax.f32 %v5125_v56, 0.0 }
 0x902   :  { %5170 = vst.msk [vmem:[#allocation3 + $0x78] sm:$0xff] %vm1067_vm3, %v5154_v51  ;;  %v5142_v30 = vmax.f32 %v5126_v39, 0.0  ;;  %v9187_v55 = vmax.f32 %v9186_v36, 0.0  ;;  %v5143_v24 = vmax.f32 %v5127_v21, 0.0  ;;  %v9189_v40 = vmax.f32 %v9188_v59, 0.0 }
 0x903   :  { %v5139_v23 = vmax.f32 %v5123_v42, 0.0  ;;  %v5130_v52 = vadd.f32 %v5114_v25, %v9185_v2  ;;  %v5144_v22 = vmax.f32 %v5128_v46, 0.0  ;;  %5156 = vst.msk [vmem:[#allocation3 + $0x8] sm:$0xff] %vm1067_vm3, %v5140_v33  ;;  %v9191_v18 = vmax.f32 %v9190_v0, 0.0 }
 0x904   :  { %v5131_v58 = vadd.f32 %v5115_v9, %v9187_v55  ;;  %v5132_v41 = vadd.f32 %v5116_v62, %v9189_v40  ;;  %v5145_v10 = vmax.f32 %v5129_v13, 0.0  ;;  %5157 = vst.msk [vmem:[#allocation3 + $0x10] sm:$0xff] %vm1067_vm3, %v5141_v60  ;;  %v9193_v53 = vmax.f32 %v9192_v26, 0.0 }
 0x905   :  { %5155 = vst.msk [vmem:[#allocation3] sm:$0xff] %vm1067_vm3, %v5139_v23  ;;  %v5133_v31 = vadd.f32 %v5117_v8, %v9191_v18  ;;  %v5146_v44 = vmax.f32 %v5130_v52, 0.0  ;;  %v9195_v28 = vmax.f32 %v9194_v47, 0.0  ;;  %v9197_v61 = vmax.f32 %v9196_v5, 0.0 }
 0x906   :  { %v5134_v34 = vadd.f32 %v5118_v45, %v9193_v53  ;;  %5158 = vst.msk [vmem:[#allocation3 + $0x18] sm:$0xff] %vm1067_vm3, %v5142_v30  ;;  %v5147_v48 = vmax.f32 %v5131_v58, 0.0  ;;  %v5148_v16 = vmax.f32 %v5132_v41, 0.0  ;;  %v9199_v14 = vmax.f32 %v9198_v12, 0.0 }
 0x907   :  { %v5135_v6 = vadd.f32 %v5119_v49, %v9195_v28  ;;  %5159 = vst.msk [vmem:[#allocation3 + $0x20] sm:$0xff] %vm1067_vm3, %v5143_v24  ;;  %v5136_v29 = vadd.f32 %v5120_v11, %v9197_v61  ;;  %v5149_v25 = vmax.f32 %v5133_v31, 0.0 }
 0x908   :  { %5160 = vst.msk [vmem:[#allocation3 + $0x28] sm:$0xff] %vm1067_vm3, %v5144_v22  ;;  %v5137_v4 = vadd.f32 %v5121_v32, %v9199_v14  ;;  %v5150_v9 = vmax.f32 %v5134_v34, 0.0 }
 0x909   :  { %5161 = vst.msk [vmem:[#allocation3 + $0x30] sm:$0xff] %vm1067_vm3, %v5145_v10  ;;  %v5151_v62 = vmax.f32 %v5135_v6, 0.0  ;;  %v5152_v8 = vmax.f32 %v5136_v29, 0.0 }
 0x90a   :  { %5162 = vst.msk [vmem:[#allocation3 + $0x38] sm:$0xff] %vm1067_vm3, %v5146_v44  ;;  %v5153_v45 = vmax.f32 %v5137_v4, 0.0 }
 0x90b   :  { %5163 = vst.msk [vmem:[#allocation3 + $0x40] sm:$0xff] %vm1067_vm3, %v5147_v48 }
 0x90c   :  { %5164 = vst.msk [vmem:[#allocation3 + $0x48] sm:$0xff] %vm1067_vm3, %v5148_v16 }
 0x90d   :  { %5165 = vst.msk [vmem:[#allocation3 + $0x50] sm:$0xff] %vm1067_vm3, %v5149_v25 }
 0x90e   :  { %5166 = vst.msk [vmem:[#allocation3 + $0x58] sm:$0xff] %vm1067_vm3, %v5150_v9 }
 0x90f   :  { %5167 = vst.msk [vmem:[#allocation3 + $0x60] sm:$0xff] %vm1067_vm3, %v5151_v62 }
 0x910   :  { %5168 = vst.msk [vmem:[#allocation3 + $0x68] sm:$0xff] %vm1067_vm3, %v5152_v8 }
 0x911   :  { %5169 = vst.msk [vmem:[#allocation3 + $0x70] sm:$0xff] %vm1067_vm3, %v5153_v45 }
 0x912   :  { %5183 = dma.vmem_to_hbm [thread:$0]  %s5176_s6, 2048, %s5178_s0, [#allocation4], %s5706_s2, %s5706_s2, %s5704_s8  }
 0x913   :  { %5700 = dma.done.wait [#allocation4], 2048  }
 0x914   :  { %5701 = vsyncadd [#allocation4], 4294965248 }
 0x915   :  { %5188 = vsyncpa [#allocation4], 1 }

</bundles_post_ra>
